<compile_context>
chip_gen: v7x
topology: tpu7x:2x2x1
jax: 0.10.0
libtpu: 0.0.40
codegen_flags: <defaults>
</compile_context>

<pallas_src>
import functools

import jax
import jax.numpy as jnp
from jax import lax
from jax.experimental import pallas as pl
from jax.experimental.pallas import tpu as pltpu


# -------------------------- in-kernel building blocks --------------------------

def _layer_norm(s, g, b, eps):
    """LayerNorm over the last axis; s (L,E) f32, g/b (1,E) f32."""
    mu = jnp.mean(s, axis=-1, keepdims=True)
    var = jnp.mean((s - mu) ** 2, axis=-1, keepdims=True)
    return (s - mu) * lax.rsqrt(var + eps) * g + b


def _mha(q_all, k_all, v_all, keep, num_heads):
    """Multi-head attention on already-projected activations.

    q_all: (Lq, E) f32, already scaled by 1/sqrt(E).
    k_all, v_all: (Lk, E) f32.  keep: (Lq, Lk) bool mask or None.
    Per-head context stays register-resident and is concatenated once (no VMEM
    scratch / masked partial stores).  Returns (Lq, E) f32.
    """
    Lq, E = q_all.shape
    hd = E // num_heads
    qb = q_all.astype(jnp.bfloat16)
    kb = k_all.astype(jnp.bfloat16)
    vb = v_all.astype(jnp.bfloat16)
    ctx_heads = []
    for h in range(num_heads):                                # static, tiny
        sl = slice(h * hd, (h + 1) * hd)
        # scores = q_h @ k_h^T (contract head dim), f32 accumulation
        s = lax.dot_general(qb[:, sl], kb[:, sl], (((1,), (1,)), ((), ())),
                            preferred_element_type=jnp.float32)          # (Lq, Lk)
        if keep is not None:
            # PyTorch: masked_fill(-1e20) then scale; exp -> 0 either way.
            s = jnp.where(keep, s, -1e20)
        s = s - jnp.max(s, axis=-1, keepdims=True)
        p = jnp.exp(s)
        p = p / jnp.sum(p, axis=-1, keepdims=True)                        # exact softmax
        ctx_heads.append(jnp.dot(p.astype(jnp.bfloat16), vb[:, sl],
                                 preferred_element_type=jnp.float32))     # (Lq, hd)
    return jnp.concatenate(ctx_heads, axis=-1)                            # (Lq, E)


# -------------------------- single fused decoder-stack kernel --------------------------

def _decoder_stack_kernel(x_ref, enc_ref,
                          self_wqkv_ref, self_wo_ref, norm_g_ref, norm_b_ref,
                          cross_wq_ref, cross_wkv_ref, cross_wo_ref,
                          ln1_g_ref, ln1_b_ref,
                          ff_w0_ref, ff_b0_ref, ff_w1_ref, ff_b1_ref,
                          ln2_g_ref, ln2_b_ref,
                          wfc_ref, bfc_ref,
                          out_ref, *, num_layers, num_heads, scale, eps):
    """One batch element per grid step; static Python loop over the layer stack.

    x_ref   : (1, L, E)  f32   token+positional embedding (residual stream source)
    enc_ref : (1, Lk, E) f32   encoder output (keys/values for cross-attention)
    stacked weights carry a leading (num_layers) axis; out_ref: (1, L, Vpad) f32.
    """
    L, E = x_ref.shape[1], x_ref.shape[2]

    x = x_ref[0]                                    # (L, E) f32 residual stream
    enc_b = enc_ref[0].astype(jnp.bfloat16)         # (Lk, E) loaded once, reused per layer

    # Causal trg_mask generated in-kernel (no mask DMA).
    row = lax.broadcasted_iota(jnp.int32, (L, L), 0)
    col = lax.broadcasted_iota(jnp.int32, (L, L), 1)
    causal_keep = row >= col

    for l in range(num_layers):                     # static unroll over layers
        # ---- masked self-attention + residual + LayerNorm (DecoderBlock.norm) ----
        qkv = jnp.dot(x.astype(jnp.bfloat16), self_wqkv_ref[l],
                      preferred_element_type=jnp.float32)                 # (L, 3E)
        ctx = _mha(qkv[:, :E] * scale, qkv[:, E:2 * E], qkv[:, 2 * E:],
                   causal_keep, num_heads)
        attn = jnp.dot(ctx.astype(jnp.bfloat16), self_wo_ref[l],
                       preferred_element_type=jnp.float32)                # (L, E)
        x = _layer_norm(attn + x, norm_g_ref[l], norm_b_ref[l], eps)

        # ---- cross-attention over encoder output + residual + LayerNorm1 ----
        # src_mask is all-ones -> unmasked; Wq / Wkv are separate lane-dense operands.
        q_all = jnp.dot(x.astype(jnp.bfloat16), cross_wq_ref[l],
                        preferred_element_type=jnp.float32) * scale       # (L, E)
        kv = jnp.dot(enc_b, cross_wkv_ref[l],
                     preferred_element_type=jnp.float32)                  # (Lk, 2E)
        ctx = _mha(q_all, kv[:, :E], kv[:, E:], None, num_heads)
        attn = jnp.dot(ctx.astype(jnp.bfloat16), cross_wo_ref[l],
                       preferred_element_type=jnp.float32)
        x = _layer_norm(attn + x, ln1_g_ref[l], ln1_b_ref[l], eps)

        # ---- FFN (ff0 -> ReLU -> ff1) + residual + LayerNorm2 ----
        h = jnp.dot(x.astype(jnp.bfloat16), ff_w0_ref[l],
                    preferred_element_type=jnp.float32) + ff_b0_ref[l]    # (L, F)
        h = jnp.maximum(h, 0.0)
        y = jnp.dot(h.astype(jnp.bfloat16), ff_w1_ref[l],
                    preferred_element_type=jnp.float32) + ff_b1_ref[l]    # (L, E)
        x = _layer_norm(x + y, ln2_g_ref[l], ln2_b_ref[l], eps)

    # ---- final vocab projection (lane-padded to 128-wide unmasked stores) ----
    out_ref[0] = jnp.dot(x.astype(jnp.bfloat16), wfc_ref[...],
                         preferred_element_type=jnp.float32) + bfc_ref[...]


# -------------------------- wrapper --------------------------

def decoder_forward(params, tokens, enc_out, src_mask, trg_mask, *, num_heads, vocab):
    """LayerNorm'd decoder stack + vocab projection. tokens (bs,L) int32, enc_out (bs,Lk,E)."""
    bs, L = tokens.shape
    E = params["word_emb"].shape[1]
    Lk = enc_out.shape[1]
    NL = params["self_wqkv"].shape[0]
    F = params["ff_w0"].shape[2]
    Vp = params["w_fc_pad"].shape[1]

    # TODO(synk): dropout is stochastic in training; modeled as identity (eval mode).
    # TODO(synk): masks are baked in-kernel (causal trg_mask, all-ones src_mask);
    #             arbitrary mask tensors passed here are not plumbed into the kernel.
    # Embedding gathers stay in plain JAX (no Pallas win for tiny gathers).
    positions = jnp.arange(L)
    x = (params["word_emb"][tokens] + params["pos_emb"][positions][None, :, :]).astype(jnp.float32)
    enc_out = enc_out.astype(jnp.float32)

    scale = 1.0 / (float(E) ** 0.5)   # torch divides by sqrt(embed_dim), not head_dim
    kernel = functools.partial(_decoder_stack_kernel, num_layers=NL,
                               num_heads=num_heads, scale=scale, eps=1e-5)

    def const(shape):
        nd = len(shape)
        return pl.BlockSpec(shape, lambda i, _nd=nd: (0,) * _nd)

    out = pl.pallas_call(
        kernel,
        out_shape=jax.ShapeDtypeStruct((bs, L, Vp), jnp.float32),
        grid=(bs,),
        in_specs=[
            pl.BlockSpec((1, L, E), lambda i: (i, 0, 0)),       # x (residual stream source)
            pl.BlockSpec((1, Lk, E), lambda i: (i, 0, 0)),      # enc_out
            const((NL, E, 3 * E)),                              # self_wqkv
            const((NL, E, E)),                                  # self_wo
            const((NL, 1, E)), const((NL, 1, E)),               # norm gamma / beta
            const((NL, E, E)),                                  # cross_wq
            const((NL, E, 2 * E)),                              # cross_wkv
            const((NL, E, E)),                                  # cross_wo
            const((NL, 1, E)), const((NL, 1, E)),               # ln1 gamma / beta
            const((NL, E, F)), const((NL, 1, F)),               # ff_w0, ff_b0
            const((NL, F, E)), const((NL, 1, E)),               # ff_w1, ff_b1
            const((NL, 1, E)), const((NL, 1, E)),               # ln2 gamma / beta
            const((E, Vp)), const((1, Vp)),                     # w_fc_pad, b_fc_pad
        ],
        out_specs=pl.BlockSpec((1, L, Vp), lambda i: (i, 0, 0)),
        compiler_params=pltpu.CompilerParams(
            # "parallel" so v7x's two TensorCores each take one batch element;
            # on v5e/v6e this is just 2 cheap sequential grid steps.
            dimension_semantics=("parallel",)),
    )(x, enc_out,
      params["self_wqkv"], params["self_wo"], params["norm_g"], params["norm_b"],
      params["cross_wq"], params["cross_wkv"], params["cross_wo"],
      params["ln1_g"], params["ln1_b"],
      params["ff_w0"], params["ff_b0"], params["ff_w1"], params["ff_b1"],
      params["ln2_g"], params["ln2_b"],
      params["w_fc_pad"], params["b_fc_pad"])
    return out[:, :, :vocab]


# -------------------------- deterministic parameter init --------------------------

def init_decoder_params(key, vocab, E, num_layers, fe, max_length):
    F = fe * E
    s = 0.02
    k_word, k_pos, k_layers, k_fc = jax.random.split(key, 4)

    def norm(k, shape):
        return jax.random.normal(k, shape, jnp.float32) * s

    self_wqkv, self_wo = [], []
    cross_wq, cross_wkv, cross_wo = [], [], []
    ff_w0, ff_b0, ff_w1, ff_b1 = [], [], [], []
    for lk in jax.random.split(k_layers, num_layers):
        sub = jax.random.split(lk, 12)
        self_wqkv.append(jnp.concatenate(
            [norm(sub[0], (E, E)), norm(sub[1], (E, E)), norm(sub[2], (E, E))], axis=1))
        self_wo.append(norm(sub[3], (E, E)))
        cross_wq.append(norm(sub[4], (E, E)))
        cross_wkv.append(jnp.concatenate(
            [norm(sub[5], (E, E)), norm(sub[6], (E, E))], axis=1))
        cross_wo.append(norm(sub[7], (E, E)))
        ff_w0.append(norm(sub[8], (E, F)))
        ff_b0.append(norm(sub[9], (1, F)))
        ff_w1.append(norm(sub[10], (F, E)))
        ff_b1.append(norm(sub[11], (1, E)))

    # Final fc: lane-pad the vocab dim to a multiple of 128 (unmasked stores in-kernel).
    Vp = max(128, ((vocab + 127) // 128) * 128)
    kfc_w, kfc_b = jax.random.split(k_fc, 2)
    w_fc = norm(kfc_w, (E, vocab))
    b_fc = norm(kfc_b, (1, vocab))
    w_fc_pad = jnp.zeros((E, Vp), jnp.float32).at[:, :vocab].set(w_fc).astype(jnp.bfloat16)
    b_fc_pad = jnp.zeros((1, Vp), jnp.float32).at[:, :vocab].set(b_fc)

    ones_ln = jnp.ones((num_layers, 1, E), jnp.float32)
    zeros_ln = jnp.zeros((num_layers, 1, E), jnp.float32)

    return {
        "word_emb": norm(k_word, (vocab, E)),
        "pos_emb": norm(k_pos, (max_length, E)),
        "self_wqkv": jnp.stack(self_wqkv).astype(jnp.bfloat16),   # (NL, E, 3E)
        "self_wo": jnp.stack(self_wo).astype(jnp.bfloat16),       # (NL, E, E)
        "norm_g": ones_ln, "norm_b": zeros_ln,
        "cross_wq": jnp.stack(cross_wq).astype(jnp.bfloat16),     # (NL, E, E)
        "cross_wkv": jnp.stack(cross_wkv).astype(jnp.bfloat16),   # (NL, E, 2E)
        "cross_wo": jnp.stack(cross_wo).astype(jnp.bfloat16),     # (NL, E, E)
        "ln1_g": ones_ln, "ln1_b": zeros_ln,
        "ln2_g": ones_ln, "ln2_b": zeros_ln,
        "ff_w0": jnp.stack(ff_w0).astype(jnp.bfloat16),           # (NL, E, F)
        "ff_b0": jnp.stack(ff_b0),                                 # (NL, 1, F)
        "ff_w1": jnp.stack(ff_w1).astype(jnp.bfloat16),           # (NL, F, E)
        "ff_b1": jnp.stack(ff_b1),                                 # (NL, 1, E)
        "w_fc_pad": w_fc_pad,                                      # (E, Vp)
        "b_fc_pad": b_fc_pad,                                      # (1, Vp)
    }


# -------------------------- main --------------------------

if __name__ == "__main__":
    bs = 2
    seq = 8            # target sequence length
    enc_seq = 8        # encoder output sequence length
    embed_dim = 32
    num_heads = 4
    forward_expansion = 2
    num_layers = 2
    trg_vocab_size = 16
    max_length = 16

    root = jax.random.PRNGKey(0)
    k_par, k_tok, k_enc = jax.random.split(root, 3)

    params = init_decoder_params(k_par, trg_vocab_size, embed_dim,
                                 num_layers, forward_expansion, max_length)

    tokens = jax.random.randint(k_tok, (bs, seq), 0, trg_vocab_size, dtype=jnp.int32)
    enc_out = jax.random.normal(k_enc, (bs, enc_seq, embed_dim), jnp.float32)

    # Masks kept only for interface fidelity with the PyTorch module (causal trg_mask,
    # all-ones src_mask); the fused kernel implements these semantics in-kernel.
    trg_mask = jnp.broadcast_to(
        jnp.tril(jnp.ones((seq, seq), jnp.float32))[None, None, :, :], (bs, 1, seq, seq))
    src_mask = jnp.ones((bs, 1, 1, enc_seq), jnp.float32)

    fwd = jax.jit(functools.partial(decoder_forward,
                                    num_heads=num_heads, vocab=trg_vocab_size))
    out = fwd(params, tokens, enc_out, src_mask, trg_mask)
    out = jax.block_until_ready(out)

    assert out.shape == (bs, seq, trg_vocab_size), out.shape
    assert bool(jnp.all(jnp.isfinite(out)))
    print("KERNEL_OK")
</pallas_src>

<mosaic_0001>
module attributes {stable_mosaic.version = 11 : i64} {
  func.func @_decoder_stack_kernel(%arg0: i32, %arg1: memref<1x8x32xf32, #tpu.memory_space<vmem>>, %arg2: memref<1x8x32xf32, #tpu.memory_space<vmem>>, %arg3: memref<2x32x96xbf16, #tpu.memory_space<vmem>>, %arg4: memref<2x32x32xbf16, #tpu.memory_space<vmem>>, %arg5: memref<2x1x32xf32, #tpu.memory_space<vmem>>, %arg6: memref<2x1x32xf32, #tpu.memory_space<vmem>>, %arg7: memref<2x32x32xbf16, #tpu.memory_space<vmem>>, %arg8: memref<2x32x64xbf16, #tpu.memory_space<vmem>>, %arg9: memref<2x32x32xbf16, #tpu.memory_space<vmem>>, %arg10: memref<2x1x32xf32, #tpu.memory_space<vmem>>, %arg11: memref<2x1x32xf32, #tpu.memory_space<vmem>>, %arg12: memref<2x32x64xbf16, #tpu.memory_space<vmem>>, %arg13: memref<2x1x64xf32, #tpu.memory_space<vmem>>, %arg14: memref<2x64x32xbf16, #tpu.memory_space<vmem>>, %arg15: memref<2x1x32xf32, #tpu.memory_space<vmem>>, %arg16: memref<2x1x32xf32, #tpu.memory_space<vmem>>, %arg17: memref<2x1x32xf32, #tpu.memory_space<vmem>>, %arg18: memref<32x128xbf16, #tpu.memory_space<vmem>>, %arg19: memref<1x128xf32, #tpu.memory_space<vmem>>, %arg20: memref<1x8x128xf32, #tpu.memory_space<vmem>>) attributes {dimension_semantics = [#tpu.dimension_semantics<parallel>], iteration_bounds = array<i64: 2>, scalar_prefetch = 0 : i64, scratch_operands = 0 : i64, tpu.core_type = #tpu.core_type<tc>, window_params = [{transform_indices = @transform_0, window_bounds = array<i64: 1, 8, 32>}, {transform_indices = @transform_1, window_bounds = array<i64: 1, 8, 32>}, {pipeline_mode = #tpu.pipeline_mode<synchronous>, transform_indices = @transform_2, window_bounds = array<i64: 2, 32, 96>}, {pipeline_mode = #tpu.pipeline_mode<synchronous>, transform_indices = @transform_3, window_bounds = array<i64: 2, 32, 32>}, {pipeline_mode = #tpu.pipeline_mode<synchronous>, transform_indices = @transform_4, window_bounds = array<i64: 2, 1, 32>}, {pipeline_mode = #tpu.pipeline_mode<synchronous>, transform_indices = @transform_5, window_bounds = array<i64: 2, 1, 32>}, {pipeline_mode = #tpu.pipeline_mode<synchronous>, transform_indices = @transform_6, window_bounds = array<i64: 2, 32, 32>}, {pipeline_mode = #tpu.pipeline_mode<synchronous>, transform_indices = @transform_7, window_bounds = array<i64: 2, 32, 64>}, {pipeline_mode = #tpu.pipeline_mode<synchronous>, transform_indices = @transform_8, window_bounds = array<i64: 2, 32, 32>}, {pipeline_mode = #tpu.pipeline_mode<synchronous>, transform_indices = @transform_9, window_bounds = array<i64: 2, 1, 32>}, {pipeline_mode = #tpu.pipeline_mode<synchronous>, transform_indices = @transform_10, window_bounds = array<i64: 2, 1, 32>}, {pipeline_mode = #tpu.pipeline_mode<synchronous>, transform_indices = @transform_11, window_bounds = array<i64: 2, 32, 64>}, {pipeline_mode = #tpu.pipeline_mode<synchronous>, transform_indices = @transform_12, window_bounds = array<i64: 2, 1, 64>}, {pipeline_mode = #tpu.pipeline_mode<synchronous>, transform_indices = @transform_13, window_bounds = array<i64: 2, 64, 32>}, {pipeline_mode = #tpu.pipeline_mode<synchronous>, transform_indices = @transform_14, window_bounds = array<i64: 2, 1, 32>}, {pipeline_mode = #tpu.pipeline_mode<synchronous>, transform_indices = @transform_15, window_bounds = array<i64: 2, 1, 32>}, {pipeline_mode = #tpu.pipeline_mode<synchronous>, transform_indices = @transform_16, window_bounds = array<i64: 2, 1, 32>}, {pipeline_mode = #tpu.pipeline_mode<synchronous>, transform_indices = @transform_17, window_bounds = array<i64: 32, 128>}, {pipeline_mode = #tpu.pipeline_mode<synchronous>, transform_indices = @transform_18, window_bounds = array<i64: 1, 128>}, {transform_indices = @transform_19, window_bounds = array<i64: 1, 8, 128>}]} {
    %c0 = arith.constant 0 : index
    %c0_0 = arith.constant 0 : index
    %c0_1 = arith.constant 0 : index
    %0 = vector.load %arg1[%c0, %c0_0, %c0_1] : memref<1x8x32xf32, #tpu.memory_space<vmem>>, vector<1x8x32xf32>
    %1 = vector.shape_cast %0 : vector<1x8x32xf32> to vector<8x32xf32>
    %c0_2 = arith.constant 0 : index
    %c0_3 = arith.constant 0 : index
    %c0_4 = arith.constant 0 : index
    %2 = vector.load %arg2[%c0_2, %c0_3, %c0_4] : memref<1x8x32xf32, #tpu.memory_space<vmem>>, vector<1x8x32xf32>
    %3 = vector.shape_cast %2 : vector<1x8x32xf32> to vector<8x32xf32>
    %4 = arith.truncf %3 : vector<8x32xf32> to vector<8x32xbf16>
    %5 = tpu.iota {dimensions = array<i32: 0>} : vector<8x8xi32>
    %6 = tpu.iota {dimensions = array<i32: 1>} : vector<8x8xi32>
    %7 = arith.cmpi sge, %5, %6 : vector<8x8xi32>
    %8 = arith.truncf %1 : vector<8x32xf32> to vector<8x32xbf16>
    %c0_5 = arith.constant 0 : index
    %c0_6 = arith.constant 0 : index
    %c0_7 = arith.constant 0 : index
    %9 = vector.load %arg3[%c0_5, %c0_6, %c0_7] : memref<2x32x96xbf16, #tpu.memory_space<vmem>>, vector<1x32x96xbf16>
    %10 = vector.shape_cast %9 : vector<1x32x96xbf16> to vector<32x96xbf16>
    %cst = arith.constant dense<0.000000e+00> : vector<8x96xf32>
    %11 = tpu.matmul %8, %10, %cst {dimension_numbers = #tpu.dot_dimension_numbers<[1], [0], [0], [1], [0, 0, 1, 1], [], []>} : vector<8x32xbf16>, vector<32x96xbf16>, vector<8x96xf32> -> vector<8x96xf32>
    %12 = vector.extract_strided_slice %11 {offsets = [0, 0], sizes = [8, 32], strides = [1, 1]} : vector<8x96xf32> to vector<8x32xf32>
    %cst_8 = arith.constant 0.176776692 : f32
    %13 = vector.broadcast %cst_8 : f32 to vector<8x32xf32>
    %14 = arith.mulf %12, %13 : vector<8x32xf32>
    %15 = vector.extract_strided_slice %11 {offsets = [0, 32], sizes = [8, 32], strides = [1, 1]} : vector<8x96xf32> to vector<8x32xf32>
    %16 = vector.extract_strided_slice %11 {offsets = [0, 64], sizes = [8, 32], strides = [1, 1]} : vector<8x96xf32> to vector<8x32xf32>
    %17 = arith.truncf %14 : vector<8x32xf32> to vector<8x32xbf16>
    %18 = arith.truncf %15 : vector<8x32xf32> to vector<8x32xbf16>
    %19 = arith.truncf %16 : vector<8x32xf32> to vector<8x32xbf16>
    %20 = vector.extract_strided_slice %17 {offsets = [0, 0], sizes = [8, 8], strides = [1, 1]} : vector<8x32xbf16> to vector<8x8xbf16>
    %21 = vector.extract_strided_slice %18 {offsets = [0, 0], sizes = [8, 8], strides = [1, 1]} : vector<8x32xbf16> to vector<8x8xbf16>
    %cst_9 = arith.constant dense<0.000000e+00> : vector<8x8xf32>
    %22 = tpu.matmul %20, %21, %cst_9 {dimension_numbers = #tpu.dot_dimension_numbers<[1], [1], [0], [0], [0, 0, 1, 0], [], []>} : vector<8x8xbf16>, vector<8x8xbf16>, vector<8x8xf32> -> vector<8x8xf32>
    %cst_10 = arith.constant -1.000000e+20 : f32
    %23 = vector.broadcast %cst_10 : f32 to vector<8x8xf32>
    %24 = arith.select %7, %22, %23 : vector<8x8xi1>, vector<8x8xf32>
    %cst_11 = arith.constant dense<0xFF800000> : vector<8xf32>
    %25 = vector.multi_reduction <maximumf>, %24, %cst_11 [1] : vector<8x8xf32> to vector<8xf32>
    %26 = vector.shape_cast %25 : vector<8xf32> to vector<8x1xf32>
    %27 = vector.broadcast %26 : vector<8x1xf32> to vector<8x8xf32>
    %28 = arith.subf %24, %27 : vector<8x8xf32>
    %29 = math.exp %28 : vector<8x8xf32>
    %cst_12 = arith.constant dense<0.000000e+00> : vector<8xf32>
    %30 = vector.multi_reduction <add>, %29, %cst_12 [1] : vector<8x8xf32> to vector<8xf32>
    %31 = vector.shape_cast %30 : vector<8xf32> to vector<8x1xf32>
    %32 = vector.broadcast %31 : vector<8x1xf32> to vector<8x8xf32>
    %33 = arith.divf %29, %32 : vector<8x8xf32>
    %34 = arith.truncf %33 : vector<8x8xf32> to vector<8x8xbf16>
    %35 = vector.extract_strided_slice %19 {offsets = [0, 0], sizes = [8, 8], strides = [1, 1]} : vector<8x32xbf16> to vector<8x8xbf16>
    %cst_13 = arith.constant dense<0.000000e+00> : vector<8x8xf32>
    %36 = tpu.matmul %34, %35, %cst_13 {dimension_numbers = #tpu.dot_dimension_numbers<[1], [0], [0], [1], [0, 0, 1, 1], [], []>} : vector<8x8xbf16>, vector<8x8xbf16>, vector<8x8xf32> -> vector<8x8xf32>
    %37 = vector.extract_strided_slice %17 {offsets = [0, 8], sizes = [8, 8], strides = [1, 1]} : vector<8x32xbf16> to vector<8x8xbf16>
    %38 = vector.extract_strided_slice %18 {offsets = [0, 8], sizes = [8, 8], strides = [1, 1]} : vector<8x32xbf16> to vector<8x8xbf16>
    %cst_14 = arith.constant dense<0.000000e+00> : vector<8x8xf32>
    %39 = tpu.matmul %37, %38, %cst_14 {dimension_numbers = #tpu.dot_dimension_numbers<[1], [1], [0], [0], [0, 0, 1, 0], [], []>} : vector<8x8xbf16>, vector<8x8xbf16>, vector<8x8xf32> -> vector<8x8xf32>
    %cst_15 = arith.constant -1.000000e+20 : f32
    %40 = vector.broadcast %cst_15 : f32 to vector<8x8xf32>
    %41 = arith.select %7, %39, %40 : vector<8x8xi1>, vector<8x8xf32>
    %cst_16 = arith.constant dense<0xFF800000> : vector<8xf32>
    %42 = vector.multi_reduction <maximumf>, %41, %cst_16 [1] : vector<8x8xf32> to vector<8xf32>
    %43 = vector.shape_cast %42 : vector<8xf32> to vector<8x1xf32>
    %44 = vector.broadcast %43 : vector<8x1xf32> to vector<8x8xf32>
    %45 = arith.subf %41, %44 : vector<8x8xf32>
    %46 = math.exp %45 : vector<8x8xf32>
    %cst_17 = arith.constant dense<0.000000e+00> : vector<8xf32>
    %47 = vector.multi_reduction <add>, %46, %cst_17 [1] : vector<8x8xf32> to vector<8xf32>
    %48 = vector.shape_cast %47 : vector<8xf32> to vector<8x1xf32>
    %49 = vector.broadcast %48 : vector<8x1xf32> to vector<8x8xf32>
    %50 = arith.divf %46, %49 : vector<8x8xf32>
    %51 = arith.truncf %50 : vector<8x8xf32> to vector<8x8xbf16>
    %52 = vector.extract_strided_slice %19 {offsets = [0, 8], sizes = [8, 8], strides = [1, 1]} : vector<8x32xbf16> to vector<8x8xbf16>
    %cst_18 = arith.constant dense<0.000000e+00> : vector<8x8xf32>
    %53 = tpu.matmul %51, %52, %cst_18 {dimension_numbers = #tpu.dot_dimension_numbers<[1], [0], [0], [1], [0, 0, 1, 1], [], []>} : vector<8x8xbf16>, vector<8x8xbf16>, vector<8x8xf32> -> vector<8x8xf32>
    %54 = vector.extract_strided_slice %17 {offsets = [0, 16], sizes = [8, 8], strides = [1, 1]} : vector<8x32xbf16> to vector<8x8xbf16>
    %55 = vector.extract_strided_slice %18 {offsets = [0, 16], sizes = [8, 8], strides = [1, 1]} : vector<8x32xbf16> to vector<8x8xbf16>
    %cst_19 = arith.constant dense<0.000000e+00> : vector<8x8xf32>
    %56 = tpu.matmul %54, %55, %cst_19 {dimension_numbers = #tpu.dot_dimension_numbers<[1], [1], [0], [0], [0, 0, 1, 0], [], []>} : vector<8x8xbf16>, vector<8x8xbf16>, vector<8x8xf32> -> vector<8x8xf32>
    %cst_20 = arith.constant -1.000000e+20 : f32
    %57 = vector.broadcast %cst_20 : f32 to vector<8x8xf32>
    %58 = arith.select %7, %56, %57 : vector<8x8xi1>, vector<8x8xf32>
    %cst_21 = arith.constant dense<0xFF800000> : vector<8xf32>
    %59 = vector.multi_reduction <maximumf>, %58, %cst_21 [1] : vector<8x8xf32> to vector<8xf32>
    %60 = vector.shape_cast %59 : vector<8xf32> to vector<8x1xf32>
    %61 = vector.broadcast %60 : vector<8x1xf32> to vector<8x8xf32>
    %62 = arith.subf %58, %61 : vector<8x8xf32>
    %63 = math.exp %62 : vector<8x8xf32>
    %cst_22 = arith.constant dense<0.000000e+00> : vector<8xf32>
    %64 = vector.multi_reduction <add>, %63, %cst_22 [1] : vector<8x8xf32> to vector<8xf32>
    %65 = vector.shape_cast %64 : vector<8xf32> to vector<8x1xf32>
    %66 = vector.broadcast %65 : vector<8x1xf32> to vector<8x8xf32>
    %67 = arith.divf %63, %66 : vector<8x8xf32>
    %68 = arith.truncf %67 : vector<8x8xf32> to vector<8x8xbf16>
    %69 = vector.extract_strided_slice %19 {offsets = [0, 16], sizes = [8, 8], strides = [1, 1]} : vector<8x32xbf16> to vector<8x8xbf16>
    %cst_23 = arith.constant dense<0.000000e+00> : vector<8x8xf32>
    %70 = tpu.matmul %68, %69, %cst_23 {dimension_numbers = #tpu.dot_dimension_numbers<[1], [0], [0], [1], [0, 0, 1, 1], [], []>} : vector<8x8xbf16>, vector<8x8xbf16>, vector<8x8xf32> -> vector<8x8xf32>
    %71 = vector.extract_strided_slice %17 {offsets = [0, 24], sizes = [8, 8], strides = [1, 1]} : vector<8x32xbf16> to vector<8x8xbf16>
    %72 = vector.extract_strided_slice %18 {offsets = [0, 24], sizes = [8, 8], strides = [1, 1]} : vector<8x32xbf16> to vector<8x8xbf16>
    %cst_24 = arith.constant dense<0.000000e+00> : vector<8x8xf32>
    %73 = tpu.matmul %71, %72, %cst_24 {dimension_numbers = #tpu.dot_dimension_numbers<[1], [1], [0], [0], [0, 0, 1, 0], [], []>} : vector<8x8xbf16>, vector<8x8xbf16>, vector<8x8xf32> -> vector<8x8xf32>
    %cst_25 = arith.constant -1.000000e+20 : f32
    %74 = vector.broadcast %cst_25 : f32 to vector<8x8xf32>
    %75 = arith.select %7, %73, %74 : vector<8x8xi1>, vector<8x8xf32>
    %cst_26 = arith.constant dense<0xFF800000> : vector<8xf32>
    %76 = vector.multi_reduction <maximumf>, %75, %cst_26 [1] : vector<8x8xf32> to vector<8xf32>
    %77 = vector.shape_cast %76 : vector<8xf32> to vector<8x1xf32>
    %78 = vector.broadcast %77 : vector<8x1xf32> to vector<8x8xf32>
    %79 = arith.subf %75, %78 : vector<8x8xf32>
    %80 = math.exp %79 : vector<8x8xf32>
    %cst_27 = arith.constant dense<0.000000e+00> : vector<8xf32>
    %81 = vector.multi_reduction <add>, %80, %cst_27 [1] : vector<8x8xf32> to vector<8xf32>
    %82 = vector.shape_cast %81 : vector<8xf32> to vector<8x1xf32>
    %83 = vector.broadcast %82 : vector<8x1xf32> to vector<8x8xf32>
    %84 = arith.divf %80, %83 : vector<8x8xf32>
    %85 = arith.truncf %84 : vector<8x8xf32> to vector<8x8xbf16>
    %86 = vector.extract_strided_slice %19 {offsets = [0, 24], sizes = [8, 8], strides = [1, 1]} : vector<8x32xbf16> to vector<8x8xbf16>
    %cst_28 = arith.constant dense<0.000000e+00> : vector<8x8xf32>
    %87 = tpu.matmul %85, %86, %cst_28 {dimension_numbers = #tpu.dot_dimension_numbers<[1], [0], [0], [1], [0, 0, 1, 1], [], []>} : vector<8x8xbf16>, vector<8x8xbf16>, vector<8x8xf32> -> vector<8x8xf32>
    %88 = tpu.concatenate %36, %53, %70, %87 in 1 : vector<8x8xf32>, vector<8x8xf32>, vector<8x8xf32>, vector<8x8xf32> -> vector<8x32xf32>
    %89 = arith.truncf %88 : vector<8x32xf32> to vector<8x32xbf16>
    %c0_29 = arith.constant 0 : index
    %c0_30 = arith.constant 0 : index
    %c0_31 = arith.constant 0 : index
    %90 = vector.load %arg4[%c0_29, %c0_30, %c0_31] : memref<2x32x32xbf16, #tpu.memory_space<vmem>>, vector<1x32x32xbf16>
    %91 = vector.shape_cast %90 : vector<1x32x32xbf16> to vector<32x32xbf16>
    %cst_32 = arith.constant dense<0.000000e+00> : vector<8x32xf32>
    %92 = tpu.matmul %89, %91, %cst_32 {dimension_numbers = #tpu.dot_dimension_numbers<[1], [0], [0], [1], [0, 0, 1, 1], [], []>} : vector<8x32xbf16>, vector<32x32xbf16>, vector<8x32xf32> -> vector<8x32xf32>
    %93 = arith.addf %92, %1 : vector<8x32xf32>
    %c0_33 = arith.constant 0 : index
    %c0_34 = arith.constant 0 : index
    %c0_35 = arith.constant 0 : index
    %94 = vector.load %arg5[%c0_33, %c0_34, %c0_35] : memref<2x1x32xf32, #tpu.memory_space<vmem>>, vector<1x1x32xf32>
    %95 = vector.shape_cast %94 : vector<1x1x32xf32> to vector<1x32xf32>
    %c0_36 = arith.constant 0 : index
    %c0_37 = arith.constant 0 : index
    %c0_38 = arith.constant 0 : index
    %96 = vector.load %arg6[%c0_36, %c0_37, %c0_38] : memref<2x1x32xf32, #tpu.memory_space<vmem>>, vector<1x1x32xf32>
    %97 = vector.shape_cast %96 : vector<1x1x32xf32> to vector<1x32xf32>
    %cst_39 = arith.constant dense<0.000000e+00> : vector<8xf32>
    %98 = vector.multi_reduction <add>, %93, %cst_39 [1] : vector<8x32xf32> to vector<8xf32>
    %99 = vector.shape_cast %98 : vector<8xf32> to vector<8x1xf32>
    %cst_40 = arith.constant 3.200000e+01 : f32
    %100 = vector.broadcast %cst_40 : f32 to vector<8x1xf32>
    %101 = arith.divf %99, %100 : vector<8x1xf32>
    %102 = vector.broadcast %101 : vector<8x1xf32> to vector<8x32xf32>
    %103 = arith.subf %93, %102 : vector<8x32xf32>
    %104 = arith.mulf %103, %103 : vector<8x32xf32>
    %cst_41 = arith.constant dense<0.000000e+00> : vector<8xf32>
    %105 = vector.multi_reduction <add>, %104, %cst_41 [1] : vector<8x32xf32> to vector<8xf32>
    %106 = vector.shape_cast %105 : vector<8xf32> to vector<8x1xf32>
    %cst_42 = arith.constant 3.200000e+01 : f32
    %107 = vector.broadcast %cst_42 : f32 to vector<8x1xf32>
    %108 = arith.divf %106, %107 : vector<8x1xf32>
    %109 = vector.broadcast %101 : vector<8x1xf32> to vector<8x32xf32>
    %110 = arith.subf %93, %109 : vector<8x32xf32>
    %cst_43 = arith.constant 9.99999974E-6 : f32
    %111 = vector.broadcast %cst_43 : f32 to vector<8x1xf32>
    %112 = arith.addf %108, %111 : vector<8x1xf32>
    %113 = math.rsqrt %112 : vector<8x1xf32>
    %114 = vector.broadcast %113 : vector<8x1xf32> to vector<8x32xf32>
    %115 = arith.mulf %110, %114 : vector<8x32xf32>
    %116 = vector.broadcast %95 : vector<1x32xf32> to vector<8x32xf32>
    %117 = arith.mulf %115, %116 : vector<8x32xf32>
    %118 = vector.broadcast %97 : vector<1x32xf32> to vector<8x32xf32>
    %119 = arith.addf %117, %118 : vector<8x32xf32>
    %120 = arith.truncf %119 : vector<8x32xf32> to vector<8x32xbf16>
    %c0_44 = arith.constant 0 : index
    %c0_45 = arith.constant 0 : index
    %c0_46 = arith.constant 0 : index
    %121 = vector.load %arg7[%c0_44, %c0_45, %c0_46] : memref<2x32x32xbf16, #tpu.memory_space<vmem>>, vector<1x32x32xbf16>
    %122 = vector.shape_cast %121 : vector<1x32x32xbf16> to vector<32x32xbf16>
    %cst_47 = arith.constant dense<0.000000e+00> : vector<8x32xf32>
    %123 = tpu.matmul %120, %122, %cst_47 {dimension_numbers = #tpu.dot_dimension_numbers<[1], [0], [0], [1], [0, 0, 1, 1], [], []>} : vector<8x32xbf16>, vector<32x32xbf16>, vector<8x32xf32> -> vector<8x32xf32>
    %cst_48 = arith.constant 0.176776692 : f32
    %124 = vector.broadcast %cst_48 : f32 to vector<8x32xf32>
    %125 = arith.mulf %123, %124 : vector<8x32xf32>
    %c0_49 = arith.constant 0 : index
    %c0_50 = arith.constant 0 : index
    %c0_51 = arith.constant 0 : index
    %126 = vector.load %arg8[%c0_49, %c0_50, %c0_51] : memref<2x32x64xbf16, #tpu.memory_space<vmem>>, vector<1x32x64xbf16>
    %127 = vector.shape_cast %126 : vector<1x32x64xbf16> to vector<32x64xbf16>
    %cst_52 = arith.constant dense<0.000000e+00> : vector<8x64xf32>
    %128 = tpu.matmul %4, %127, %cst_52 {dimension_numbers = #tpu.dot_dimension_numbers<[1], [0], [0], [1], [0, 0, 1, 1], [], []>} : vector<8x32xbf16>, vector<32x64xbf16>, vector<8x64xf32> -> vector<8x64xf32>
    %129 = vector.extract_strided_slice %128 {offsets = [0, 0], sizes = [8, 32], strides = [1, 1]} : vector<8x64xf32> to vector<8x32xf32>
    %130 = vector.extract_strided_slice %128 {offsets = [0, 32], sizes = [8, 32], strides = [1, 1]} : vector<8x64xf32> to vector<8x32xf32>
    %131 = arith.truncf %125 : vector<8x32xf32> to vector<8x32xbf16>
    %132 = arith.truncf %129 : vector<8x32xf32> to vector<8x32xbf16>
    %133 = arith.truncf %130 : vector<8x32xf32> to vector<8x32xbf16>
    %134 = vector.extract_strided_slice %131 {offsets = [0, 0], sizes = [8, 8], strides = [1, 1]} : vector<8x32xbf16> to vector<8x8xbf16>
    %135 = vector.extract_strided_slice %132 {offsets = [0, 0], sizes = [8, 8], strides = [1, 1]} : vector<8x32xbf16> to vector<8x8xbf16>
    %cst_53 = arith.constant dense<0.000000e+00> : vector<8x8xf32>
    %136 = tpu.matmul %134, %135, %cst_53 {dimension_numbers = #tpu.dot_dimension_numbers<[1], [1], [0], [0], [0, 0, 1, 0], [], []>} : vector<8x8xbf16>, vector<8x8xbf16>, vector<8x8xf32> -> vector<8x8xf32>
    %cst_54 = arith.constant dense<0xFF800000> : vector<8xf32>
    %137 = vector.multi_reduction <maximumf>, %136, %cst_54 [1] : vector<8x8xf32> to vector<8xf32>
    %138 = vector.shape_cast %137 : vector<8xf32> to vector<8x1xf32>
    %139 = vector.broadcast %138 : vector<8x1xf32> to vector<8x8xf32>
    %140 = arith.subf %136, %139 : vector<8x8xf32>
    %141 = math.exp %140 : vector<8x8xf32>
    %cst_55 = arith.constant dense<0.000000e+00> : vector<8xf32>
    %142 = vector.multi_reduction <add>, %141, %cst_55 [1] : vector<8x8xf32> to vector<8xf32>
    %143 = vector.shape_cast %142 : vector<8xf32> to vector<8x1xf32>
    %144 = vector.broadcast %143 : vector<8x1xf32> to vector<8x8xf32>
    %145 = arith.divf %141, %144 : vector<8x8xf32>
    %146 = arith.truncf %145 : vector<8x8xf32> to vector<8x8xbf16>
    %147 = vector.extract_strided_slice %133 {offsets = [0, 0], sizes = [8, 8], strides = [1, 1]} : vector<8x32xbf16> to vector<8x8xbf16>
    %cst_56 = arith.constant dense<0.000000e+00> : vector<8x8xf32>
    %148 = tpu.matmul %146, %147, %cst_56 {dimension_numbers = #tpu.dot_dimension_numbers<[1], [0], [0], [1], [0, 0, 1, 1], [], []>} : vector<8x8xbf16>, vector<8x8xbf16>, vector<8x8xf32> -> vector<8x8xf32>
    %149 = vector.extract_strided_slice %131 {offsets = [0, 8], sizes = [8, 8], strides = [1, 1]} : vector<8x32xbf16> to vector<8x8xbf16>
    %150 = vector.extract_strided_slice %132 {offsets = [0, 8], sizes = [8, 8], strides = [1, 1]} : vector<8x32xbf16> to vector<8x8xbf16>
    %cst_57 = arith.constant dense<0.000000e+00> : vector<8x8xf32>
    %151 = tpu.matmul %149, %150, %cst_57 {dimension_numbers = #tpu.dot_dimension_numbers<[1], [1], [0], [0], [0, 0, 1, 0], [], []>} : vector<8x8xbf16>, vector<8x8xbf16>, vector<8x8xf32> -> vector<8x8xf32>
    %cst_58 = arith.constant dense<0xFF800000> : vector<8xf32>
    %152 = vector.multi_reduction <maximumf>, %151, %cst_58 [1] : vector<8x8xf32> to vector<8xf32>
    %153 = vector.shape_cast %152 : vector<8xf32> to vector<8x1xf32>
    %154 = vector.broadcast %153 : vector<8x1xf32> to vector<8x8xf32>
    %155 = arith.subf %151, %154 : vector<8x8xf32>
    %156 = math.exp %155 : vector<8x8xf32>
    %cst_59 = arith.constant dense<0.000000e+00> : vector<8xf32>
    %157 = vector.multi_reduction <add>, %156, %cst_59 [1] : vector<8x8xf32> to vector<8xf32>
    %158 = vector.shape_cast %157 : vector<8xf32> to vector<8x1xf32>
    %159 = vector.broadcast %158 : vector<8x1xf32> to vector<8x8xf32>
    %160 = arith.divf %156, %159 : vector<8x8xf32>
    %161 = arith.truncf %160 : vector<8x8xf32> to vector<8x8xbf16>
    %162 = vector.extract_strided_slice %133 {offsets = [0, 8], sizes = [8, 8], strides = [1, 1]} : vector<8x32xbf16> to vector<8x8xbf16>
    %cst_60 = arith.constant dense<0.000000e+00> : vector<8x8xf32>
    %163 = tpu.matmul %161, %162, %cst_60 {dimension_numbers = #tpu.dot_dimension_numbers<[1], [0], [0], [1], [0, 0, 1, 1], [], []>} : vector<8x8xbf16>, vector<8x8xbf16>, vector<8x8xf32> -> vector<8x8xf32>
    %164 = vector.extract_strided_slice %131 {offsets = [0, 16], sizes = [8, 8], strides = [1, 1]} : vector<8x32xbf16> to vector<8x8xbf16>
    %165 = vector.extract_strided_slice %132 {offsets = [0, 16], sizes = [8, 8], strides = [1, 1]} : vector<8x32xbf16> to vector<8x8xbf16>
    %cst_61 = arith.constant dense<0.000000e+00> : vector<8x8xf32>
    %166 = tpu.matmul %164, %165, %cst_61 {dimension_numbers = #tpu.dot_dimension_numbers<[1], [1], [0], [0], [0, 0, 1, 0], [], []>} : vector<8x8xbf16>, vector<8x8xbf16>, vector<8x8xf32> -> vector<8x8xf32>
    %cst_62 = arith.constant dense<0xFF800000> : vector<8xf32>
    %167 = vector.multi_reduction <maximumf>, %166, %cst_62 [1] : vector<8x8xf32> to vector<8xf32>
    %168 = vector.shape_cast %167 : vector<8xf32> to vector<8x1xf32>
    %169 = vector.broadcast %168 : vector<8x1xf32> to vector<8x8xf32>
    %170 = arith.subf %166, %169 : vector<8x8xf32>
    %171 = math.exp %170 : vector<8x8xf32>
    %cst_63 = arith.constant dense<0.000000e+00> : vector<8xf32>
    %172 = vector.multi_reduction <add>, %171, %cst_63 [1] : vector<8x8xf32> to vector<8xf32>
    %173 = vector.shape_cast %172 : vector<8xf32> to vector<8x1xf32>
    %174 = vector.broadcast %173 : vector<8x1xf32> to vector<8x8xf32>
    %175 = arith.divf %171, %174 : vector<8x8xf32>
    %176 = arith.truncf %175 : vector<8x8xf32> to vector<8x8xbf16>
    %177 = vector.extract_strided_slice %133 {offsets = [0, 16], sizes = [8, 8], strides = [1, 1]} : vector<8x32xbf16> to vector<8x8xbf16>
    %cst_64 = arith.constant dense<0.000000e+00> : vector<8x8xf32>
    %178 = tpu.matmul %176, %177, %cst_64 {dimension_numbers = #tpu.dot_dimension_numbers<[1], [0], [0], [1], [0, 0, 1, 1], [], []>} : vector<8x8xbf16>, vector<8x8xbf16>, vector<8x8xf32> -> vector<8x8xf32>
    %179 = vector.extract_strided_slice %131 {offsets = [0, 24], sizes = [8, 8], strides = [1, 1]} : vector<8x32xbf16> to vector<8x8xbf16>
    %180 = vector.extract_strided_slice %132 {offsets = [0, 24], sizes = [8, 8], strides = [1, 1]} : vector<8x32xbf16> to vector<8x8xbf16>
    %cst_65 = arith.constant dense<0.000000e+00> : vector<8x8xf32>
    %181 = tpu.matmul %179, %180, %cst_65 {dimension_numbers = #tpu.dot_dimension_numbers<[1], [1], [0], [0], [0, 0, 1, 0], [], []>} : vector<8x8xbf16>, vector<8x8xbf16>, vector<8x8xf32> -> vector<8x8xf32>
    %cst_66 = arith.constant dense<0xFF800000> : vector<8xf32>
    %182 = vector.multi_reduction <maximumf>, %181, %cst_66 [1] : vector<8x8xf32> to vector<8xf32>
    %183 = vector.shape_cast %182 : vector<8xf32> to vector<8x1xf32>
    %184 = vector.broadcast %183 : vector<8x1xf32> to vector<8x8xf32>
    %185 = arith.subf %181, %184 : vector<8x8xf32>
    %186 = math.exp %185 : vector<8x8xf32>
    %cst_67 = arith.constant dense<0.000000e+00> : vector<8xf32>
    %187 = vector.multi_reduction <add>, %186, %cst_67 [1] : vector<8x8xf32> to vector<8xf32>
    %188 = vector.shape_cast %187 : vector<8xf32> to vector<8x1xf32>
    %189 = vector.broadcast %188 : vector<8x1xf32> to vector<8x8xf32>
    %190 = arith.divf %186, %189 : vector<8x8xf32>
    %191 = arith.truncf %190 : vector<8x8xf32> to vector<8x8xbf16>
    %192 = vector.extract_strided_slice %133 {offsets = [0, 24], sizes = [8, 8], strides = [1, 1]} : vector<8x32xbf16> to vector<8x8xbf16>
    %cst_68 = arith.constant dense<0.000000e+00> : vector<8x8xf32>
    %193 = tpu.matmul %191, %192, %cst_68 {dimension_numbers = #tpu.dot_dimension_numbers<[1], [0], [0], [1], [0, 0, 1, 1], [], []>} : vector<8x8xbf16>, vector<8x8xbf16>, vector<8x8xf32> -> vector<8x8xf32>
    %194 = tpu.concatenate %148, %163, %178, %193 in 1 : vector<8x8xf32>, vector<8x8xf32>, vector<8x8xf32>, vector<8x8xf32> -> vector<8x32xf32>
    %195 = arith.truncf %194 : vector<8x32xf32> to vector<8x32xbf16>
    %c0_69 = arith.constant 0 : index
    %c0_70 = arith.constant 0 : index
    %c0_71 = arith.constant 0 : index
    %196 = vector.load %arg9[%c0_69, %c0_70, %c0_71] : memref<2x32x32xbf16, #tpu.memory_space<vmem>>, vector<1x32x32xbf16>
    %197 = vector.shape_cast %196 : vector<1x32x32xbf16> to vector<32x32xbf16>
    %cst_72 = arith.constant dense<0.000000e+00> : vector<8x32xf32>
    %198 = tpu.matmul %195, %197, %cst_72 {dimension_numbers = #tpu.dot_dimension_numbers<[1], [0], [0], [1], [0, 0, 1, 1], [], []>} : vector<8x32xbf16>, vector<32x32xbf16>, vector<8x32xf32> -> vector<8x32xf32>
    %199 = arith.addf %198, %119 : vector<8x32xf32>
    %c0_73 = arith.constant 0 : index
    %c0_74 = arith.constant 0 : index
    %c0_75 = arith.constant 0 : index
    %200 = vector.load %arg10[%c0_73, %c0_74, %c0_75] : memref<2x1x32xf32, #tpu.memory_space<vmem>>, vector<1x1x32xf32>
    %201 = vector.shape_cast %200 : vector<1x1x32xf32> to vector<1x32xf32>
    %c0_76 = arith.constant 0 : index
    %c0_77 = arith.constant 0 : index
    %c0_78 = arith.constant 0 : index
    %202 = vector.load %arg11[%c0_76, %c0_77, %c0_78] : memref<2x1x32xf32, #tpu.memory_space<vmem>>, vector<1x1x32xf32>
    %203 = vector.shape_cast %202 : vector<1x1x32xf32> to vector<1x32xf32>
    %cst_79 = arith.constant dense<0.000000e+00> : vector<8xf32>
    %204 = vector.multi_reduction <add>, %199, %cst_79 [1] : vector<8x32xf32> to vector<8xf32>
    %205 = vector.shape_cast %204 : vector<8xf32> to vector<8x1xf32>
    %cst_80 = arith.constant 3.200000e+01 : f32
    %206 = vector.broadcast %cst_80 : f32 to vector<8x1xf32>
    %207 = arith.divf %205, %206 : vector<8x1xf32>
    %208 = vector.broadcast %207 : vector<8x1xf32> to vector<8x32xf32>
    %209 = arith.subf %199, %208 : vector<8x32xf32>
    %210 = arith.mulf %209, %209 : vector<8x32xf32>
    %cst_81 = arith.constant dense<0.000000e+00> : vector<8xf32>
    %211 = vector.multi_reduction <add>, %210, %cst_81 [1] : vector<8x32xf32> to vector<8xf32>
    %212 = vector.shape_cast %211 : vector<8xf32> to vector<8x1xf32>
    %cst_82 = arith.constant 3.200000e+01 : f32
    %213 = vector.broadcast %cst_82 : f32 to vector<8x1xf32>
    %214 = arith.divf %212, %213 : vector<8x1xf32>
    %215 = vector.broadcast %207 : vector<8x1xf32> to vector<8x32xf32>
    %216 = arith.subf %199, %215 : vector<8x32xf32>
    %cst_83 = arith.constant 9.99999974E-6 : f32
    %217 = vector.broadcast %cst_83 : f32 to vector<8x1xf32>
    %218 = arith.addf %214, %217 : vector<8x1xf32>
    %219 = math.rsqrt %218 : vector<8x1xf32>
    %220 = vector.broadcast %219 : vector<8x1xf32> to vector<8x32xf32>
    %221 = arith.mulf %216, %220 : vector<8x32xf32>
    %222 = vector.broadcast %201 : vector<1x32xf32> to vector<8x32xf32>
    %223 = arith.mulf %221, %222 : vector<8x32xf32>
    %224 = vector.broadcast %203 : vector<1x32xf32> to vector<8x32xf32>
    %225 = arith.addf %223, %224 : vector<8x32xf32>
    %226 = arith.truncf %225 : vector<8x32xf32> to vector<8x32xbf16>
    %c0_84 = arith.constant 0 : index
    %c0_85 = arith.constant 0 : index
    %c0_86 = arith.constant 0 : index
    %227 = vector.load %arg12[%c0_84, %c0_85, %c0_86] : memref<2x32x64xbf16, #tpu.memory_space<vmem>>, vector<1x32x64xbf16>
    %228 = vector.shape_cast %227 : vector<1x32x64xbf16> to vector<32x64xbf16>
    %cst_87 = arith.constant dense<0.000000e+00> : vector<8x64xf32>
    %229 = tpu.matmul %226, %228, %cst_87 {dimension_numbers = #tpu.dot_dimension_numbers<[1], [0], [0], [1], [0, 0, 1, 1], [], []>} : vector<8x32xbf16>, vector<32x64xbf16>, vector<8x64xf32> -> vector<8x64xf32>
    %c0_88 = arith.constant 0 : index
    %c0_89 = arith.constant 0 : index
    %c0_90 = arith.constant 0 : index
    %230 = vector.load %arg13[%c0_88, %c0_89, %c0_90] : memref<2x1x64xf32, #tpu.memory_space<vmem>>, vector<1x1x64xf32>
    %231 = vector.shape_cast %230 : vector<1x1x64xf32> to vector<1x64xf32>
    %232 = vector.broadcast %231 : vector<1x64xf32> to vector<8x64xf32>
    %233 = arith.addf %229, %232 : vector<8x64xf32>
    %cst_91 = arith.constant 0.000000e+00 : f32
    %234 = vector.broadcast %cst_91 : f32 to vector<8x64xf32>
    %235 = arith.maximumf %233, %234 : vector<8x64xf32>
    %236 = arith.truncf %235 : vector<8x64xf32> to vector<8x64xbf16>
    %c0_92 = arith.constant 0 : index
    %c0_93 = arith.constant 0 : index
    %c0_94 = arith.constant 0 : index
    %237 = vector.load %arg14[%c0_92, %c0_93, %c0_94] : memref<2x64x32xbf16, #tpu.memory_space<vmem>>, vector<1x64x32xbf16>
    %238 = vector.shape_cast %237 : vector<1x64x32xbf16> to vector<64x32xbf16>
    %cst_95 = arith.constant dense<0.000000e+00> : vector<8x32xf32>
    %239 = tpu.matmul %236, %238, %cst_95 {dimension_numbers = #tpu.dot_dimension_numbers<[1], [0], [0], [1], [0, 0, 1, 1], [], []>} : vector<8x64xbf16>, vector<64x32xbf16>, vector<8x32xf32> -> vector<8x32xf32>
    %c0_96 = arith.constant 0 : index
    %c0_97 = arith.constant 0 : index
    %c0_98 = arith.constant 0 : index
    %240 = vector.load %arg15[%c0_96, %c0_97, %c0_98] : memref<2x1x32xf32, #tpu.memory_space<vmem>>, vector<1x1x32xf32>
    %241 = vector.shape_cast %240 : vector<1x1x32xf32> to vector<1x32xf32>
    %242 = vector.broadcast %241 : vector<1x32xf32> to vector<8x32xf32>
    %243 = arith.addf %239, %242 : vector<8x32xf32>
    %244 = arith.addf %225, %243 : vector<8x32xf32>
    %c0_99 = arith.constant 0 : index
    %c0_100 = arith.constant 0 : index
    %c0_101 = arith.constant 0 : index
    %245 = vector.load %arg16[%c0_99, %c0_100, %c0_101] : memref<2x1x32xf32, #tpu.memory_space<vmem>>, vector<1x1x32xf32>
    %246 = vector.shape_cast %245 : vector<1x1x32xf32> to vector<1x32xf32>
    %c0_102 = arith.constant 0 : index
    %c0_103 = arith.constant 0 : index
    %c0_104 = arith.constant 0 : index
    %247 = vector.load %arg17[%c0_102, %c0_103, %c0_104] : memref<2x1x32xf32, #tpu.memory_space<vmem>>, vector<1x1x32xf32>
    %248 = vector.shape_cast %247 : vector<1x1x32xf32> to vector<1x32xf32>
    %cst_105 = arith.constant dense<0.000000e+00> : vector<8xf32>
    %249 = vector.multi_reduction <add>, %244, %cst_105 [1] : vector<8x32xf32> to vector<8xf32>
    %250 = vector.shape_cast %249 : vector<8xf32> to vector<8x1xf32>
    %cst_106 = arith.constant 3.200000e+01 : f32
    %251 = vector.broadcast %cst_106 : f32 to vector<8x1xf32>
    %252 = arith.divf %250, %251 : vector<8x1xf32>
    %253 = vector.broadcast %252 : vector<8x1xf32> to vector<8x32xf32>
    %254 = arith.subf %244, %253 : vector<8x32xf32>
    %255 = arith.mulf %254, %254 : vector<8x32xf32>
    %cst_107 = arith.constant dense<0.000000e+00> : vector<8xf32>
    %256 = vector.multi_reduction <add>, %255, %cst_107 [1] : vector<8x32xf32> to vector<8xf32>
    %257 = vector.shape_cast %256 : vector<8xf32> to vector<8x1xf32>
    %cst_108 = arith.constant 3.200000e+01 : f32
    %258 = vector.broadcast %cst_108 : f32 to vector<8x1xf32>
    %259 = arith.divf %257, %258 : vector<8x1xf32>
    %260 = vector.broadcast %252 : vector<8x1xf32> to vector<8x32xf32>
    %261 = arith.subf %244, %260 : vector<8x32xf32>
    %cst_109 = arith.constant 9.99999974E-6 : f32
    %262 = vector.broadcast %cst_109 : f32 to vector<8x1xf32>
    %263 = arith.addf %259, %262 : vector<8x1xf32>
    %264 = math.rsqrt %263 : vector<8x1xf32>
    %265 = vector.broadcast %264 : vector<8x1xf32> to vector<8x32xf32>
    %266 = arith.mulf %261, %265 : vector<8x32xf32>
    %267 = vector.broadcast %246 : vector<1x32xf32> to vector<8x32xf32>
    %268 = arith.mulf %266, %267 : vector<8x32xf32>
    %269 = vector.broadcast %248 : vector<1x32xf32> to vector<8x32xf32>
    %270 = arith.addf %268, %269 : vector<8x32xf32>
    %271 = arith.truncf %270 : vector<8x32xf32> to vector<8x32xbf16>
    %c1 = arith.constant 1 : index
    %c0_110 = arith.constant 0 : index
    %c0_111 = arith.constant 0 : index
    %272 = vector.load %arg3[%c1, %c0_110, %c0_111] : memref<2x32x96xbf16, #tpu.memory_space<vmem>>, vector<1x32x96xbf16>
    %273 = vector.shape_cast %272 : vector<1x32x96xbf16> to vector<32x96xbf16>
    %cst_112 = arith.constant dense<0.000000e+00> : vector<8x96xf32>
    %274 = tpu.matmul %271, %273, %cst_112 {dimension_numbers = #tpu.dot_dimension_numbers<[1], [0], [0], [1], [0, 0, 1, 1], [], []>} : vector<8x32xbf16>, vector<32x96xbf16>, vector<8x96xf32> -> vector<8x96xf32>
    %275 = vector.extract_strided_slice %274 {offsets = [0, 0], sizes = [8, 32], strides = [1, 1]} : vector<8x96xf32> to vector<8x32xf32>
    %cst_113 = arith.constant 0.176776692 : f32
    %276 = vector.broadcast %cst_113 : f32 to vector<8x32xf32>
    %277 = arith.mulf %275, %276 : vector<8x32xf32>
    %278 = vector.extract_strided_slice %274 {offsets = [0, 32], sizes = [8, 32], strides = [1, 1]} : vector<8x96xf32> to vector<8x32xf32>
    %279 = vector.extract_strided_slice %274 {offsets = [0, 64], sizes = [8, 32], strides = [1, 1]} : vector<8x96xf32> to vector<8x32xf32>
    %280 = arith.truncf %277 : vector<8x32xf32> to vector<8x32xbf16>
    %281 = arith.truncf %278 : vector<8x32xf32> to vector<8x32xbf16>
    %282 = arith.truncf %279 : vector<8x32xf32> to vector<8x32xbf16>
    %283 = vector.extract_strided_slice %280 {offsets = [0, 0], sizes = [8, 8], strides = [1, 1]} : vector<8x32xbf16> to vector<8x8xbf16>
    %284 = vector.extract_strided_slice %281 {offsets = [0, 0], sizes = [8, 8], strides = [1, 1]} : vector<8x32xbf16> to vector<8x8xbf16>
    %cst_114 = arith.constant dense<0.000000e+00> : vector<8x8xf32>
    %285 = tpu.matmul %283, %284, %cst_114 {dimension_numbers = #tpu.dot_dimension_numbers<[1], [1], [0], [0], [0, 0, 1, 0], [], []>} : vector<8x8xbf16>, vector<8x8xbf16>, vector<8x8xf32> -> vector<8x8xf32>
    %cst_115 = arith.constant -1.000000e+20 : f32
    %286 = vector.broadcast %cst_115 : f32 to vector<8x8xf32>
    %287 = arith.select %7, %285, %286 : vector<8x8xi1>, vector<8x8xf32>
    %cst_116 = arith.constant dense<0xFF800000> : vector<8xf32>
    %288 = vector.multi_reduction <maximumf>, %287, %cst_116 [1] : vector<8x8xf32> to vector<8xf32>
    %289 = vector.shape_cast %288 : vector<8xf32> to vector<8x1xf32>
    %290 = vector.broadcast %289 : vector<8x1xf32> to vector<8x8xf32>
    %291 = arith.subf %287, %290 : vector<8x8xf32>
    %292 = math.exp %291 : vector<8x8xf32>
    %cst_117 = arith.constant dense<0.000000e+00> : vector<8xf32>
    %293 = vector.multi_reduction <add>, %292, %cst_117 [1] : vector<8x8xf32> to vector<8xf32>
    %294 = vector.shape_cast %293 : vector<8xf32> to vector<8x1xf32>
    %295 = vector.broadcast %294 : vector<8x1xf32> to vector<8x8xf32>
    %296 = arith.divf %292, %295 : vector<8x8xf32>
    %297 = arith.truncf %296 : vector<8x8xf32> to vector<8x8xbf16>
    %298 = vector.extract_strided_slice %282 {offsets = [0, 0], sizes = [8, 8], strides = [1, 1]} : vector<8x32xbf16> to vector<8x8xbf16>
    %cst_118 = arith.constant dense<0.000000e+00> : vector<8x8xf32>
    %299 = tpu.matmul %297, %298, %cst_118 {dimension_numbers = #tpu.dot_dimension_numbers<[1], [0], [0], [1], [0, 0, 1, 1], [], []>} : vector<8x8xbf16>, vector<8x8xbf16>, vector<8x8xf32> -> vector<8x8xf32>
    %300 = vector.extract_strided_slice %280 {offsets = [0, 8], sizes = [8, 8], strides = [1, 1]} : vector<8x32xbf16> to vector<8x8xbf16>
    %301 = vector.extract_strided_slice %281 {offsets = [0, 8], sizes = [8, 8], strides = [1, 1]} : vector<8x32xbf16> to vector<8x8xbf16>
    %cst_119 = arith.constant dense<0.000000e+00> : vector<8x8xf32>
    %302 = tpu.matmul %300, %301, %cst_119 {dimension_numbers = #tpu.dot_dimension_numbers<[1], [1], [0], [0], [0, 0, 1, 0], [], []>} : vector<8x8xbf16>, vector<8x8xbf16>, vector<8x8xf32> -> vector<8x8xf32>
    %cst_120 = arith.constant -1.000000e+20 : f32
    %303 = vector.broadcast %cst_120 : f32 to vector<8x8xf32>
    %304 = arith.select %7, %302, %303 : vector<8x8xi1>, vector<8x8xf32>
    %cst_121 = arith.constant dense<0xFF800000> : vector<8xf32>
    %305 = vector.multi_reduction <maximumf>, %304, %cst_121 [1] : vector<8x8xf32> to vector<8xf32>
    %306 = vector.shape_cast %305 : vector<8xf32> to vector<8x1xf32>
    %307 = vector.broadcast %306 : vector<8x1xf32> to vector<8x8xf32>
    %308 = arith.subf %304, %307 : vector<8x8xf32>
    %309 = math.exp %308 : vector<8x8xf32>
    %cst_122 = arith.constant dense<0.000000e+00> : vector<8xf32>
    %310 = vector.multi_reduction <add>, %309, %cst_122 [1] : vector<8x8xf32> to vector<8xf32>
    %311 = vector.shape_cast %310 : vector<8xf32> to vector<8x1xf32>
    %312 = vector.broadcast %311 : vector<8x1xf32> to vector<8x8xf32>
    %313 = arith.divf %309, %312 : vector<8x8xf32>
    %314 = arith.truncf %313 : vector<8x8xf32> to vector<8x8xbf16>
    %315 = vector.extract_strided_slice %282 {offsets = [0, 8], sizes = [8, 8], strides = [1, 1]} : vector<8x32xbf16> to vector<8x8xbf16>
    %cst_123 = arith.constant dense<0.000000e+00> : vector<8x8xf32>
    %316 = tpu.matmul %314, %315, %cst_123 {dimension_numbers = #tpu.dot_dimension_numbers<[1], [0], [0], [1], [0, 0, 1, 1], [], []>} : vector<8x8xbf16>, vector<8x8xbf16>, vector<8x8xf32> -> vector<8x8xf32>
    %317 = vector.extract_strided_slice %280 {offsets = [0, 16], sizes = [8, 8], strides = [1, 1]} : vector<8x32xbf16> to vector<8x8xbf16>
    %318 = vector.extract_strided_slice %281 {offsets = [0, 16], sizes = [8, 8], strides = [1, 1]} : vector<8x32xbf16> to vector<8x8xbf16>
    %cst_124 = arith.constant dense<0.000000e+00> : vector<8x8xf32>
    %319 = tpu.matmul %317, %318, %cst_124 {dimension_numbers = #tpu.dot_dimension_numbers<[1], [1], [0], [0], [0, 0, 1, 0], [], []>} : vector<8x8xbf16>, vector<8x8xbf16>, vector<8x8xf32> -> vector<8x8xf32>
    %cst_125 = arith.constant -1.000000e+20 : f32
    %320 = vector.broadcast %cst_125 : f32 to vector<8x8xf32>
    %321 = arith.select %7, %319, %320 : vector<8x8xi1>, vector<8x8xf32>
    %cst_126 = arith.constant dense<0xFF800000> : vector<8xf32>
    %322 = vector.multi_reduction <maximumf>, %321, %cst_126 [1] : vector<8x8xf32> to vector<8xf32>
    %323 = vector.shape_cast %322 : vector<8xf32> to vector<8x1xf32>
    %324 = vector.broadcast %323 : vector<8x1xf32> to vector<8x8xf32>
    %325 = arith.subf %321, %324 : vector<8x8xf32>
    %326 = math.exp %325 : vector<8x8xf32>
    %cst_127 = arith.constant dense<0.000000e+00> : vector<8xf32>
    %327 = vector.multi_reduction <add>, %326, %cst_127 [1] : vector<8x8xf32> to vector<8xf32>
    %328 = vector.shape_cast %327 : vector<8xf32> to vector<8x1xf32>
    %329 = vector.broadcast %328 : vector<8x1xf32> to vector<8x8xf32>
    %330 = arith.divf %326, %329 : vector<8x8xf32>
    %331 = arith.truncf %330 : vector<8x8xf32> to vector<8x8xbf16>
    %332 = vector.extract_strided_slice %282 {offsets = [0, 16], sizes = [8, 8], strides = [1, 1]} : vector<8x32xbf16> to vector<8x8xbf16>
    %cst_128 = arith.constant dense<0.000000e+00> : vector<8x8xf32>
    %333 = tpu.matmul %331, %332, %cst_128 {dimension_numbers = #tpu.dot_dimension_numbers<[1], [0], [0], [1], [0, 0, 1, 1], [], []>} : vector<8x8xbf16>, vector<8x8xbf16>, vector<8x8xf32> -> vector<8x8xf32>
    %334 = vector.extract_strided_slice %280 {offsets = [0, 24], sizes = [8, 8], strides = [1, 1]} : vector<8x32xbf16> to vector<8x8xbf16>
    %335 = vector.extract_strided_slice %281 {offsets = [0, 24], sizes = [8, 8], strides = [1, 1]} : vector<8x32xbf16> to vector<8x8xbf16>
    %cst_129 = arith.constant dense<0.000000e+00> : vector<8x8xf32>
    %336 = tpu.matmul %334, %335, %cst_129 {dimension_numbers = #tpu.dot_dimension_numbers<[1], [1], [0], [0], [0, 0, 1, 0], [], []>} : vector<8x8xbf16>, vector<8x8xbf16>, vector<8x8xf32> -> vector<8x8xf32>
    %cst_130 = arith.constant -1.000000e+20 : f32
    %337 = vector.broadcast %cst_130 : f32 to vector<8x8xf32>
    %338 = arith.select %7, %336, %337 : vector<8x8xi1>, vector<8x8xf32>
    %cst_131 = arith.constant dense<0xFF800000> : vector<8xf32>
    %339 = vector.multi_reduction <maximumf>, %338, %cst_131 [1] : vector<8x8xf32> to vector<8xf32>
    %340 = vector.shape_cast %339 : vector<8xf32> to vector<8x1xf32>
    %341 = vector.broadcast %340 : vector<8x1xf32> to vector<8x8xf32>
    %342 = arith.subf %338, %341 : vector<8x8xf32>
    %343 = math.exp %342 : vector<8x8xf32>
    %cst_132 = arith.constant dense<0.000000e+00> : vector<8xf32>
    %344 = vector.multi_reduction <add>, %343, %cst_132 [1] : vector<8x8xf32> to vector<8xf32>
    %345 = vector.shape_cast %344 : vector<8xf32> to vector<8x1xf32>
    %346 = vector.broadcast %345 : vector<8x1xf32> to vector<8x8xf32>
    %347 = arith.divf %343, %346 : vector<8x8xf32>
    %348 = arith.truncf %347 : vector<8x8xf32> to vector<8x8xbf16>
    %349 = vector.extract_strided_slice %282 {offsets = [0, 24], sizes = [8, 8], strides = [1, 1]} : vector<8x32xbf16> to vector<8x8xbf16>
    %cst_133 = arith.constant dense<0.000000e+00> : vector<8x8xf32>
    %350 = tpu.matmul %348, %349, %cst_133 {dimension_numbers = #tpu.dot_dimension_numbers<[1], [0], [0], [1], [0, 0, 1, 1], [], []>} : vector<8x8xbf16>, vector<8x8xbf16>, vector<8x8xf32> -> vector<8x8xf32>
    %351 = tpu.concatenate %299, %316, %333, %350 in 1 : vector<8x8xf32>, vector<8x8xf32>, vector<8x8xf32>, vector<8x8xf32> -> vector<8x32xf32>
    %352 = arith.truncf %351 : vector<8x32xf32> to vector<8x32xbf16>
    %c1_134 = arith.constant 1 : index
    %c0_135 = arith.constant 0 : index
    %c0_136 = arith.constant 0 : index
    %353 = vector.load %arg4[%c1_134, %c0_135, %c0_136] : memref<2x32x32xbf16, #tpu.memory_space<vmem>>, vector<1x32x32xbf16>
    %354 = vector.shape_cast %353 : vector<1x32x32xbf16> to vector<32x32xbf16>
    %cst_137 = arith.constant dense<0.000000e+00> : vector<8x32xf32>
    %355 = tpu.matmul %352, %354, %cst_137 {dimension_numbers = #tpu.dot_dimension_numbers<[1], [0], [0], [1], [0, 0, 1, 1], [], []>} : vector<8x32xbf16>, vector<32x32xbf16>, vector<8x32xf32> -> vector<8x32xf32>
    %356 = arith.addf %355, %270 : vector<8x32xf32>
    %c1_138 = arith.constant 1 : index
    %c0_139 = arith.constant 0 : index
    %c0_140 = arith.constant 0 : index
    %357 = vector.load %arg5[%c1_138, %c0_139, %c0_140] : memref<2x1x32xf32, #tpu.memory_space<vmem>>, vector<1x1x32xf32>
    %358 = vector.shape_cast %357 : vector<1x1x32xf32> to vector<1x32xf32>
    %c1_141 = arith.constant 1 : index
    %c0_142 = arith.constant 0 : index
    %c0_143 = arith.constant 0 : index
    %359 = vector.load %arg6[%c1_141, %c0_142, %c0_143] : memref<2x1x32xf32, #tpu.memory_space<vmem>>, vector<1x1x32xf32>
    %360 = vector.shape_cast %359 : vector<1x1x32xf32> to vector<1x32xf32>
    %cst_144 = arith.constant dense<0.000000e+00> : vector<8xf32>
    %361 = vector.multi_reduction <add>, %356, %cst_144 [1] : vector<8x32xf32> to vector<8xf32>
    %362 = vector.shape_cast %361 : vector<8xf32> to vector<8x1xf32>
    %cst_145 = arith.constant 3.200000e+01 : f32
    %363 = vector.broadcast %cst_145 : f32 to vector<8x1xf32>
    %364 = arith.divf %362, %363 : vector<8x1xf32>
    %365 = vector.broadcast %364 : vector<8x1xf32> to vector<8x32xf32>
    %366 = arith.subf %356, %365 : vector<8x32xf32>
    %367 = arith.mulf %366, %366 : vector<8x32xf32>
    %cst_146 = arith.constant dense<0.000000e+00> : vector<8xf32>
    %368 = vector.multi_reduction <add>, %367, %cst_146 [1] : vector<8x32xf32> to vector<8xf32>
    %369 = vector.shape_cast %368 : vector<8xf32> to vector<8x1xf32>
    %cst_147 = arith.constant 3.200000e+01 : f32
    %370 = vector.broadcast %cst_147 : f32 to vector<8x1xf32>
    %371 = arith.divf %369, %370 : vector<8x1xf32>
    %372 = vector.broadcast %364 : vector<8x1xf32> to vector<8x32xf32>
    %373 = arith.subf %356, %372 : vector<8x32xf32>
    %cst_148 = arith.constant 9.99999974E-6 : f32
    %374 = vector.broadcast %cst_148 : f32 to vector<8x1xf32>
    %375 = arith.addf %371, %374 : vector<8x1xf32>
    %376 = math.rsqrt %375 : vector<8x1xf32>
    %377 = vector.broadcast %376 : vector<8x1xf32> to vector<8x32xf32>
    %378 = arith.mulf %373, %377 : vector<8x32xf32>
    %379 = vector.broadcast %358 : vector<1x32xf32> to vector<8x32xf32>
    %380 = arith.mulf %378, %379 : vector<8x32xf32>
    %381 = vector.broadcast %360 : vector<1x32xf32> to vector<8x32xf32>
    %382 = arith.addf %380, %381 : vector<8x32xf32>
    %383 = arith.truncf %382 : vector<8x32xf32> to vector<8x32xbf16>
    %c1_149 = arith.constant 1 : index
    %c0_150 = arith.constant 0 : index
    %c0_151 = arith.constant 0 : index
    %384 = vector.load %arg7[%c1_149, %c0_150, %c0_151] : memref<2x32x32xbf16, #tpu.memory_space<vmem>>, vector<1x32x32xbf16>
    %385 = vector.shape_cast %384 : vector<1x32x32xbf16> to vector<32x32xbf16>
    %cst_152 = arith.constant dense<0.000000e+00> : vector<8x32xf32>
    %386 = tpu.matmul %383, %385, %cst_152 {dimension_numbers = #tpu.dot_dimension_numbers<[1], [0], [0], [1], [0, 0, 1, 1], [], []>} : vector<8x32xbf16>, vector<32x32xbf16>, vector<8x32xf32> -> vector<8x32xf32>
    %cst_153 = arith.constant 0.176776692 : f32
    %387 = vector.broadcast %cst_153 : f32 to vector<8x32xf32>
    %388 = arith.mulf %386, %387 : vector<8x32xf32>
    %c1_154 = arith.constant 1 : index
    %c0_155 = arith.constant 0 : index
    %c0_156 = arith.constant 0 : index
    %389 = vector.load %arg8[%c1_154, %c0_155, %c0_156] : memref<2x32x64xbf16, #tpu.memory_space<vmem>>, vector<1x32x64xbf16>
    %390 = vector.shape_cast %389 : vector<1x32x64xbf16> to vector<32x64xbf16>
    %cst_157 = arith.constant dense<0.000000e+00> : vector<8x64xf32>
    %391 = tpu.matmul %4, %390, %cst_157 {dimension_numbers = #tpu.dot_dimension_numbers<[1], [0], [0], [1], [0, 0, 1, 1], [], []>} : vector<8x32xbf16>, vector<32x64xbf16>, vector<8x64xf32> -> vector<8x64xf32>
    %392 = vector.extract_strided_slice %391 {offsets = [0, 0], sizes = [8, 32], strides = [1, 1]} : vector<8x64xf32> to vector<8x32xf32>
    %393 = vector.extract_strided_slice %391 {offsets = [0, 32], sizes = [8, 32], strides = [1, 1]} : vector<8x64xf32> to vector<8x32xf32>
    %394 = arith.truncf %388 : vector<8x32xf32> to vector<8x32xbf16>
    %395 = arith.truncf %392 : vector<8x32xf32> to vector<8x32xbf16>
    %396 = arith.truncf %393 : vector<8x32xf32> to vector<8x32xbf16>
    %397 = vector.extract_strided_slice %394 {offsets = [0, 0], sizes = [8, 8], strides = [1, 1]} : vector<8x32xbf16> to vector<8x8xbf16>
    %398 = vector.extract_strided_slice %395 {offsets = [0, 0], sizes = [8, 8], strides = [1, 1]} : vector<8x32xbf16> to vector<8x8xbf16>
    %cst_158 = arith.constant dense<0.000000e+00> : vector<8x8xf32>
    %399 = tpu.matmul %397, %398, %cst_158 {dimension_numbers = #tpu.dot_dimension_numbers<[1], [1], [0], [0], [0, 0, 1, 0], [], []>} : vector<8x8xbf16>, vector<8x8xbf16>, vector<8x8xf32> -> vector<8x8xf32>
    %cst_159 = arith.constant dense<0xFF800000> : vector<8xf32>
    %400 = vector.multi_reduction <maximumf>, %399, %cst_159 [1] : vector<8x8xf32> to vector<8xf32>
    %401 = vector.shape_cast %400 : vector<8xf32> to vector<8x1xf32>
    %402 = vector.broadcast %401 : vector<8x1xf32> to vector<8x8xf32>
    %403 = arith.subf %399, %402 : vector<8x8xf32>
    %404 = math.exp %403 : vector<8x8xf32>
    %cst_160 = arith.constant dense<0.000000e+00> : vector<8xf32>
    %405 = vector.multi_reduction <add>, %404, %cst_160 [1] : vector<8x8xf32> to vector<8xf32>
    %406 = vector.shape_cast %405 : vector<8xf32> to vector<8x1xf32>
    %407 = vector.broadcast %406 : vector<8x1xf32> to vector<8x8xf32>
    %408 = arith.divf %404, %407 : vector<8x8xf32>
    %409 = arith.truncf %408 : vector<8x8xf32> to vector<8x8xbf16>
    %410 = vector.extract_strided_slice %396 {offsets = [0, 0], sizes = [8, 8], strides = [1, 1]} : vector<8x32xbf16> to vector<8x8xbf16>
    %cst_161 = arith.constant dense<0.000000e+00> : vector<8x8xf32>
    %411 = tpu.matmul %409, %410, %cst_161 {dimension_numbers = #tpu.dot_dimension_numbers<[1], [0], [0], [1], [0, 0, 1, 1], [], []>} : vector<8x8xbf16>, vector<8x8xbf16>, vector<8x8xf32> -> vector<8x8xf32>
    %412 = vector.extract_strided_slice %394 {offsets = [0, 8], sizes = [8, 8], strides = [1, 1]} : vector<8x32xbf16> to vector<8x8xbf16>
    %413 = vector.extract_strided_slice %395 {offsets = [0, 8], sizes = [8, 8], strides = [1, 1]} : vector<8x32xbf16> to vector<8x8xbf16>
    %cst_162 = arith.constant dense<0.000000e+00> : vector<8x8xf32>
    %414 = tpu.matmul %412, %413, %cst_162 {dimension_numbers = #tpu.dot_dimension_numbers<[1], [1], [0], [0], [0, 0, 1, 0], [], []>} : vector<8x8xbf16>, vector<8x8xbf16>, vector<8x8xf32> -> vector<8x8xf32>
    %cst_163 = arith.constant dense<0xFF800000> : vector<8xf32>
    %415 = vector.multi_reduction <maximumf>, %414, %cst_163 [1] : vector<8x8xf32> to vector<8xf32>
    %416 = vector.shape_cast %415 : vector<8xf32> to vector<8x1xf32>
    %417 = vector.broadcast %416 : vector<8x1xf32> to vector<8x8xf32>
    %418 = arith.subf %414, %417 : vector<8x8xf32>
    %419 = math.exp %418 : vector<8x8xf32>
    %cst_164 = arith.constant dense<0.000000e+00> : vector<8xf32>
    %420 = vector.multi_reduction <add>, %419, %cst_164 [1] : vector<8x8xf32> to vector<8xf32>
    %421 = vector.shape_cast %420 : vector<8xf32> to vector<8x1xf32>
    %422 = vector.broadcast %421 : vector<8x1xf32> to vector<8x8xf32>
    %423 = arith.divf %419, %422 : vector<8x8xf32>
    %424 = arith.truncf %423 : vector<8x8xf32> to vector<8x8xbf16>
    %425 = vector.extract_strided_slice %396 {offsets = [0, 8], sizes = [8, 8], strides = [1, 1]} : vector<8x32xbf16> to vector<8x8xbf16>
    %cst_165 = arith.constant dense<0.000000e+00> : vector<8x8xf32>
    %426 = tpu.matmul %424, %425, %cst_165 {dimension_numbers = #tpu.dot_dimension_numbers<[1], [0], [0], [1], [0, 0, 1, 1], [], []>} : vector<8x8xbf16>, vector<8x8xbf16>, vector<8x8xf32> -> vector<8x8xf32>
    %427 = vector.extract_strided_slice %394 {offsets = [0, 16], sizes = [8, 8], strides = [1, 1]} : vector<8x32xbf16> to vector<8x8xbf16>
    %428 = vector.extract_strided_slice %395 {offsets = [0, 16], sizes = [8, 8], strides = [1, 1]} : vector<8x32xbf16> to vector<8x8xbf16>
    %cst_166 = arith.constant dense<0.000000e+00> : vector<8x8xf32>
    %429 = tpu.matmul %427, %428, %cst_166 {dimension_numbers = #tpu.dot_dimension_numbers<[1], [1], [0], [0], [0, 0, 1, 0], [], []>} : vector<8x8xbf16>, vector<8x8xbf16>, vector<8x8xf32> -> vector<8x8xf32>
    %cst_167 = arith.constant dense<0xFF800000> : vector<8xf32>
    %430 = vector.multi_reduction <maximumf>, %429, %cst_167 [1] : vector<8x8xf32> to vector<8xf32>
    %431 = vector.shape_cast %430 : vector<8xf32> to vector<8x1xf32>
    %432 = vector.broadcast %431 : vector<8x1xf32> to vector<8x8xf32>
    %433 = arith.subf %429, %432 : vector<8x8xf32>
    %434 = math.exp %433 : vector<8x8xf32>
    %cst_168 = arith.constant dense<0.000000e+00> : vector<8xf32>
    %435 = vector.multi_reduction <add>, %434, %cst_168 [1] : vector<8x8xf32> to vector<8xf32>
    %436 = vector.shape_cast %435 : vector<8xf32> to vector<8x1xf32>
    %437 = vector.broadcast %436 : vector<8x1xf32> to vector<8x8xf32>
    %438 = arith.divf %434, %437 : vector<8x8xf32>
    %439 = arith.truncf %438 : vector<8x8xf32> to vector<8x8xbf16>
    %440 = vector.extract_strided_slice %396 {offsets = [0, 16], sizes = [8, 8], strides = [1, 1]} : vector<8x32xbf16> to vector<8x8xbf16>
    %cst_169 = arith.constant dense<0.000000e+00> : vector<8x8xf32>
    %441 = tpu.matmul %439, %440, %cst_169 {dimension_numbers = #tpu.dot_dimension_numbers<[1], [0], [0], [1], [0, 0, 1, 1], [], []>} : vector<8x8xbf16>, vector<8x8xbf16>, vector<8x8xf32> -> vector<8x8xf32>
    %442 = vector.extract_strided_slice %394 {offsets = [0, 24], sizes = [8, 8], strides = [1, 1]} : vector<8x32xbf16> to vector<8x8xbf16>
    %443 = vector.extract_strided_slice %395 {offsets = [0, 24], sizes = [8, 8], strides = [1, 1]} : vector<8x32xbf16> to vector<8x8xbf16>
    %cst_170 = arith.constant dense<0.000000e+00> : vector<8x8xf32>
    %444 = tpu.matmul %442, %443, %cst_170 {dimension_numbers = #tpu.dot_dimension_numbers<[1], [1], [0], [0], [0, 0, 1, 0], [], []>} : vector<8x8xbf16>, vector<8x8xbf16>, vector<8x8xf32> -> vector<8x8xf32>
    %cst_171 = arith.constant dense<0xFF800000> : vector<8xf32>
    %445 = vector.multi_reduction <maximumf>, %444, %cst_171 [1] : vector<8x8xf32> to vector<8xf32>
    %446 = vector.shape_cast %445 : vector<8xf32> to vector<8x1xf32>
    %447 = vector.broadcast %446 : vector<8x1xf32> to vector<8x8xf32>
    %448 = arith.subf %444, %447 : vector<8x8xf32>
    %449 = math.exp %448 : vector<8x8xf32>
    %cst_172 = arith.constant dense<0.000000e+00> : vector<8xf32>
    %450 = vector.multi_reduction <add>, %449, %cst_172 [1] : vector<8x8xf32> to vector<8xf32>
    %451 = vector.shape_cast %450 : vector<8xf32> to vector<8x1xf32>
    %452 = vector.broadcast %451 : vector<8x1xf32> to vector<8x8xf32>
    %453 = arith.divf %449, %452 : vector<8x8xf32>
    %454 = arith.truncf %453 : vector<8x8xf32> to vector<8x8xbf16>
    %455 = vector.extract_strided_slice %396 {offsets = [0, 24], sizes = [8, 8], strides = [1, 1]} : vector<8x32xbf16> to vector<8x8xbf16>
    %cst_173 = arith.constant dense<0.000000e+00> : vector<8x8xf32>
    %456 = tpu.matmul %454, %455, %cst_173 {dimension_numbers = #tpu.dot_dimension_numbers<[1], [0], [0], [1], [0, 0, 1, 1], [], []>} : vector<8x8xbf16>, vector<8x8xbf16>, vector<8x8xf32> -> vector<8x8xf32>
    %457 = tpu.concatenate %411, %426, %441, %456 in 1 : vector<8x8xf32>, vector<8x8xf32>, vector<8x8xf32>, vector<8x8xf32> -> vector<8x32xf32>
    %458 = arith.truncf %457 : vector<8x32xf32> to vector<8x32xbf16>
    %c1_174 = arith.constant 1 : index
    %c0_175 = arith.constant 0 : index
    %c0_176 = arith.constant 0 : index
    %459 = vector.load %arg9[%c1_174, %c0_175, %c0_176] : memref<2x32x32xbf16, #tpu.memory_space<vmem>>, vector<1x32x32xbf16>
    %460 = vector.shape_cast %459 : vector<1x32x32xbf16> to vector<32x32xbf16>
    %cst_177 = arith.constant dense<0.000000e+00> : vector<8x32xf32>
    %461 = tpu.matmul %458, %460, %cst_177 {dimension_numbers = #tpu.dot_dimension_numbers<[1], [0], [0], [1], [0, 0, 1, 1], [], []>} : vector<8x32xbf16>, vector<32x32xbf16>, vector<8x32xf32> -> vector<8x32xf32>
    %462 = arith.addf %461, %382 : vector<8x32xf32>
    %c1_178 = arith.constant 1 : index
    %c0_179 = arith.constant 0 : index
    %c0_180 = arith.constant 0 : index
    %463 = vector.load %arg10[%c1_178, %c0_179, %c0_180] : memref<2x1x32xf32, #tpu.memory_space<vmem>>, vector<1x1x32xf32>
    %464 = vector.shape_cast %463 : vector<1x1x32xf32> to vector<1x32xf32>
    %c1_181 = arith.constant 1 : index
    %c0_182 = arith.constant 0 : index
    %c0_183 = arith.constant 0 : index
    %465 = vector.load %arg11[%c1_181, %c0_182, %c0_183] : memref<2x1x32xf32, #tpu.memory_space<vmem>>, vector<1x1x32xf32>
    %466 = vector.shape_cast %465 : vector<1x1x32xf32> to vector<1x32xf32>
    %cst_184 = arith.constant dense<0.000000e+00> : vector<8xf32>
    %467 = vector.multi_reduction <add>, %462, %cst_184 [1] : vector<8x32xf32> to vector<8xf32>
    %468 = vector.shape_cast %467 : vector<8xf32> to vector<8x1xf32>
    %cst_185 = arith.constant 3.200000e+01 : f32
    %469 = vector.broadcast %cst_185 : f32 to vector<8x1xf32>
    %470 = arith.divf %468, %469 : vector<8x1xf32>
    %471 = vector.broadcast %470 : vector<8x1xf32> to vector<8x32xf32>
    %472 = arith.subf %462, %471 : vector<8x32xf32>
    %473 = arith.mulf %472, %472 : vector<8x32xf32>
    %cst_186 = arith.constant dense<0.000000e+00> : vector<8xf32>
    %474 = vector.multi_reduction <add>, %473, %cst_186 [1] : vector<8x32xf32> to vector<8xf32>
    %475 = vector.shape_cast %474 : vector<8xf32> to vector<8x1xf32>
    %cst_187 = arith.constant 3.200000e+01 : f32
    %476 = vector.broadcast %cst_187 : f32 to vector<8x1xf32>
    %477 = arith.divf %475, %476 : vector<8x1xf32>
    %478 = vector.broadcast %470 : vector<8x1xf32> to vector<8x32xf32>
    %479 = arith.subf %462, %478 : vector<8x32xf32>
    %cst_188 = arith.constant 9.99999974E-6 : f32
    %480 = vector.broadcast %cst_188 : f32 to vector<8x1xf32>
    %481 = arith.addf %477, %480 : vector<8x1xf32>
    %482 = math.rsqrt %481 : vector<8x1xf32>
    %483 = vector.broadcast %482 : vector<8x1xf32> to vector<8x32xf32>
    %484 = arith.mulf %479, %483 : vector<8x32xf32>
    %485 = vector.broadcast %464 : vector<1x32xf32> to vector<8x32xf32>
    %486 = arith.mulf %484, %485 : vector<8x32xf32>
    %487 = vector.broadcast %466 : vector<1x32xf32> to vector<8x32xf32>
    %488 = arith.addf %486, %487 : vector<8x32xf32>
    %489 = arith.truncf %488 : vector<8x32xf32> to vector<8x32xbf16>
    %c1_189 = arith.constant 1 : index
    %c0_190 = arith.constant 0 : index
    %c0_191 = arith.constant 0 : index
    %490 = vector.load %arg12[%c1_189, %c0_190, %c0_191] : memref<2x32x64xbf16, #tpu.memory_space<vmem>>, vector<1x32x64xbf16>
    %491 = vector.shape_cast %490 : vector<1x32x64xbf16> to vector<32x64xbf16>
    %cst_192 = arith.constant dense<0.000000e+00> : vector<8x64xf32>
    %492 = tpu.matmul %489, %491, %cst_192 {dimension_numbers = #tpu.dot_dimension_numbers<[1], [0], [0], [1], [0, 0, 1, 1], [], []>} : vector<8x32xbf16>, vector<32x64xbf16>, vector<8x64xf32> -> vector<8x64xf32>
    %c1_193 = arith.constant 1 : index
    %c0_194 = arith.constant 0 : index
    %c0_195 = arith.constant 0 : index
    %493 = vector.load %arg13[%c1_193, %c0_194, %c0_195] : memref<2x1x64xf32, #tpu.memory_space<vmem>>, vector<1x1x64xf32>
    %494 = vector.shape_cast %493 : vector<1x1x64xf32> to vector<1x64xf32>
    %495 = vector.broadcast %494 : vector<1x64xf32> to vector<8x64xf32>
    %496 = arith.addf %492, %495 : vector<8x64xf32>
    %cst_196 = arith.constant 0.000000e+00 : f32
    %497 = vector.broadcast %cst_196 : f32 to vector<8x64xf32>
    %498 = arith.maximumf %496, %497 : vector<8x64xf32>
    %499 = arith.truncf %498 : vector<8x64xf32> to vector<8x64xbf16>
    %c1_197 = arith.constant 1 : index
    %c0_198 = arith.constant 0 : index
    %c0_199 = arith.constant 0 : index
    %500 = vector.load %arg14[%c1_197, %c0_198, %c0_199] : memref<2x64x32xbf16, #tpu.memory_space<vmem>>, vector<1x64x32xbf16>
    %501 = vector.shape_cast %500 : vector<1x64x32xbf16> to vector<64x32xbf16>
    %cst_200 = arith.constant dense<0.000000e+00> : vector<8x32xf32>
    %502 = tpu.matmul %499, %501, %cst_200 {dimension_numbers = #tpu.dot_dimension_numbers<[1], [0], [0], [1], [0, 0, 1, 1], [], []>} : vector<8x64xbf16>, vector<64x32xbf16>, vector<8x32xf32> -> vector<8x32xf32>
    %c1_201 = arith.constant 1 : index
    %c0_202 = arith.constant 0 : index
    %c0_203 = arith.constant 0 : index
    %503 = vector.load %arg15[%c1_201, %c0_202, %c0_203] : memref<2x1x32xf32, #tpu.memory_space<vmem>>, vector<1x1x32xf32>
    %504 = vector.shape_cast %503 : vector<1x1x32xf32> to vector<1x32xf32>
    %505 = vector.broadcast %504 : vector<1x32xf32> to vector<8x32xf32>
    %506 = arith.addf %502, %505 : vector<8x32xf32>
    %507 = arith.addf %488, %506 : vector<8x32xf32>
    %c1_204 = arith.constant 1 : index
    %c0_205 = arith.constant 0 : index
    %c0_206 = arith.constant 0 : index
    %508 = vector.load %arg16[%c1_204, %c0_205, %c0_206] : memref<2x1x32xf32, #tpu.memory_space<vmem>>, vector<1x1x32xf32>
    %509 = vector.shape_cast %508 : vector<1x1x32xf32> to vector<1x32xf32>
    %c1_207 = arith.constant 1 : index
    %c0_208 = arith.constant 0 : index
    %c0_209 = arith.constant 0 : index
    %510 = vector.load %arg17[%c1_207, %c0_208, %c0_209] : memref<2x1x32xf32, #tpu.memory_space<vmem>>, vector<1x1x32xf32>
    %511 = vector.shape_cast %510 : vector<1x1x32xf32> to vector<1x32xf32>
    %cst_210 = arith.constant dense<0.000000e+00> : vector<8xf32>
    %512 = vector.multi_reduction <add>, %507, %cst_210 [1] : vector<8x32xf32> to vector<8xf32>
    %513 = vector.shape_cast %512 : vector<8xf32> to vector<8x1xf32>
    %cst_211 = arith.constant 3.200000e+01 : f32
    %514 = vector.broadcast %cst_211 : f32 to vector<8x1xf32>
    %515 = arith.divf %513, %514 : vector<8x1xf32>
    %516 = vector.broadcast %515 : vector<8x1xf32> to vector<8x32xf32>
    %517 = arith.subf %507, %516 : vector<8x32xf32>
    %518 = arith.mulf %517, %517 : vector<8x32xf32>
    %cst_212 = arith.constant dense<0.000000e+00> : vector<8xf32>
    %519 = vector.multi_reduction <add>, %518, %cst_212 [1] : vector<8x32xf32> to vector<8xf32>
    %520 = vector.shape_cast %519 : vector<8xf32> to vector<8x1xf32>
    %cst_213 = arith.constant 3.200000e+01 : f32
    %521 = vector.broadcast %cst_213 : f32 to vector<8x1xf32>
    %522 = arith.divf %520, %521 : vector<8x1xf32>
    %523 = vector.broadcast %515 : vector<8x1xf32> to vector<8x32xf32>
    %524 = arith.subf %507, %523 : vector<8x32xf32>
    %cst_214 = arith.constant 9.99999974E-6 : f32
    %525 = vector.broadcast %cst_214 : f32 to vector<8x1xf32>
    %526 = arith.addf %522, %525 : vector<8x1xf32>
    %527 = math.rsqrt %526 : vector<8x1xf32>
    %528 = vector.broadcast %527 : vector<8x1xf32> to vector<8x32xf32>
    %529 = arith.mulf %524, %528 : vector<8x32xf32>
    %530 = vector.broadcast %509 : vector<1x32xf32> to vector<8x32xf32>
    %531 = arith.mulf %529, %530 : vector<8x32xf32>
    %532 = vector.broadcast %511 : vector<1x32xf32> to vector<8x32xf32>
    %533 = arith.addf %531, %532 : vector<8x32xf32>
    %534 = arith.truncf %533 : vector<8x32xf32> to vector<8x32xbf16>
    %c0_215 = arith.constant 0 : index
    %c0_216 = arith.constant 0 : index
    %535 = vector.load %arg18[%c0_215, %c0_216] : memref<32x128xbf16, #tpu.memory_space<vmem>>, vector<32x128xbf16>
    %cst_217 = arith.constant dense<0.000000e+00> : vector<8x128xf32>
    %536 = tpu.matmul %534, %535, %cst_217 {dimension_numbers = #tpu.dot_dimension_numbers<[1], [0], [0], [1], [0, 0, 1, 1], [], []>} : vector<8x32xbf16>, vector<32x128xbf16>, vector<8x128xf32> -> vector<8x128xf32>
    %c0_218 = arith.constant 0 : index
    %c0_219 = arith.constant 0 : index
    %537 = vector.load %arg19[%c0_218, %c0_219] : memref<1x128xf32, #tpu.memory_space<vmem>>, vector<1x128xf32>
    %538 = vector.broadcast %537 : vector<1x128xf32> to vector<8x128xf32>
    %539 = arith.addf %536, %538 : vector<8x128xf32>
    %c0_220 = arith.constant 0 : index
    %c0_221 = arith.constant 0 : index
    %c0_222 = arith.constant 0 : index
    %540 = vector.load %arg20[%c0_220, %c0_221, %c0_222] : memref<1x8x128xf32, #tpu.memory_space<vmem>>, vector<1x8x128xf32>
    %541 = vector.shape_cast %540 : vector<1x8x128xf32> to vector<8x128xf32>
    %542 = vector.shape_cast %539 : vector<8x128xf32> to vector<1x8x128xf32>
    tpu.vector_store %arg20[%c0_220, %c0_221, %c0_222], %542 {strides = array<i32>} : memref<1x8x128xf32, #tpu.memory_space<vmem>>, vector<1x8x128xf32>,
    return
  }
  func.func @transform_0(%arg0: i32) -> (i32, i32, i32) {
    %c0_i32 = arith.constant 0 : i32
    %c0_i32_0 = arith.constant 0 : i32
    %c0_i32_1 = arith.constant 0 : i32
    return %arg0, %c0_i32, %c0_i32_0 : i32, i32, i32
  }
  func.func @transform_1(%arg0: i32) -> (i32, i32, i32) {
    %c0_i32 = arith.constant 0 : i32
    %c0_i32_0 = arith.constant 0 : i32
    %c0_i32_1 = arith.constant 0 : i32
    return %arg0, %c0_i32, %c0_i32_0 : i32, i32, i32
  }
  func.func @transform_2(%arg0: i32) -> (i32, i32, i32) {
    %c0_i32 = arith.constant 0 : i32
    %c0_i32_0 = arith.constant 0 : i32
    %c0_i32_1 = arith.constant 0 : i32
    %c0_i32_2 = arith.constant 0 : i32
    return %c0_i32, %c0_i32_0, %c0_i32_1 : i32, i32, i32
  }
  func.func @transform_3(%arg0: i32) -> (i32, i32, i32) {
    %c0_i32 = arith.constant 0 : i32
    %c0_i32_0 = arith.constant 0 : i32
    %c0_i32_1 = arith.constant 0 : i32
    %c0_i32_2 = arith.constant 0 : i32
    return %c0_i32, %c0_i32_0, %c0_i32_1 : i32, i32, i32
  }
  func.func @transform_4(%arg0: i32) -> (i32, i32, i32) {
    %c0_i32 = arith.constant 0 : i32
    %c0_i32_0 = arith.constant 0 : i32
    %c0_i32_1 = arith.constant 0 : i32
    %c0_i32_2 = arith.constant 0 : i32
    return %c0_i32, %c0_i32_0, %c0_i32_1 : i32, i32, i32
  }
  func.func @transform_5(%arg0: i32) -> (i32, i32, i32) {
    %c0_i32 = arith.constant 0 : i32
    %c0_i32_0 = arith.constant 0 : i32
    %c0_i32_1 = arith.constant 0 : i32
    %c0_i32_2 = arith.constant 0 : i32
    return %c0_i32, %c0_i32_0, %c0_i32_1 : i32, i32, i32
  }
  func.func @transform_6(%arg0: i32) -> (i32, i32, i32) {
    %c0_i32 = arith.constant 0 : i32
    %c0_i32_0 = arith.constant 0 : i32
    %c0_i32_1 = arith.constant 0 : i32
    %c0_i32_2 = arith.constant 0 : i32
    return %c0_i32, %c0_i32_0, %c0_i32_1 : i32, i32, i32
  }
  func.func @transform_7(%arg0: i32) -> (i32, i32, i32) {
    %c0_i32 = arith.constant 0 : i32
    %c0_i32_0 = arith.constant 0 : i32
    %c0_i32_1 = arith.constant 0 : i32
    %c0_i32_2 = arith.constant 0 : i32
    return %c0_i32, %c0_i32_0, %c0_i32_1 : i32, i32, i32
  }
  func.func @transform_8(%arg0: i32) -> (i32, i32, i32) {
    %c0_i32 = arith.constant 0 : i32
    %c0_i32_0 = arith.constant 0 : i32
    %c0_i32_1 = arith.constant 0 : i32
    %c0_i32_2 = arith.constant 0 : i32
    return %c0_i32, %c0_i32_0, %c0_i32_1 : i32, i32, i32
  }
  func.func @transform_9(%arg0: i32) -> (i32, i32, i32) {
    %c0_i32 = arith.constant 0 : i32
    %c0_i32_0 = arith.constant 0 : i32
    %c0_i32_1 = arith.constant 0 : i32
    %c0_i32_2 = arith.constant 0 : i32
    return %c0_i32, %c0_i32_0, %c0_i32_1 : i32, i32, i32
  }
  func.func @transform_10(%arg0: i32) -> (i32, i32, i32) {
    %c0_i32 = arith.constant 0 : i32
    %c0_i32_0 = arith.constant 0 : i32
    %c0_i32_1 = arith.constant 0 : i32
    %c0_i32_2 = arith.constant 0 : i32
    return %c0_i32, %c0_i32_0, %c0_i32_1 : i32, i32, i32
  }
  func.func @transform_11(%arg0: i32) -> (i32, i32, i32) {
    %c0_i32 = arith.constant 0 : i32
    %c0_i32_0 = arith.constant 0 : i32
    %c0_i32_1 = arith.constant 0 : i32
    %c0_i32_2 = arith.constant 0 : i32
    return %c0_i32, %c0_i32_0, %c0_i32_1 : i32, i32, i32
  }
  func.func @transform_12(%arg0: i32) -> (i32, i32, i32) {
    %c0_i32 = arith.constant 0 : i32
    %c0_i32_0 = arith.constant 0 : i32
    %c0_i32_1 = arith.constant 0 : i32
    %c0_i32_2 = arith.constant 0 : i32
    return %c0_i32, %c0_i32_0, %c0_i32_1 : i32, i32, i32
  }
  func.func @transform_13(%arg0: i32) -> (i32, i32, i32) {
    %c0_i32 = arith.constant 0 : i32
    %c0_i32_0 = arith.constant 0 : i32
    %c0_i32_1 = arith.constant 0 : i32
    %c0_i32_2 = arith.constant 0 : i32
    return %c0_i32, %c0_i32_0, %c0_i32_1 : i32, i32, i32
  }
  func.func @transform_14(%arg0: i32) -> (i32, i32, i32) {
    %c0_i32 = arith.constant 0 : i32
    %c0_i32_0 = arith.constant 0 : i32
    %c0_i32_1 = arith.constant 0 : i32
    %c0_i32_2 = arith.constant 0 : i32
    return %c0_i32, %c0_i32_0, %c0_i32_1 : i32, i32, i32
  }
  func.func @transform_15(%arg0: i32) -> (i32, i32, i32) {
    %c0_i32 = arith.constant 0 : i32
    %c0_i32_0 = arith.constant 0 : i32
    %c0_i32_1 = arith.constant 0 : i32
    %c0_i32_2 = arith.constant 0 : i32
    return %c0_i32, %c0_i32_0, %c0_i32_1 : i32, i32, i32
  }
  func.func @transform_16(%arg0: i32) -> (i32, i32, i32) {
    %c0_i32 = arith.constant 0 : i32
    %c0_i32_0 = arith.constant 0 : i32
    %c0_i32_1 = arith.constant 0 : i32
    %c0_i32_2 = arith.constant 0 : i32
    return %c0_i32, %c0_i32_0, %c0_i32_1 : i32, i32, i32
  }
  func.func @transform_17(%arg0: i32) -> (i32, i32) {
    %c0_i32 = arith.constant 0 : i32
    %c0_i32_0 = arith.constant 0 : i32
    %c0_i32_1 = arith.constant 0 : i32
    return %c0_i32, %c0_i32_0 : i32, i32
  }
  func.func @transform_18(%arg0: i32) -> (i32, i32) {
    %c0_i32 = arith.constant 0 : i32
    %c0_i32_0 = arith.constant 0 : i32
    %c0_i32_1 = arith.constant 0 : i32
    return %c0_i32, %c0_i32_0 : i32, i32
  }
  func.func @transform_19(%arg0: i32) -> (i32, i32, i32) {
    %c0_i32 = arith.constant 0 : i32
    %c0_i32_0 = arith.constant 0 : i32
    %c0_i32_1 = arith.constant 0 : i32
    return %arg0, %c0_i32, %c0_i32_0 : i32, i32, i32
  }
}

</mosaic_0001>

<bundles_post_ra>
// kernel: decoder_forward.1
= control target key start
LH: loop header
LB: loop body
LE: loop exit
PB: predicated region body
PF: predicated region fallthrough
CT: control target
= control target key end

     0   :  { %s5332_s0 = inlined_call_operand.vmem [shape: f32[2,8,32], index: 0, kind: input, shape index: {}]   ;;  %s5333_s1 = inlined_call_operand.vmem [shape: f32[2,8,32], index: 1, kind: input, shape index: {}]   ;;  %s5334_s2 = inlined_call_operand.vmem [shape: bf16[2,32,96], index: 2, kind: input, shape index: {}]   ;;  %s5335_s3 = inlined_call_operand.vmem [shape: bf16[2,32,32], index: 3, kind: input, shape index: {}]   ;;  %s5336_s4 = inlined_call_operand.vmem [shape: f32[2,1,32], index: 4, kind: input, shape index: {}]   ;;  %s5337_s5 = inlined_call_operand.vmem [shape: f32[2,1,32], index: 5, kind: input, shape index: {}]   ;;  %s5338_s6 = inlined_call_operand.vmem [shape: bf16[2,32,32], index: 6, kind: input, shape index: {}]   ;;  %s5339_s7 = inlined_call_operand.vmem [shape: bf16[2,32,64], index: 7, kind: input, shape index: {}]   ;;  %s5340_s8 = inlined_call_operand.vmem [shape: bf16[2,32,32], index: 8, kind: input, shape index: {}]   ;;  %s5341_s9 = inlined_call_operand.vmem [shape: f32[2,1,32], index: 9, kind: input, shape index: {}]   ;;  %s5342_s10 = inlined_call_operand.vmem [shape: f32[2,1,32], index: 10, kind: input, shape index: {}]   ;;  %s5343_s11 = inlined_call_operand.vmem [shape: bf16[2,32,64], index: 11, kind: input, shape index: {}]   ;;  %s5344_s12 = inlined_call_operand.vmem [shape: f32[2,1,64], index: 12, kind: input, shape index: {}]   ;;  %s5345_s13 = inlined_call_operand.vmem [shape: bf16[2,64,32], index: 13, kind: input, shape index: {}]   ;;  %s5346_s14 = inlined_call_operand.vmem [shape: f32[2,1,32], index: 14, kind: input, shape index: {}]   ;;  %s5347_s15 = inlined_call_operand.vmem [shape: f32[2,1,32], index: 15, kind: input, shape index: {}]   ;;  %s5348_s16 = inlined_call_operand.vmem [shape: f32[2,1,32], index: 16, kind: input, shape index: {}]   ;;  %s5349_s17 = inlined_call_operand.vmem [shape: bf16[32,128], index: 17, kind: input, shape index: {}]   ;;  %s5350_s18 = inlined_call_operand.vmem [shape: f32[1,128], index: 18, kind: input, shape index: {}]   ;;  %s5351_s19 = inlined_call_operand.hbm [shape: f32[2,8,128], index: 19, kind: output, shape index: {}]  }
   0x1   :  { %5392 = sst [smem:[#allocation14_spill]] %s5332_s0 }
   0x2   :  { %5393 = sst [smem:[#allocation15_spill]] %s5333_s1 }
   0x3   :  { %5394 = sst [smem:[#allocation16_spill]] %s5334_s2 }
   0x4   :  { %5395 = sst [smem:[#allocation17_spill]] %s5335_s3 }
   0x5   :  { %5396 = sst [smem:[#allocation18_spill]] %s5337_s5 }
   0x6   :  { %5397 = sst [smem:[#allocation19_spill]] %s5340_s8 }
   0x7   :  { %5398 = sst [smem:[#allocation20_spill]] %s5349_s17 }
   0x8   :  { %5399 = sst [smem:[#allocation21_spill]] %s5350_s18 }
   0x9   :  { %5400 = sst [smem:[#allocation22_spill]] %s5351_s19 }
   0xa   :  { %24 = vsyncpa [#allocation3], 0 }
   0xb   :  { %26 = vsyncpa [#allocation3 + $0x1], 0  ;;  %s4636_s0 = smov 0   ;;  %s4638_s30 = smov 0  }
   0xc   :  { %s4640_s20 = smov 0   ;;  %s4642_s21 = smov 0  }
   0xd LB: > { %5401 = sst [smem:[#allocation5_spill]] %s4505_s0  ;;  %s4657_s1 = sadd.s32 4294967295, %s4517_s21   ;;  %s4517_s21 = sphi %s4642_s21, %s5447_s21   ;;  %s4513_s20 = sphi %s4640_s20, %s5450_s20   ;;  %s4509_s30 = sphi %s4638_s30, %s5449_s30   ;;  %s4505_s0 = sphi %s4636_s0, %s5448_s0  }
   0xe   : > { %5402 = sst [smem:[#allocation6_spill]] %s4509_s30  ;;  %s3708_s22 = sadd.s32 4294967294, %s4517_s21  }
   0xf   : > { %5403 = sst [smem:[#allocation7_spill]] %s4513_s20  ;;  %s4661_s2 = sadd.s32 1, %s4517_s21  }
  0x10   : > { %5404 = sst [smem:[#allocation8_spill]] %s4517_s21  ;;  %s448_s23 = sadd.s32 1, %s4513_s20 }
  0x11   : > { %5405 = sst [smem:[#allocation9_spill]] %s4657_s1  ;;  %s445_s24 = ssub.s32 %s4517_s21, %s4661_s2 }
  0x12   : > { %5406 = sst [smem:[#allocation10_spill]] %s4661_s2  ;;  %p458_p0 = scmp.ne.s32.totalorder %s4513_s20, %s4509_s30 }
  0x13   : > { %p446_p1 = scmp.eq.s32.totalorder %s445_s24, 0  ;;  %p459_p2 = scmp.eq.s32.totalorder %s4657_s1, 1 }
  0x14   : > { %p464_p3 = scmp.ne.s32.totalorder %s4509_s30, %s4505_s0  ;;  %p465_p4 = scmp.eq.s32.totalorder %s3708_s22, 1 }
  0x15   : > { %s4672_s25 = scalar_select %p446_p1, %s4513_s20, %s448_s23  }
  0x16   : > { %p4674_p5 = por %p459_p2, %p458_p0  ;;  %p4678_p6 = por %p465_p4, %p464_p3 }
  0x17   : > { %5407 = sst [smem:[#allocation11_spill]] %s4672_s25  ;;  %p3711_p7 = scmp.ge.s32.totalorder %s4517_s21, 1 }
  0x18   : > { %s5408_s3 = scalar_select %p4674_p5, 1, 0 }
  0x19   : > { %s5410_s26 = scalar_select %p4678_p6, 1, 0 }
  0x1a   : > { %5409 = sst [smem:[#allocation12_spill]] %s5408_s3  ;;  %p548_p8 = scmp.lt.s32.totalorder %s4517_s21, 3 }
  0x1b   : > { %5411 = sst [smem:[#allocation13_spill]] %s5410_s26 }
  0x1c   : > { %p549_p9 = pnand %p3711_p7, %p548_p8 }
  0x1d   : > { %s5412_s29 = sld [smem:[#allocation16_spill]] (!%p549_p9)  ;;  %v4519_v1 = vmov (!%p549_p9), 0.0   ;;  %vm4520_vm0 = vmmov (!%p549_p9), 0   ;;  %p607_p10 = scmp.lt.s32.totalorder (!%p549_p9), %s4657_s1, 1  ;;  %vm641_vm1 = vcmask (!%p549_p9), 261120   ;;  %vm691_vm2 = vcmask (!%p549_p9), 64512  }
  0x1e   : > { %552 = sbr.rel (%p549_p9) target bundleno = 8858 (0x229a), region = 96  ;;  %3970 = vmatprep.subr.bf16.mxu0 (!%p549_p9), %v4519_v1  ;;  %3978 = vmatprep.subr.bf16.mxu1 (!%p549_p9), %v4519_v1  ;;  %s5413_s23 = sld [smem:[#allocation14_spill]] (!%p549_p9)  ;;  %v619_v23 = vlaneseq (!%p549_p9)  ;;  %vm756_vm4 = vcmask (!%p549_p9), 1043456   ;;  %vm1147_vm5 = vcmask (!%p549_p9), 130048   ;;  %vm1149_vm6 = vcmask (!%p549_p9), 195584  }
  0x1f   : > { %3974 = vmatprep.mubr.msk.bf16.mxu0 (!%p549_p9), %vm4520_vm0, %v4519_v1  ;;  %3980 = vmatprep.mubr.msk.bf16.mxu1 (!%p549_p9), %vm4520_vm0, %v4519_v1  ;;  %s5356_s28 = smov (!%p549_p9), 96   ;;  %s5358_s22 = smov (!%p549_p9), 88   ;;  %vm2013_vm7 = vcmask (!%p549_p9), 523264  }
  0x20   : > { %s5360_s20 = smov (!%p549_p9), 72   ;;  %v620_v24 = vshrl.u32 (!%p549_p9), %v619_v23, 7  ;;  %v622_v25 = vand.u32 (!%p549_p9), 127, %v619_v23  ;;  %s5379_s26 = smov (!%p549_p9), 16  }
  0x21   : > { %s5420_s5 = sld [smem:[#allocation18_spill]] (!%p549_p9)  ;;  %s5425_s0 = smov (!%p549_p9), 80  }
  0x22   : > { %vm4748_vm3 = vcmp.ge.s32.totalorder (!%p549_p9), %v620_v24, %v622_v25  ;;  %s5426_s21 = smov (!%p549_p9), 72   ;;  %s5428_s8 = sld [smem:[#allocation19_spill]] (!%p549_p9) }
  0x23   : > { %v4345_v0 = vld [vmem:[%s5412_s29] sm:$0xff] (!%p549_p9)   ;;  %v4346_v2 = vld [vmem:[%s5412_s29 + $0x8] sm:$0xff] (!%p549_p9)   ;;  %s5429_s2 = smov (!%p549_p9), 8   ;;  %s5430_s18 = smov (!%p549_p9), 16  }
  0x24   : > { %3971 = vmatpush3.bf16.msra.mxu0 (!%p549_p9), %v4345_v0  ;;  %s5434_s3 = smov (!%p549_p9), 48   ;;  %s5439_s30 = sld [smem:[#allocation6_spill]] (!%p549_p9) }
  0x25   : > { %3972 = vmatprep.subr.bf16.mxu0 %v4519_v1  ;;  %s4699_s24 = scalar_select %p607_p10, %s4657_s1, 1 }
  0x26   : > { %s5436_s1 = sld [smem:[#allocation18_spill]] }
  0x27   : > { %s5354_s27 = sshll.u32 %s4699_s24, 3 }
  0x28   : > { %3973 = vmatpush3.bf16.msra.mxu0 %v4346_v2  ;;  %s610_s25 = scalar_lea.vmem %s5413_s23, %s5354_s27  ;;  %s5362_s23 = smov 80  }
  0x29   : > { %3984 = vmatprep.subr.bf16.mxu0 %v4519_v1  ;;  %v4708_v3 = vld [vmem:[%s610_s25] sm:$0xff]  ;;  %s5372_s25 = smov 120   ;;  %s5370_s27 = smov 112  }
  0x2a   : > { %v624_v4 = vpack.c.bf16 %v4708_v3, %v4708_v3 }
  0x2c   : > { %3975 = vmatmul.mubr.msk.bf16.vlgmr.msra.gmra.mrb[0].mxu0 %vm641_vm1, %v624_v4 }
  0x2d   : > { %3986 = vmatprep.mubr.msk.bf16.mxu0 %vm4520_vm0, %v4519_v1 }
  0xff   : > { %v679_v5 = vpop.f32.mrb[0].mxu0 }
 0x100   : > { %v685_v6 = vmul.f32 0.17677669, %v679_v5  ;;  %v4715_v7 = vpack.c.bf16 %v679_v5, %v679_v5  ;;  %v3976_v8 = vpop.f32.mrb[1].mxu0 }
 0x101   : > { %v682_v9 = vpop.f32.mrb[2].mxu0 }
 0x102   : > { %v686_v10 = vpack.c.bf16 %v685_v6, %v685_v6  ;;  %689 = vrot.lane.b32.xlu0 %v4715_v7, %s5356_s28  ;;  %v3977_v11 = vpop.f32.mrb[3].mxu0  ;;  %s5364_s28 = smov 104  }
 0x104   : > { %801 = vrot.lane.b32.xlu1 %v686_v10, %s5372_s25  ;;  %s5421_s25 = smov 120  }
 0x106   : > { %803 = vrot.lane.b32.xlu0 %v4715_v7, %s5358_s22  ;;  %s5368_s22 = smov 56  }
 0x108   : > { %914 = vrot.lane.b32.xlu1 %v4715_v7, %s5362_s23  ;;  %s5366_s23 = smov 40  }
 0x10a   : > { %912 = vrot.lane.b32.xlu0 %v686_v10, %s5370_s27 }
 0x10c   : > { %1025 = vrot.lane.b32.xlu1 %v4715_v7, %s5360_s20  ;;  %s5369_s20 = smov 64  }
 0x10e   : > { %1023 = vrot.lane.b32.xlu0 %v686_v10, %s5364_s28  ;;  %s5367_s28 = smov 48  }
 0x174   : > { %v690_v12 = vpop.permute.xlu0 %689 }
 0x175   : > { %v696_v13 = vsel %vm691_vm2, %v690_v12, 0 }
 0x176   : > { %3979 = vmatpush3.bf16.xpose.msra.mxu1 %v696_v13  ;;  %v802_v15 = vpop.permute.xlu1 %801 }
 0x177   : > { %3990 = vmatprep.subr.bf16.mxu1 %v4519_v1 }
 0x178   : > { %v804_v14 = vpop.permute.xlu0 %803 }
 0x179   : > { %v809_v16 = vsel %vm691_vm2, %v804_v14, 0 }
 0x17a   : > { %v915_v17 = vpop.permute.xlu1 %914 }
 0x17b   : > { %v920_v18 = vsel %vm691_vm2, %v915_v17, 0 }
 0x17c   : > { %v913_v20 = vpop.permute.xlu0 %912 }
 0x17d   : > { %3981 = vmatmul.mubr.msk.bf16.vlgmr.msra.gmra.mrb[0].mxu1 %vm691_vm2, %v686_v10 }
 0x17e   : > { %3991 = vmatpush3.bf16.xpose.msra.mxu1 %v809_v16  ;;  %3992 = vmatprep.mubr.msk.bf16.mxu1 %vm4520_vm0, %v4519_v1  ;;  %v1026_v19 = vpop.permute.xlu1 %1025 }
 0x17f   : > { %4002 = vmatprep.subr.bf16.mxu1 %v4519_v1  ;;  %v1031_v21 = vsel %vm691_vm2, %v1026_v19, 0 }
 0x180   : > { %v1024_v22 = vpop.permute.xlu0 %1023 }
 0x185   : > { %3993 = vmatmul.mubr.msk.bf16.vlgmr.msra.gmra.mrb[4].mxu1 %vm691_vm2, %v802_v15 }
 0x186   : > { %4003 = vmatpush3.bf16.xpose.msra.mxu1 %v920_v18  ;;  %4004 = vmatprep.mubr.msk.bf16.mxu1 %vm4520_vm0, %v4519_v1 }
 0x187   : > { %4014 = vmatprep.subr.bf16.mxu1 %v4519_v1 }
 0x18d   : > { %4005 = vmatmul.mubr.msk.bf16.vlgmr.msra.gmra.mrb[8].mxu1 %vm691_vm2, %v913_v20 }
 0x18e   : > { %4015 = vmatpush3.bf16.xpose.msra.mxu1 %v1031_v21  ;;  %4016 = vmatprep.mubr.msk.bf16.mxu1 %vm4520_vm0, %v4519_v1 }
 0x18f   : > { %4026 = vmatprep.subr.bf16.mxu1 %v4519_v1 }
 0x195   : > { %4017 = vmatmul.mubr.msk.bf16.vlgmr.msra.gmra.mrb[12].mxu1 %vm691_vm2, %v1024_v22 }
 0x196   : > { %4030 = vmatprep.mubr.msk.bf16.mxu1 %vm4520_vm0, %v4519_v1 }
 0x250   : > { %v732_v27 = vpop.f32.mrb[0].mxu1 }
 0x251   : > { %v738_v28 = vsel %vm4748_vm3, %v732_v27, -1e+20  ;;  %v3982_v29 = vpop.f32.mrb[1].mxu1 }
 0x252   : > { %v735_v30 = vpop.f32.mrb[2].mxu1  ;;  %v739_v31 = vsel %vm691_vm2, %v738_v28, -inf }
 0x253   : > { %740 = vmax.xlane.f32.xlu1 %v739_v31  ;;  %v3983_v32 = vpop.f32.mrb[3].mxu1 }
 0x258   : > { %v845_v33 = vpop.f32.mrb[4].mxu1 }
 0x259   : > { %v851_v34 = vsel %vm4748_vm3, %v845_v33, -1e+20  ;;  %v3994_v35 = vpop.f32.mrb[5].mxu1 }
 0x25a   : > { %v848_v36 = vpop.f32.mrb[6].mxu1  ;;  %v852_v37 = vsel %vm691_vm2, %v851_v34, -inf }
 0x25b   : > { %853 = vmax.xlane.f32.xlu0 %v852_v37  ;;  %v3995_v38 = vpop.f32.mrb[7].mxu1 }
 0x260   : > { %v956_v39 = vpop.f32.mrb[8].mxu1 }
 0x261   : > { %v962_v40 = vsel %vm4748_vm3, %v956_v39, -1e+20  ;;  %v4006_v41 = vpop.f32.mrb[9].mxu1 }
 0x262   : > { %v959_v42 = vpop.f32.mrb[10].mxu1  ;;  %v963_v43 = vsel %vm691_vm2, %v962_v40, -inf }
 0x263   : > { %964 = vmax.xlane.f32.xlu0 %v963_v43  ;;  %v4007_v44 = vpop.f32.mrb[11].mxu1 }
 0x268   : > { %v1067_v45 = vpop.f32.mrb[12].mxu1 }
 0x269   : > { %v1073_v46 = vsel %vm4748_vm3, %v1067_v45, -1e+20  ;;  %v4018_v47 = vpop.f32.mrb[13].mxu1 }
 0x26a   : > { %v1070_v48 = vpop.f32.mrb[14].mxu1  ;;  %v1074_v49 = vsel %vm691_vm2, %v1073_v46, -inf }
 0x26b   : > { %1075 = vmax.xlane.f32.xlu1 %v1074_v49  ;;  %v4019_v50 = vpop.f32.mrb[15].mxu1 }
 0x2e0   : > { %v741_v51 = vpop.xlane.xlu1 %740 }
 0x2e1   : > { %v742_v52 = vsub.f32 %v738_v28, %v741_v51 }
 0x2e3   : > { %v743_v53 = vmul.f32 1.442695, %v742_v52 }
 0x2e5   : > { %4379 = vpow2.f32 %v743_v53 }
 0x2e8   : > { %v854_v54 = vpop.xlane.xlu0 %853 }
 0x2e9   : > { %v855_v55 = vsub.f32 %v851_v34, %v854_v54 }
 0x2eb   : > { %v856_v56 = vmul.f32 1.442695, %v855_v55 }
 0x2ed   : > { %4381 = vpow2.f32 %v856_v56 }
 0x2ef   : > { %v4380_v57 = vpop.eup %4379 }
 0x2f0   : > { %v965_v58 = vpop.xlane.xlu0 %964  ;;  %v745_v59 = vsel %vm691_vm2, %v4380_v57, 0.0 }
 0x2f1   : > { %v966_v60 = vsub.f32 %v962_v40, %v965_v58  ;;  %746 = vadd.xlane.f32.xlu0 %v745_v59 }
 0x2f3   : > { %v967_v61 = vmul.f32 1.442695, %v966_v60 }
 0x2f5   : > { %4383 = vpow2.f32 %v967_v61 }
 0x2f7   : > { %v4382_v62 = vpop.eup %4381 }
 0x2f8   : > { %v858_v63 = vsel %vm691_vm2, %v4382_v62, 0.0  ;;  %v1076_v4 = vpop.xlane.xlu1 %1075 }
 0x2f9   : > { %859 = vadd.xlane.f32.xlu1 %v858_v63  ;;  %v1077_v5 = vsub.f32 %v1073_v46, %v1076_v4 }
 0x2fb   : > { %v1078_v6 = vmul.f32 1.442695, %v1077_v5 }
 0x2fd   : > { %4385 = vpow2.f32 %v1078_v6 }
 0x2ff   : > { %v4384_v0 = vpop.eup %4383 }
 0x300   : > { %v969_v2 = vsel %vm691_vm2, %v4384_v0, 0.0 }
 0x301   : > { %970 = vadd.xlane.f32.xlu0 %v969_v2 }
 0x307   : > { %v4386_v8 = vpop.eup %4385 }
 0x308   : > { %v1080_v9 = vsel %vm691_vm2, %v4386_v8, 0.0 }
 0x30a   : > { %864 = vrot.lane.b32.xlu1 %v4715_v7, %s5368_s22  ;;  %s5419_s22 = sld [smem:[#allocation15_spill]] }
 0x317   : > { %751 = vrot.lane.b32.xlu0 %v4715_v7, %s5369_s20  ;;  %s5416_s20 = sld [smem:[#allocation17_spill]] }
 0x31b   : > { %1086 = vrot.lane.b32.xlu0 %v4715_v7, %s5366_s23  ;;  %s5381_s23 = smov 8  }
 0x31d   : > { %s5417_s27 = smov %s5416_s20  ;;  %v4347_v42 = vld [vmem:[%s5416_s20] sm:$0xff]   ;;  %s5418_s20 = sshll.u32 %s4699_s24, 3 }
 0x31e   : > { %4027 = vmatpush3.bf16.msra.mxu1 %v4347_v42  ;;  %v4348_v43 = vld [vmem:[%s5417_s27 + $0x8] sm:$0xff]   ;;  %s5424_s24 = smov 96  }
 0x31f   : > { %4028 = vmatprep.subr.bf16.mxu1 %v4519_v1 }
 0x322   : > { %4029 = vmatpush3.bf16.msra.mxu1 %v4348_v43 }
 0x323   : > { %4042 = vmatprep.subr.bf16.mxu1 %v4519_v1 }
 0x32e   : > { %1081 = vadd.xlane.f32.xlu1 %v1080_v9 }
 0x33f   : > { %975 = vrot.lane.b32.xlu1 %v4715_v7, %s5367_s28  ;;  %s5377_s28 = smov 24  }
 0x37e   : > { %v747_v10 = vpop.xlane.xlu0 %746 }
 0x37f   : > { %4387 = vrcp.f32 %v747_v10  ;;  %v4350_v10 = vld [vmem:[%s5339_s7 + $0x8] sm:$0xff]  }
 0x386   : > { %v860_v11 = vpop.xlane.xlu1 %859 }
 0x387   : > { %4389 = vrcp.f32 %v860_v11 }
 0x389   : > { %v4388_v12 = vpop.eup %4387 }
 0x38a   : > { %v749_v14 = vmul.f32 %v4388_v12, %v4380_v57  ;;  %v865_v17 = vpop.permute.xlu1 %864  ;;  %v4351_v12 = vld [vmem:[%s5338_s6] sm:$0xff]  }
 0x38b   : > { %v870_v20 = vsel %vm756_vm4, %v865_v17, 0 }
 0x38c   : > { %v750_v18 = vpack.c.bf16 %v749_v14, %v749_v14 }
 0x38e   : > { %v971_v13 = vpop.xlane.xlu0 %970 }
 0x38f   : > { %4391 = vrcp.f32 %v971_v13  ;;  %v4352_v13 = vld [vmem:[%s5338_s6 + $0x8] sm:$0xff]  }
 0x391   : > { %v4390_v19 = vpop.eup %4389 }
 0x392   : > { %v752_v15 = vpop.permute.xlu0 %751  ;;  %v862_v7 = vmul.f32 %v4390_v19, %v4382_v62 }
 0x393   : > { %v758_v16 = vsel %vm756_vm4, %v752_v15, 0 }
 0x394   : > { %3985 = vmatpush3.bf16.msra.mxu0 %v758_v16  ;;  %v863_v21 = vpack.c.bf16 %v862_v7, %v862_v7 }
 0x395   : > { %3996 = vmatprep.subr.bf16.mxu0 %v4519_v1 }
 0x396   : > { %v1087_v28 = vpop.permute.xlu0 %1086 }
 0x397   : > { %3987 = vmatmul.mubr.msk.bf16.vlgmr.msra.gmra.mrb[4].mxu0 %vm691_vm2, %v750_v18  ;;  %v1092_v30 = vsel %vm756_vm4, %v1087_v28, 0  ;;  %v3729_v18 = vld [vmem:[%s5336_s4] ss:$0 sm:$0xff] }
 0x398   : > { %3997 = vmatpush3.bf16.msra.mxu0 %v870_v20  ;;  %3998 = vmatprep.mubr.msk.bf16.mxu0 %vm4520_vm0, %v4519_v1  ;;  %v3730_v20 = vld [vmem:[%s5420_s5] ss:$0 sm:$0xff]  ;;  %s5432_s5 = smov 64  }
 0x399   : > { %4008 = vmatprep.subr.bf16.mxu0 %v4519_v1  ;;  %v4392_v22 = vpop.eup %4391 }
 0x39a   : > { %v973_v24 = vmul.f32 %v4392_v22, %v4384_v0 }
 0x39c   : > { %v974_v29 = vpack.c.bf16 %v973_v24, %v973_v24 }
 0x39f   : > { %3999 = vmatmul.mubr.msk.bf16.vlgmr.msra.gmra.mrb[8].mxu0 %vm691_vm2, %v863_v21 }
 0x3a0   : > { %4010 = vmatprep.mubr.msk.bf16.mxu0 %vm4520_vm0, %v4519_v1 }
 0x3bb   : > { %v1082_v23 = vpop.xlane.xlu1 %1081 }
 0x3bc   : > { %4393 = vrcp.f32 %v1082_v23 }
 0x3bf   : > { %v976_v25 = vpop.permute.xlu1 %975 }
 0x3c0   : > { %v981_v27 = vsel %vm756_vm4, %v976_v25, 0 }
 0x3c1   : > { %4009 = vmatpush3.bf16.msra.mxu0 %v981_v27 }
 0x3c2   : > { %4020 = vmatprep.subr.bf16.mxu0 %v4519_v1 }
 0x3c4   : > { %4011 = vmatmul.mubr.msk.bf16.vlgmr.msra.gmra.mrb[12].mxu0 %vm691_vm2, %v974_v29 }
 0x3c5   : > { %4021 = vmatpush3.bf16.msra.mxu0 %v1092_v30  ;;  %4022 = vmatprep.mubr.msk.bf16.mxu0 %vm4520_vm0, %v4519_v1 }
 0x3c6   : > { %v4394_v31 = vpop.eup %4393  ;;  %4034 = vmatprep.subr.bf16.mxu0 %v4519_v1 }
 0x3c7   : > { %v1084_v32 = vmul.f32 %v4394_v31, %v4386_v8 }
 0x3c9   : > { %v1085_v33 = vpack.c.bf16 %v1084_v32, %v1084_v32 }
 0x3cc   : > { %4023 = vmatmul.mubr.msk.bf16.vlgmr.msra.gmra.mrb[16].mxu0 %vm691_vm2, %v1085_v33 }
 0x3cd   : > { %4038 = vmatprep.mubr.msk.bf16.mxu0 %vm4520_vm0, %v4519_v1  ;;  %4035 = vmatpush3.bf16.msra.mxu0 %v4351_v12 }
 0x3ce   : > { %4036 = vmatprep.subr.bf16.mxu0 %v4519_v1 }
 0x3d1   : > { %4037 = vmatpush3.bf16.msra.mxu0 %v4352_v13 }
 0x3d2   : > { %4050 = vmatprep.subr.bf16.mxu0 %v4519_v1 }
 0x46a   : > { %v794_v34 = vpop.f32.mrb[4].mxu0 }
 0x46b   : > { %v3988_v35 = vpop.f32.mrb[5].mxu0 }
 0x46c   : > { %v797_v36 = vpop.f32.mrb[6].mxu0 }
 0x46d   : > { %v3989_v37 = vpop.f32.mrb[7].mxu0 }
 0x472   : > { %v906_v38 = vpop.f32.mrb[8].mxu0 }
 0x473   : > { %1135 = vrot.lane.b32.xlu1 %v906_v38, %s5381_s23  ;;  %v4000_v39 = vpop.f32.mrb[9].mxu0  ;;  %s5427_s23 = smov 88  }
 0x474   : > { %v909_v40 = vpop.f32.mrb[10].mxu0 }
 0x475   : > { %v4001_v41 = vpop.f32.mrb[11].mxu0 }
 0x497   : > { %v1017_v44 = vpop.f32.mrb[12].mxu0 }
 0x498   : > { %1139 = vrot.lane.b32.xlu0 %v1017_v44, %s5379_s26  ;;  %v4012_v45 = vpop.f32.mrb[13].mxu0  ;;  %s5423_s26 = smov 104  }
 0x499   : > { %v1020_v46 = vpop.f32.mrb[14].mxu0 }
 0x49a   : > { %v4013_v47 = vpop.f32.mrb[15].mxu0 }
 0x49f   : > { %v1128_v48 = vpop.f32.mrb[16].mxu0 }
 0x4a0   : > { %1143 = vrot.lane.b32.xlu1 %v1128_v48, %s5377_s28  ;;  %v4024_v49 = vpop.f32.mrb[17].mxu0  ;;  %s614_s28 = scalar_lea.vmem %s5419_s22, %s5418_s20  ;;  %s5422_s22 = smov 112  }
 0x4a1   : > { %v1131_v50 = vpop.f32.mrb[18].mxu0  ;;  %v617_v9 = vld [vmem:[%s614_s28] sm:$0xff]  ;;  %s5431_s28 = smov 24   ;;  %s5435_s20 = smov 40  }
 0x4a2   : > { %v4025_v51 = vpop.f32.mrb[19].mxu0  ;;  %v4828_v11 = vpack.c.bf16 %v617_v9, %v617_v9 }
 0x4e5   : > { %v1136_v52 = vpop.permute.xlu1 %1135 }
 0x4e6   : > { %v1146_v54 = vsel %vm691_vm2, %v794_v34, %v1136_v52 }
 0x50a   : > { %v1140_v53 = vpop.permute.xlu0 %1139 }
 0x50b   : > { %v1148_v55 = vsel %vm1147_vm5, %v1146_v54, %v1140_v53 }
 0x512   : > { %v1144_v56 = vpop.permute.xlu1 %1143 }
 0x513   : > { %v1150_v57 = vsel %vm1149_vm6, %v1148_v55, %v1144_v56 }
 0x514   : > { %v1151_v58 = vpack.c.bf16 %v1150_v57, %v1150_v57 }
 0x516   : > { %4031 = vmatmul.mubr.msk.bf16.vlgmr.msra.gmra.mrb[16].mxu1 %vm641_vm1, %v1151_v58 }
 0x517   : > { %4046 = vmatprep.mubr.msk.bf16.mxu1 %vm4520_vm0, %v4519_v1 }
 0x5e9   : > { %v1205_v59 = vpop.f32.mrb[16].mxu1 }
 0x5ea   : > { %v1206_v60 = vadd.f32 %v1205_v59, %v4708_v3  ;;  %v4032_v61 = vpop.f32.mrb[17].mxu1  ;;  %v4349_v3 = vld [vmem:[%s5339_s7] sm:$0xff]  }
 0x5eb   : > { %v1208_v62 = vpop.f32.mrb[18].mxu1  ;;  %4043 = vmatpush3.bf16.msra.mxu1 %v4349_v3 }
 0x5ec   : > { %v4033_v63 = vpop.f32.mrb[19].mxu1  ;;  %v1213_v0 = vsel %vm641_vm1, %v1206_v60, 0.0  ;;  %4044 = vmatprep.subr.bf16.mxu1 %v4519_v1 }
 0x5ed   : > { %1214 = vadd.xlane.f32.xlu0 %v1213_v0 }
 0x5ef   : > { %4045 = vmatpush3.bf16.msra.mxu1 %v4350_v10 }
 0x5f0   : > { %4056 = vmatprep.subr.bf16.mxu1 %v4519_v1 }
 0x5f2   : > { %4047 = vmatmul.mubr.msk.bf16.vlgmr.msra.gmra.mrb[20].mxu1 %vm641_vm1, %v4828_v11 }
 0x5f3   : > { %4058 = vmatprep.mubr.msk.bf16.mxu1 %vm4520_vm0, %v4519_v1 }
 0x67a   : > { %v1215_v2 = vpop.xlane.xlu0 %1214 }
 0x67b   : > { %v1217_v4 = vmul.f32 0.03125, %v1215_v2 }
 0x67d   : > { %v1218_v5 = vsub.f32 %v1206_v60, %v1217_v4 }
 0x67f   : > { %v1219_v6 = vmul.f32 %v1218_v5, %v1218_v5 }
 0x681   : > { %v1220_v8 = vsel %vm641_vm1, %v1219_v6, 0.0 }
 0x682   : > { %1221 = vadd.xlane.f32.xlu1 %v1220_v8 }
 0x6c5   : > { %v1355_v23 = vpop.f32.mrb[20].mxu1 }
 0x6c6   : > { %v4856_v24 = vpack.c.bf16 %v1355_v23, %v1355_v23  ;;  %v4048_v25 = vpop.f32.mrb[21].mxu1 }
 0x6c7   : > { %v1358_v27 = vpop.f32.mrb[22].mxu1 }
 0x6c8   : > { %1473 = vrot.lane.b32.xlu0 %v4856_v24, %s5421_s25  ;;  %v4049_v28 = vpop.f32.mrb[23].mxu1  ;;  %v1367_v29 = vsel %vm691_vm2, %v4856_v24, 0 }
 0x6cc   : > { %1583 = vrot.lane.b32.xlu0 %v4856_v24, %s5422_s22 }
 0x6d0   : > { %1693 = vrot.lane.b32.xlu0 %v4856_v24, %s5423_s26 }
 0x70f   : > { %v1222_v14 = vpop.xlane.xlu1 %1221 }
 0x710   : > { %v1223_v15 = vmul.f32 0.03125, %v1222_v14 }
 0x712   : > { %v1224_v16 = vadd.f32 1e-05, %v1223_v15 }
 0x714   : > { %4395 = vrsqrt.f32 %v1224_v16 }
 0x71e   : > { %v4396_v17 = vpop.eup %4395 }
 0x71f   : > { %v1226_v19 = vmul.f32 %v4396_v17, %v1218_v5 }
 0x721   : > { %v1233_v7 = vmul.f32 %v3729_v18, %v1226_v19 }
 0x723   : > { %v4849_v21 = vadd.f32 %v3730_v20, %v1233_v7 }
 0x725   : > { %v1241_v22 = vpack.c.bf16 %v4849_v21, %v4849_v21 }
 0x727   : > { %4039 = vmatmul.mubr.msk.bf16.vlgmr.msra.gmra.mrb[20].mxu0 %vm641_vm1, %v1241_v22 }
 0x728   : > { %4052 = vmatprep.mubr.msk.bf16.mxu0 %vm4520_vm0, %v4519_v1  ;;  %4051 = vmatpush3.bf16.xpose.msra.mxu0 %v1367_v29 }
 0x729   : > { %4062 = vmatprep.subr.bf16.mxu0 %v4519_v1 }
 0x73a   : > { %v1474_v34 = vpop.permute.xlu0 %1473 }
 0x73b   : > { %v1479_v37 = vsel %vm691_vm2, %v1474_v34, 0 }
 0x73e   : > { %v1584_v38 = vpop.permute.xlu0 %1583 }
 0x73f   : > { %v1589_v40 = vsel %vm691_vm2, %v1584_v38, 0 }
 0x742   : > { %v1694_v41 = vpop.permute.xlu0 %1693 }
 0x743   : > { %v1699_v43 = vsel %vm691_vm2, %v1694_v41, 0 }
 0x7fa   : > { %v1295_v30 = vpop.f32.mrb[20].mxu0 }
 0x7fb   : > { %v1301_v31 = vmul.f32 0.17677669, %v1295_v30  ;;  %v4040_v32 = vpop.f32.mrb[21].mxu0 }
 0x7fc   : > { %v1298_v33 = vpop.f32.mrb[22].mxu0 }
 0x7fd   : > { %v1361_v35 = vpack.c.bf16 %v1301_v31, %v1301_v31  ;;  %v4041_v36 = vpop.f32.mrb[23].mxu0 }
 0x7ff   : > { %1471 = vrot.lane.b32.xlu1 %v1361_v35, %s5421_s25  ;;  %4053 = vmatmul.mubr.msk.bf16.vlgmr.msra.gmra.mrb[24].mxu0 %vm691_vm2, %v1361_v35 }
 0x800   : > { %4063 = vmatpush3.bf16.xpose.msra.mxu0 %v1479_v37  ;;  %4064 = vmatprep.mubr.msk.bf16.mxu0 %vm4520_vm0, %v4519_v1 }
 0x801   : > { %4074 = vmatprep.subr.bf16.mxu0 %v4519_v1 }
 0x803   : > { %1581 = vrot.lane.b32.xlu1 %v1361_v35, %s5422_s22 }
 0x807   : > { %1691 = vrot.lane.b32.xlu1 %v1361_v35, %s5423_s26 }
 0x871   : > { %v1472_v39 = vpop.permute.xlu1 %1471 }
 0x872   : > { %4065 = vmatmul.mubr.msk.bf16.vlgmr.msra.gmra.mrb[28].mxu0 %vm691_vm2, %v1472_v39 }
 0x873   : > { %4075 = vmatpush3.bf16.xpose.msra.mxu0 %v1589_v40  ;;  %4076 = vmatprep.mubr.msk.bf16.mxu0 %vm4520_vm0, %v4519_v1 }
 0x874   : > { %4086 = vmatprep.subr.bf16.mxu0 %v4519_v1 }
 0x875   : > { %v1582_v42 = vpop.permute.xlu1 %1581 }
 0x879   : > { %v1692_v44 = vpop.permute.xlu1 %1691 }
 0x87a   : > { %4077 = vmatmul.mubr.msk.bf16.vlgmr.msra.gmra.mrb[32].mxu0 %vm691_vm2, %v1582_v42 }
 0x87b   : > { %4087 = vmatpush3.bf16.xpose.msra.mxu0 %v1699_v43  ;;  %4088 = vmatprep.mubr.msk.bf16.mxu0 %vm4520_vm0, %v4519_v1 }
 0x87c   : > { %4098 = vmatprep.subr.bf16.mxu0 %v4519_v1 }
 0x882   : > { %4089 = vmatmul.mubr.msk.bf16.vlgmr.msra.gmra.mrb[36].mxu0 %vm691_vm2, %v1692_v44 }
 0x883   : > { %4102 = vmatprep.mubr.msk.bf16.mxu0 %vm4520_vm0, %v4519_v1 }
 0x8d2   : > { %v1403_v45 = vpop.f32.mrb[24].mxu0 }
 0x8d3   : > { %v4054_v46 = vpop.f32.mrb[25].mxu0  ;;  %v1409_v47 = vsel %vm691_vm2, %v1403_v45, -inf }
 0x8d4   : > { %1410 = vmax.xlane.f32.xlu0 %v1409_v47  ;;  %v1406_v48 = vpop.f32.mrb[26].mxu0 }
 0x8d5   : > { %v4055_v49 = vpop.f32.mrb[27].mxu0 }
 0x945   : > { %v1515_v50 = vpop.f32.mrb[28].mxu0 }
 0x946   : > { %v4066_v51 = vpop.f32.mrb[29].mxu0  ;;  %v1521_v52 = vsel %vm691_vm2, %v1515_v50, -inf }
 0x947   : > { %1522 = vmax.xlane.f32.xlu1 %v1521_v52  ;;  %v1518_v53 = vpop.f32.mrb[30].mxu0 }
 0x948   : > { %v4067_v54 = vpop.f32.mrb[31].mxu0  ;;  %v4353_v53 = vld [vmem:[%s5428_s8] sm:$0xff]  }
 0x949   : > { %4099 = vmatpush3.bf16.msra.mxu0 %v4353_v53 }
 0x94a   : > { %4100 = vmatprep.subr.bf16.mxu0 %v4519_v1 }
 0x94d   : > { %v1625_v55 = vpop.f32.mrb[32].mxu0 }
 0x94e   : > { %v4078_v56 = vpop.f32.mrb[33].mxu0  ;;  %v1631_v57 = vsel %vm691_vm2, %v1625_v55, -inf }
 0x94f   : > { %1632 = vmax.xlane.f32.xlu0 %v1631_v57  ;;  %v1628_v58 = vpop.f32.mrb[34].mxu0 }
 0x950   : > { %v4079_v59 = vpop.f32.mrb[35].mxu0  ;;  %v4354_v58 = vld [vmem:[%s5428_s8 + $0x8] sm:$0xff]   ;;  %s5433_s8 = smov 56  }
 0x951   : > { %4101 = vmatpush3.bf16.msra.mxu0 %v4354_v58 }
 0x952   : > { %4114 = vmatprep.subr.bf16.mxu0 %v4519_v1 }
 0x955   : > { %v1735_v60 = vpop.f32.mrb[36].mxu0 }
 0x956   : > { %v4090_v61 = vpop.f32.mrb[37].mxu0  ;;  %v1741_v62 = vsel %vm691_vm2, %v1735_v60, -inf }
 0x957   : > { %1742 = vmax.xlane.f32.xlu0 %v1741_v62  ;;  %v1738_v63 = vpop.f32.mrb[38].mxu0 }
 0x958   : > { %v4091_v0 = vpop.f32.mrb[39].mxu0 }
 0x961   : > { %v1411_v2 = vpop.xlane.xlu0 %1410 }
 0x962   : > { %v1412_v4 = vsub.f32 %v1403_v45, %v1411_v2 }
 0x964   : > { %v1413_v5 = vmul.f32 1.442695, %v1412_v4 }
 0x966   : > { %4397 = vpow2.f32 %v1413_v5 }
 0x970   : > { %v4398_v6 = vpop.eup %4397 }
 0x971   : > { %v1415_v8 = vsel %vm691_vm2, %v4398_v6, 0.0 }
 0x972   : > { %1416 = vadd.xlane.f32.xlu1 %v1415_v8 }
 0x983   : > { %1422 = vrot.lane.b32.xlu1 %v4856_v24, %s5424_s24 }
 0x9d4   : > { %v1523_v3 = vpop.xlane.xlu1 %1522 }
 0x9d5   : > { %v1524_v9 = vsub.f32 %v1515_v50, %v1523_v3 }
 0x9d7   : > { %v1525_v10 = vmul.f32 1.442695, %v1524_v9 }
 0x9d9   : > { %4399 = vpow2.f32 %v1525_v10 }
 0x9dc   : > { %v1633_v12 = vpop.xlane.xlu0 %1632 }
 0x9dd   : > { %v1634_v13 = vsub.f32 %v1625_v55, %v1633_v12 }
 0x9df   : > { %v1635_v14 = vmul.f32 1.442695, %v1634_v13 }
 0x9e1   : > { %4401 = vpow2.f32 %v1635_v14 }
 0x9e3   : > { %v4400_v15 = vpop.eup %4399 }
 0x9e4   : > { %v1743_v16 = vpop.xlane.xlu0 %1742  ;;  %v1527_v17 = vsel %vm691_vm2, %v4400_v15, 0.0 }
 0x9e5   : > { %v1744_v18 = vsub.f32 %v1735_v60, %v1743_v16  ;;  %1528 = vadd.xlane.f32.xlu0 %v1527_v17 }
 0x9e7   : > { %v1745_v19 = vmul.f32 1.442695, %v1744_v18 }
 0x9e9   : > { %4403 = vpow2.f32 %v1745_v19 }
 0x9eb   : > { %v4402_v20 = vpop.eup %4401 }
 0x9ec   : > { %v1637_v7 = vsel %vm691_vm2, %v4402_v20, 0.0 }
 0x9ed   : > { %1638 = vadd.xlane.f32.xlu1 %v1637_v7 }
 0x9f3   : > { %v4404_v22 = vpop.eup %4403 }
 0x9f4   : > { %v1747_v23 = vsel %vm691_vm2, %v4404_v22, 0.0 }
 0x9f5   : > { %1748 = vadd.xlane.f32.xlu0 %v1747_v23 }
 0x9fe   : > { %1643 = vrot.lane.b32.xlu1 %v4856_v24, %s5425_s0 }
 0x9ff   : > { %v1417_v25 = vpop.xlane.xlu1 %1416 }
 0xa00   : > { %4405 = vrcp.f32 %v1417_v25  ;;  %v4355_v25 = vld [vmem:[%s5343_s11] sm:$0xff]  }
 0xa02   : > { %1753 = vrot.lane.b32.xlu1 %v4856_v24, %s5426_s21 }
 0xa03   : > { %v1423_v27 = vpop.permute.xlu1 %1422 }
 0xa04   : > { %v1428_v28 = vsel %vm756_vm4, %v1423_v27, 0  ;;  %v4357_v27 = vld [vmem:[%s5345_s13] sm:$0xff]  }
 0xa05   : > { %4057 = vmatpush3.bf16.msra.mxu1 %v1428_v28  ;;  %v4358_v28 = vld [vmem:[%s5345_s13 + $0x8] sm:$0xff]  }
 0xa06   : > { %4068 = vmatprep.subr.bf16.mxu1 %v4519_v1 }
 0xa0a   : > { %v4406_v29 = vpop.eup %4405 }
 0xa0b   : > { %v1419_v30 = vmul.f32 %v4406_v29, %v4398_v6  ;;  %1533 = vrot.lane.b32.xlu0 %v4856_v24, %s5427_s23 }
 0xa0d   : > { %v1420_v31 = vpack.c.bf16 %v1419_v30, %v1419_v30 }
 0xa0f   : > { %4059 = vmatmul.mubr.msk.bf16.vlgmr.msra.gmra.mrb[24].mxu1 %vm691_vm2, %v1420_v31 }
 0xa10   : > { %4070 = vmatprep.mubr.msk.bf16.mxu1 %vm4520_vm0, %v4519_v1 }
 0xa72   : > { %v1529_v32 = vpop.xlane.xlu0 %1528 }
 0xa73   : > { %4407 = vrcp.f32 %v1529_v32 }
 0xa7a   : > { %v1639_v33 = vpop.xlane.xlu1 %1638 }
 0xa7b   : > { %4409 = vrcp.f32 %v1639_v33  ;;  %v3748_v33 = vld [vmem:[%s5341_s9] ss:$0 sm:$0xff] }
 0xa7d   : > { %v4408_v34 = vpop.eup %4407 }
 0xa7e   : > { %v1531_v36 = vmul.f32 %v4408_v34, %v4400_v15  ;;  %v1644_v39 = vpop.permute.xlu1 %1643 }
 0xa7f   : > { %v1649_v41 = vsel %vm756_vm4, %v1644_v39, 0  ;;  %v4359_v39 = vld [vmem:[%s5345_s13 + $0x10] sm:$0xff]  }
 0xa80   : > { %v1532_v24 = vpack.c.bf16 %v1531_v36, %v1531_v36 }
 0xa82   : > { %v1749_v35 = vpop.xlane.xlu0 %1748  ;;  %v1754_v43 = vpop.permute.xlu1 %1753 }
 0xa83   : > { %4411 = vrcp.f32 %v1749_v35  ;;  %v1759_v46 = vsel %vm756_vm4, %v1754_v43, 0  ;;  %v3749_v35 = vld [vmem:[%s5342_s10] ss:$0 sm:$0xff] }
 0xa85   : > { %v4410_v40 = vpop.eup %4409 }
 0xa86   : > { %v1534_v37 = vpop.permute.xlu0 %1533  ;;  %v1641_v42 = vmul.f32 %v4410_v40, %v4402_v20  ;;  %v3750_v40 = vld [vmem:[%s5344_s12] ss:$0 sm:$0xff] }
 0xa87   : > { %v1539_v38 = vsel %vm756_vm4, %v1534_v37, 0 }
 0xa88   : > { %4069 = vmatpush3.bf16.msra.mxu1 %v1539_v38  ;;  %v1642_v44 = vpack.c.bf16 %v1641_v42, %v1641_v42 }
 0xa89   : > { %4080 = vmatprep.subr.bf16.mxu1 %v4519_v1 }
 0xa8b   : > { %4071 = vmatmul.mubr.msk.bf16.vlgmr.msra.gmra.mrb[28].mxu1 %vm691_vm2, %v1532_v24  ;;  %v4360_v24 = vld [vmem:[%s5345_s13 + $0x18] sm:$0xff]  }
 0xa8c   : > { %4081 = vmatpush3.bf16.msra.mxu1 %v1649_v41  ;;  %4082 = vmatprep.mubr.msk.bf16.mxu1 %vm4520_vm0, %v4519_v1 }
 0xa8d   : > { %4092 = vmatprep.subr.bf16.mxu1 %v4519_v1  ;;  %v4412_v45 = vpop.eup %4411 }
 0xa8e   : > { %v1751_v47 = vmul.f32 %v4412_v45, %v4404_v22 }
 0xa90   : > { %v1752_v48 = vpack.c.bf16 %v1751_v47, %v1751_v47 }
 0xa93   : > { %4083 = vmatmul.mubr.msk.bf16.vlgmr.msra.gmra.mrb[32].mxu1 %vm691_vm2, %v1642_v44 }
 0xa94   : > { %4093 = vmatpush3.bf16.msra.mxu1 %v1759_v46  ;;  %4094 = vmatprep.mubr.msk.bf16.mxu1 %vm4520_vm0, %v4519_v1 }
 0xa95   : > { %4106 = vmatprep.subr.bf16.mxu1 %v4519_v1 }
 0xa9b   : > { %4095 = vmatmul.mubr.msk.bf16.vlgmr.msra.gmra.mrb[36].mxu1 %vm691_vm2, %v1752_v48  ;;  %v3754_v48 = vld [vmem:[%s5346_s14] ss:$0 sm:$0xff] }
 0xa9c   : > { %4110 = vmatprep.mubr.msk.bf16.mxu1 %vm4520_vm0, %v4519_v1  ;;  %4107 = vmatpush3.bf16.msra.mxu1 %v4355_v25 }
 0xa9d   : > { %4108 = vmatprep.subr.bf16.mxu1 %v4519_v1 }
 0xae2   : > { %v1464_v49 = vpop.f32.mrb[24].mxu1 }
 0xae3   : > { %v4060_v50 = vpop.f32.mrb[25].mxu1 }
 0xae4   : > { %v1467_v51 = vpop.f32.mrb[26].mxu1 }
 0xae5   : > { %v4061_v52 = vpop.f32.mrb[27].mxu1 }
 0xb5e   : > { %v1575_v54 = vpop.f32.mrb[28].mxu1 }
 0xb5f   : > { %1802 = vrot.lane.b32.xlu0 %v1575_v54, %s5429_s2  ;;  %v4072_v55 = vpop.f32.mrb[29].mxu1 }
 0xb60   : > { %v1578_v56 = vpop.f32.mrb[30].mxu1 }
 0xb61   : > { %v4073_v57 = vpop.f32.mrb[31].mxu1 }
 0xb66   : > { %v1685_v59 = vpop.f32.mrb[32].mxu1 }
 0xb67   : > { %1806 = vrot.lane.b32.xlu1 %v1685_v59, %s5430_s18  ;;  %v4084_v60 = vpop.f32.mrb[33].mxu1 }
 0xb68   : > { %v1688_v61 = vpop.f32.mrb[34].mxu1 }
 0xb69   : > { %v4085_v62 = vpop.f32.mrb[35].mxu1  ;;  %v4361_v61 = vld [vmem:[%s5412_s29 + $0x10] sm:$0xff]  }
 0xb6a   : > { %v4362_v62 = vld [vmem:[%s5412_s29 + $0x18] sm:$0xff]  }
 0xb6e   : > { %v1795_v63 = vpop.f32.mrb[36].mxu1 }
 0xb6f   : > { %1810 = vrot.lane.b32.xlu0 %v1795_v63, %s5431_s28  ;;  %v4096_v0 = vpop.f32.mrb[37].mxu1 }
 0xb70   : > { %v1798_v2 = vpop.f32.mrb[38].mxu1 }
 0xb71   : > { %v4097_v4 = vpop.f32.mrb[39].mxu1 }
 0xbd1   : > { %v1803_v5 = vpop.permute.xlu0 %1802 }
 0xbd2   : > { %v1813_v8 = vsel %vm691_vm2, %v1464_v49, %v1803_v5  ;;  %v3760_v5 = vld [vmem:[%s5347_s15] ss:$0 sm:$0xff] }
 0xbd9   : > { %v1807_v6 = vpop.permute.xlu1 %1806 }
 0xbda   : > { %v1814_v3 = vsel %vm1147_vm5, %v1813_v8, %v1807_v6  ;;  %v3761_v8 = vld [vmem:[%s5348_s16] ss:$0 sm:$0xff] }
 0xbe1   : > { %v1811_v9 = vpop.permute.xlu0 %1810 }
 0xbe2   : > { %v1815_v10 = vsel %vm1149_vm6, %v1814_v3, %v1811_v9 }
 0xbe3   : > { %v1816_v12 = vpack.c.bf16 %v1815_v10, %v1815_v10 }
 0xbe5   : > { %4103 = vmatmul.mubr.msk.bf16.vlgmr.msra.gmra.mrb[40].mxu0 %vm641_vm1, %v1816_v12 }
 0xbe6   : > { %4122 = vmatprep.mubr.msk.bf16.mxu0 %vm4520_vm0, %v4519_v1  ;;  %4115 = vmatpush3.bf16.msra.mxu0 %v4357_v27 }
 0xbe7   : > { %4116 = vmatprep.subr.bf16.mxu0 %v4519_v1 }
 0xbea   : > { %4117 = vmatpush3.bf16.msra.mxu0 %v4358_v28 }
 0xbeb   : > { %4118 = vmatprep.subr.bf16.mxu0 %v4519_v1 }
 0xbee   : > { %4119 = vmatpush3.bf16.msra.mxu0 %v4359_v39 }
 0xbef   : > { %4120 = vmatprep.subr.bf16.mxu0 %v4519_v1 }
 0xbf2   : > { %4121 = vmatpush3.bf16.msra.mxu0 %v4360_v24 }
 0xbf3   : > { %4140 = vmatprep.subr.bf16.mxu0 %v4519_v1 }
 0xcb8   : > { %v1870_v13 = vpop.f32.mrb[40].mxu0 }
 0xcb9   : > { %v1871_v14 = vadd.f32 %v1870_v13, %v4849_v21  ;;  %v4104_v15 = vpop.f32.mrb[41].mxu0  ;;  %v4356_v21 = vld [vmem:[%s5343_s11 + $0x8] sm:$0xff]  }
 0xcba   : > { %v1873_v16 = vpop.f32.mrb[42].mxu0  ;;  %4109 = vmatpush3.bf16.msra.mxu1 %v4356_v21 }
 0xcbb   : > { %v4105_v17 = vpop.f32.mrb[43].mxu0  ;;  %v1878_v18 = vsel %vm641_vm1, %v1871_v14, 0.0  ;;  %4126 = vmatprep.subr.bf16.mxu1 %v4519_v1 }
 0xcbc   : > { %1879 = vadd.xlane.f32.xlu1 %v1878_v18 }
 0xd49   : > { %v1880_v19 = vpop.xlane.xlu1 %1879 }
 0xd4a   : > { %v1881_v20 = vmul.f32 0.03125, %v1880_v19 }
 0xd4c   : > { %v1882_v7 = vsub.f32 %v1871_v14, %v1881_v20 }
 0xd4e   : > { %v1883_v22 = vmul.f32 %v1882_v7, %v1882_v7 }
 0xd50   : > { %v1884_v23 = vsel %vm641_vm1, %v1883_v22, 0.0 }
 0xd51   : > { %1885 = vadd.xlane.f32.xlu0 %v1884_v23 }
 0xdde   : > { %v1886_v29 = vpop.xlane.xlu0 %1885 }
 0xddf   : > { %v1887_v30 = vmul.f32 0.03125, %v1886_v29 }
 0xde1   : > { %v1888_v31 = vadd.f32 1e-05, %v1887_v30 }
 0xde3   : > { %4413 = vrsqrt.f32 %v1888_v31 }
 0xded   : > { %v4414_v32 = vpop.eup %4413 }
 0xdee   : > { %v1890_v34 = vmul.f32 %v4414_v32, %v1882_v7 }
 0xdf0   : > { %v1897_v36 = vmul.f32 %v3748_v33, %v1890_v34 }
 0xdf2   : > { %v1904_v37 = vadd.f32 %v3749_v35, %v1897_v36 }
 0xdf4   : > { %v1905_v38 = vpack.c.bf16 %v1904_v37, %v1904_v37 }
 0xdf6   : > { %4111 = vmatmul.mubr.msk.bf16.vlgmr.msra.gmra.mrb[40].mxu1 %vm641_vm1, %v1905_v38 }
 0xdf7   : > { %4130 = vmatprep.mubr.msk.bf16.mxu1 %vm4520_vm0, %v4519_v1  ;;  %4127 = vmatpush3.bf16.msra.mxu1 %v4361_v61 }
 0xdf8   : > { %4128 = vmatprep.subr.bf16.mxu1 %v4519_v1 }
 0xdfb   : > { %4129 = vmatpush3.bf16.msra.mxu1 %v4362_v62 }
 0xdfc   : > { %4134 = vmatprep.subr.bf16.mxu1 %v4519_v1 }
 0xec9   : > { %v1966_v41 = vpop.f32.mrb[40].mxu1 }
 0xeca   : > { %v1967_v42 = vadd.f32 %v3750_v40, %v1966_v41  ;;  %v4112_v43 = vpop.f32.mrb[41].mxu1 }
 0xecb   : > { %v1969_v44 = vpop.f32.mrb[42].mxu1 }
 0xecc   : > { %v1972_v45 = vmax.f32 %v1967_v42, 0.0  ;;  %v4113_v46 = vpop.f32.mrb[43].mxu1 }
 0xece   : > { %v1973_v47 = vpack.c.bf16 %v1972_v45, %v1972_v45 }
 0xed0   : > { %4123 = vmatmul.mubr.msk.bf16.vlgmr.msra.gmra.mrb[44].mxu0 %vm2013_vm7, %v1973_v47 }
 0xed1   : > { %4142 = vmatprep.mubr.msk.bf16.mxu0 %vm4520_vm0, %v4519_v1 }
 0xfa3   : > { %v2051_v49 = vpop.f32.mrb[44].mxu0 }
 0xfa4   : > { %v2052_v50 = vadd.f32 %v3754_v48, %v2051_v49  ;;  %v4124_v51 = vpop.f32.mrb[45].mxu0 }
 0xfa5   : > { %v2054_v52 = vpop.f32.mrb[46].mxu0 }
 0xfa6   : > { %v4125_v53 = vpop.f32.mrb[47].mxu0  ;;  %v2057_v54 = vadd.f32 %v2052_v50, %v1904_v37 }
 0xfa8   : > { %v2060_v55 = vsel %vm641_vm1, %v2057_v54, 0.0 }
 0xfa9   : > { %2061 = vadd.xlane.f32.xlu0 %v2060_v55 }
0x1036   : > { %v2062_v56 = vpop.xlane.xlu0 %2061 }
0x1037   : > { %v2063_v57 = vmul.f32 0.03125, %v2062_v56 }
0x1039   : > { %v2064_v58 = vsub.f32 %v2057_v54, %v2063_v57 }
0x103b   : > { %v2065_v59 = vmul.f32 %v2064_v58, %v2064_v58 }
0x103d   : > { %v2066_v60 = vsel %vm641_vm1, %v2065_v59, 0.0 }
0x103e   : > { %2067 = vadd.xlane.f32.xlu1 %v2066_v60 }
0x10cb   : > { %v2068_v63 = vpop.xlane.xlu1 %2067 }
0x10cc   : > { %v2069_v0 = vmul.f32 0.03125, %v2068_v63 }
0x10ce   : > { %v2070_v2 = vadd.f32 1e-05, %v2069_v0 }
0x10d0   : > { %4415 = vrsqrt.f32 %v2070_v2 }
0x10da   : > { %v4416_v4 = vpop.eup %4415 }
0x10db   : > { %v2072_v6 = vmul.f32 %v4416_v4, %v2064_v58 }
0x10dd   : > { %v2079_v3 = vmul.f32 %v3760_v5, %v2072_v6 }
0x10df   : > { %v5002_v9 = vadd.f32 %v3761_v8, %v2079_v3 }
0x10e1   : > { %v2087_v10 = vpack.c.bf16 %v5002_v9, %v5002_v9 }
0x10e3   : > { %4131 = vmatmul.mubr.msk.bf16.vlgmr.msra.gmra.mrb[44].mxu1 %vm641_vm1, %v2087_v10 }
0x10e4   : > { %4136 = vmatprep.mubr.msk.bf16.mxu1 %vm4520_vm0, %v4519_v1 }
0x11b6   : > { %v2142_v12 = vpop.f32.mrb[44].mxu1 }
0x11b7   : > { %v2148_v13 = vmul.f32 0.17677669, %v2142_v12  ;;  %v5009_v14 = vpack.c.bf16 %v2142_v12, %v2142_v12  ;;  %v4132_v15 = vpop.f32.mrb[45].mxu1 }
0x11b8   : > { %v2145_v16 = vpop.f32.mrb[46].mxu1 }
0x11b9   : > { %2264 = vrot.lane.b32.xlu1 %v5009_v14, %s5427_s23  ;;  %2152 = vrot.lane.b32.xlu0 %v5009_v14, %s5424_s24  ;;  %v4133_v17 = vpop.f32.mrb[47].mxu1  ;;  %v2149_v18 = vpack.c.bf16 %v2148_v13, %v2148_v13 }
0x11bd   : > { %2375 = vrot.lane.b32.xlu0 %v5009_v14, %s5425_s0  ;;  %2262 = vrot.lane.b32.xlu1 %v2149_v18, %s5421_s25 }
0x11c1   : > { %2486 = vrot.lane.b32.xlu0 %v5009_v14, %s5426_s21  ;;  %2373 = vrot.lane.b32.xlu1 %v2149_v18, %s5422_s22 }
0x11c5   : > { %2484 = vrot.lane.b32.xlu1 %v2149_v18, %s5423_s26 }
0x122b   : > { %v2153_v19 = vpop.permute.xlu0 %2152  ;;  %v2265_v7 = vpop.permute.xlu1 %2264 }
0x122c   : > { %v2158_v20 = vsel %vm691_vm2, %v2153_v19, 0  ;;  %v2270_v22 = vsel %vm691_vm2, %v2265_v7, 0 }
0x122d   : > { %4135 = vmatpush3.bf16.xpose.msra.mxu1 %v2158_v20 }
0x122e   : > { %4146 = vmatprep.subr.bf16.mxu1 %v4519_v1 }
0x122f   : > { %v2376_v23 = vpop.permute.xlu0 %2375  ;;  %v2263_v25 = vpop.permute.xlu1 %2262 }
0x1230   : > { %v2381_v21 = vsel %vm691_vm2, %v2376_v23, 0 }
0x1233   : > { %v2487_v27 = vpop.permute.xlu0 %2486  ;;  %v2374_v28 = vpop.permute.xlu1 %2373 }
0x1234   : > { %4137 = vmatmul.mubr.msk.bf16.vlgmr.msra.gmra.mrb[48].mxu1 %vm691_vm2, %v2149_v18  ;;  %v2492_v29 = vsel %vm691_vm2, %v2487_v27, 0 }
0x1235   : > { %4147 = vmatpush3.bf16.xpose.msra.mxu1 %v2270_v22  ;;  %4148 = vmatprep.mubr.msk.bf16.mxu1 %vm4520_vm0, %v4519_v1 }
0x1236   : > { %4158 = vmatprep.subr.bf16.mxu1 %v4519_v1 }
0x1237   : > { %v2485_v30 = vpop.permute.xlu1 %2484 }
0x123c   : > { %4149 = vmatmul.mubr.msk.bf16.vlgmr.msra.gmra.mrb[52].mxu1 %vm691_vm2, %v2263_v25 }
0x123d   : > { %4159 = vmatpush3.bf16.xpose.msra.mxu1 %v2381_v21  ;;  %4160 = vmatprep.mubr.msk.bf16.mxu1 %vm4520_vm0, %v4519_v1 }
0x123e   : > { %4170 = vmatprep.subr.bf16.mxu1 %v4519_v1 }
0x1244   : > { %4161 = vmatmul.mubr.msk.bf16.vlgmr.msra.gmra.mrb[56].mxu1 %vm691_vm2, %v2374_v28 }
0x1245   : > { %4171 = vmatpush3.bf16.xpose.msra.mxu1 %v2492_v29  ;;  %4172 = vmatprep.mubr.msk.bf16.mxu1 %vm4520_vm0, %v4519_v1 }
0x1246   : > { %4182 = vmatprep.subr.bf16.mxu1 %v4519_v1 }
0x124c   : > { %4173 = vmatmul.mubr.msk.bf16.vlgmr.msra.gmra.mrb[60].mxu1 %vm691_vm2, %v2485_v30 }
0x124d   : > { %4186 = vmatprep.mubr.msk.bf16.mxu1 %vm4520_vm0, %v4519_v1 }
0x1307   : > { %v2194_v31 = vpop.f32.mrb[48].mxu1 }
0x1308   : > { %v2200_v32 = vsel %vm4748_vm3, %v2194_v31, -1e+20  ;;  %v4138_v33 = vpop.f32.mrb[49].mxu1 }
0x1309   : > { %v2197_v34 = vpop.f32.mrb[50].mxu1  ;;  %v2201_v35 = vsel %vm691_vm2, %v2200_v32, -inf }
0x130a   : > { %2202 = vmax.xlane.f32.xlu0 %v2201_v35  ;;  %v4139_v36 = vpop.f32.mrb[51].mxu1 }
0x130f   : > { %v2306_v37 = vpop.f32.mrb[52].mxu1 }
0x1310   : > { %v2312_v38 = vsel %vm4748_vm3, %v2306_v37, -1e+20  ;;  %v4150_v39 = vpop.f32.mrb[53].mxu1 }
0x1311   : > { %v2309_v24 = vpop.f32.mrb[54].mxu1  ;;  %v2313_v40 = vsel %vm691_vm2, %v2312_v38, -inf }
0x1312   : > { %2314 = vmax.xlane.f32.xlu1 %v2313_v40  ;;  %v4151_v41 = vpop.f32.mrb[55].mxu1 }
0x1317   : > { %v2417_v42 = vpop.f32.mrb[56].mxu1 }
0x1318   : > { %v2423_v43 = vsel %vm4748_vm3, %v2417_v42, -1e+20  ;;  %v4162_v44 = vpop.f32.mrb[57].mxu1 }
0x1319   : > { %v2420_v45 = vpop.f32.mrb[58].mxu1  ;;  %v2424_v46 = vsel %vm691_vm2, %v2423_v43, -inf }
0x131a   : > { %2425 = vmax.xlane.f32.xlu0 %v2424_v46  ;;  %v4163_v47 = vpop.f32.mrb[59].mxu1  ;;  %v4363_v45 = vld [vmem:[%s5417_s27 + $0x10] sm:$0xff]   ;;  %v4364_v46 = vld [vmem:[%s5417_s27 + $0x18] sm:$0xff]  }
0x131b   : > { %4183 = vmatpush3.bf16.msra.mxu1 %v4363_v45 }
0x131c   : > { %4184 = vmatprep.subr.bf16.mxu1 %v4519_v1 }
0x131f   : > { %v2528_v48 = vpop.f32.mrb[60].mxu1  ;;  %4185 = vmatpush3.bf16.msra.mxu1 %v4364_v46 }
0x1320   : > { %v2534_v49 = vsel %vm4748_vm3, %v2528_v48, -1e+20  ;;  %v4174_v50 = vpop.f32.mrb[61].mxu1  ;;  %4198 = vmatprep.subr.bf16.mxu1 %v4519_v1 }
0x1321   : > { %v2531_v51 = vpop.f32.mrb[62].mxu1  ;;  %v2535_v52 = vsel %vm691_vm2, %v2534_v49, -inf }
0x1322   : > { %2536 = vmax.xlane.f32.xlu0 %v2535_v52  ;;  %v4175_v53 = vpop.f32.mrb[63].mxu1 }
0x1397   : > { %v2203_v54 = vpop.xlane.xlu0 %2202 }
0x1398   : > { %v2204_v55 = vsub.f32 %v2200_v32, %v2203_v54 }
0x139a   : > { %v2205_v56 = vmul.f32 1.442695, %v2204_v55 }
0x139c   : > { %4417 = vpow2.f32 %v2205_v56 }
0x139f   : > { %v2315_v57 = vpop.xlane.xlu1 %2314 }
0x13a0   : > { %v2316_v58 = vsub.f32 %v2312_v38, %v2315_v57 }
0x13a2   : > { %v2317_v59 = vmul.f32 1.442695, %v2316_v58 }
0x13a4   : > { %4419 = vpow2.f32 %v2317_v59 }
0x13a6   : > { %v4418_v60 = vpop.eup %4417 }
0x13a7   : > { %v2207_v61 = vsel %vm691_vm2, %v4418_v60, 0.0  ;;  %v2426_v26 = vpop.xlane.xlu0 %2425 }
0x13a8   : > { %2208 = vadd.xlane.f32.xlu1 %v2207_v61  ;;  %v2427_v8 = vsub.f32 %v2423_v43, %v2426_v26 }
0x13aa   : > { %v2428_v3 = vmul.f32 1.442695, %v2427_v8 }
0x13ae   : > { %v4420_v62 = vpop.eup %4419 }
0x13af   : > { %v2537_v63 = vpop.xlane.xlu0 %2536  ;;  %v2319_v0 = vsel %vm691_vm2, %v4420_v62, 0.0 }
0x13b0   : > { %v2538_v2 = vsub.f32 %v2534_v49, %v2537_v63  ;;  %2320 = vadd.xlane.f32.xlu0 %v2319_v0 }
0x13b2   : > { %v2539_v4 = vmul.f32 1.442695, %v2538_v2 }
0x13b4   : > { %4421 = vpow2.f32 %v2539_v4 }
0x13b5   : > { %4423 = vpow2.f32 %v2428_v3 }
0x13b9   : > { %2213 = vrot.lane.b32.xlu1 %v5009_v14, %s5432_s5  ;;  %s5440_s5 = sld [smem:[#allocation9_spill]] }
0x13be   : > { %v4422_v5 = vpop.eup %4421 }
0x13bf   : > { %v2541_v6 = vsel %vm691_vm2, %v4422_v5, 0.0  ;;  %v4424_v10 = vpop.eup %4423 }
0x13c0   : > { %2542 = vadd.xlane.f32.xlu0 %v2541_v6  ;;  %v2430_v12 = vsel %vm691_vm2, %v4424_v10, 0.0 }
0x13d6   : > { %2325 = vrot.lane.b32.xlu0 %v5009_v14, %s5433_s8  ;;  %s5443_s8 = sld [smem:[#allocation22_spill]] }
0x13dd   : > { %2431 = vadd.xlane.f32.xlu1 %v2430_v12  ;;  %v4365_v12 = vld [vmem:[%s5339_s7 + $0x10] sm:$0xff]  }
0x13ee   : > { %2436 = vrot.lane.b32.xlu1 %v5009_v14, %s5434_s3 }
0x13f2   : > { %2547 = vrot.lane.b32.xlu1 %v5009_v14, %s5435_s20  ;;  %s4535_s20 = smov [#allocation2]  }
0x1435   : > { %v2209_v13 = vpop.xlane.xlu1 %2208 }
0x1436   : > { %4425 = vrcp.f32 %v2209_v13  ;;  %v4367_v13 = vld [vmem:[%s5338_s6 + $0x10] sm:$0xff]  }
0x1439   : > { %v2214_v15 = vpop.permute.xlu1 %2213 }
0x143a   : > { %v2219_v16 = vsel %vm756_vm4, %v2214_v15, 0  ;;  %v4368_v15 = vld [vmem:[%s5338_s6 + $0x18] sm:$0xff]  }
0x143b   : > { %4141 = vmatpush3.bf16.msra.mxu0 %v2219_v16 }
0x143c   : > { %4152 = vmatprep.subr.bf16.mxu0 %v4519_v1 }
0x143d   : > { %v2321_v18 = vpop.xlane.xlu0 %2320 }
0x143e   : > { %4427 = vrcp.f32 %v2321_v18 }
0x1440   : > { %v4426_v17 = vpop.eup %4425 }
0x1441   : > { %v2211_v19 = vmul.f32 %v4426_v17, %v4418_v60 }
0x1443   : > { %v2212_v20 = vpack.c.bf16 %v2211_v19, %v2211_v19  ;;  %v3786_v19 = vld [vmem:[%s5336_s4 + $0x1] ss:$0 sm:$0xff] }
0x1445   : > { %4143 = vmatmul.mubr.msk.bf16.vlgmr.msra.gmra.mrb[48].mxu0 %vm691_vm2, %v2212_v20 }
0x1446   : > { %4154 = vmatprep.mubr.msk.bf16.mxu0 %vm4520_vm0, %v4519_v1 }
0x1448   : > { %v4428_v7 = vpop.eup %4427 }
0x1449   : > { %v2323_v22 = vmul.f32 %v4428_v7, %v4420_v62  ;;  %v3787_v7 = vld [vmem:[%s5436_s1 + $0x1] ss:$0 sm:$0xff]  ;;  %s4459_s1 = sshll.u32 %s4535_s20, 4  ;;  %s4460_s1 = int_to_ptr.vmem [resolvable:$false] %s4459_s1 }
0x144b   : > { %v2324_v21 = vpack.c.bf16 %v2323_v22, %v2323_v22 }
0x144d   : > { %v2543_v14 = vpop.xlane.xlu0 %2542 }
0x1451   : > { %v2326_v23 = vpop.permute.xlu0 %2325 }
0x1452   : > { %v2331_v25 = vsel %vm756_vm4, %v2326_v23, 0 }
0x1453   : > { %4153 = vmatpush3.bf16.msra.mxu0 %v2331_v25 }
0x1454   : > { %4164 = vmatprep.subr.bf16.mxu0 %v4519_v1 }
0x1456   : > { %4155 = vmatmul.mubr.msk.bf16.vlgmr.msra.gmra.mrb[52].mxu0 %vm691_vm2, %v2324_v21 }
0x1457   : > { %4166 = vmatprep.mubr.msk.bf16.mxu0 %vm4520_vm0, %v4519_v1 }
0x146a   : > { %v2432_v27 = vpop.xlane.xlu1 %2431 }
0x146b   : > { %4429 = vrcp.f32 %v2432_v27 }
0x146c   : > { %4431 = vrcp.f32 %v2543_v14 }
0x146e   : > { %v2437_v28 = vpop.permute.xlu1 %2436 }
0x146f   : > { %v2442_v29 = vsel %vm756_vm4, %v2437_v28, 0 }
0x1470   : > { %4165 = vmatpush3.bf16.msra.mxu0 %v2442_v29 }
0x1471   : > { %4176 = vmatprep.subr.bf16.mxu0 %v4519_v1 }
0x1472   : > { %v2548_v32 = vpop.permute.xlu1 %2547 }
0x1473   : > { %v2553_v35 = vsel %vm756_vm4, %v2548_v32, 0 }
0x1475   : > { %v4430_v30 = vpop.eup %4429 }
0x1476   : > { %v2434_v31 = vmul.f32 %v4430_v30, %v4424_v10  ;;  %v4432_v34 = vpop.eup %4431 }
0x1477   : > { %v2545_v36 = vmul.f32 %v4432_v34, %v4422_v5 }
0x1478   : > { %v2435_v33 = vpack.c.bf16 %v2434_v31, %v2434_v31 }
0x1479   : > { %v2546_v37 = vpack.c.bf16 %v2545_v36, %v2545_v36 }
0x147a   : > { %4167 = vmatmul.mubr.msk.bf16.vlgmr.msra.gmra.mrb[56].mxu0 %vm691_vm2, %v2435_v33 }
0x147b   : > { %4177 = vmatpush3.bf16.msra.mxu0 %v2553_v35  ;;  %4178 = vmatprep.mubr.msk.bf16.mxu0 %vm4520_vm0, %v4519_v1 }
0x147c   : > { %4190 = vmatprep.subr.bf16.mxu0 %v4519_v1 }
0x1482   : > { %4179 = vmatmul.mubr.msk.bf16.vlgmr.msra.gmra.mrb[60].mxu0 %vm691_vm2, %v2546_v37 }
0x1483   : > { %4194 = vmatprep.mubr.msk.bf16.mxu0 %vm4520_vm0, %v4519_v1  ;;  %4191 = vmatpush3.bf16.msra.mxu0 %v4367_v13 }
0x1484   : > { %4192 = vmatprep.subr.bf16.mxu0 %v4519_v1 }
0x1487   : > { %4193 = vmatpush3.bf16.msra.mxu0 %v4368_v15 }
0x1488   : > { %4206 = vmatprep.subr.bf16.mxu0 %v4519_v1 }
0x1518   : > { %v2255_v38 = vpop.f32.mrb[48].mxu0 }
0x1519   : > { %v4144_v39 = vpop.f32.mrb[49].mxu0 }
0x151a   : > { %v2258_v24 = vpop.f32.mrb[50].mxu0 }
0x151b   : > { %v4145_v40 = vpop.f32.mrb[51].mxu0 }
0x1529   : > { %v2367_v41 = vpop.f32.mrb[52].mxu0 }
0x152a   : > { %2596 = vrot.lane.b32.xlu0 %v2367_v41, %s5429_s2  ;;  %v4156_v42 = vpop.f32.mrb[53].mxu0 }
0x152b   : > { %v2370_v43 = vpop.f32.mrb[54].mxu0 }
0x152c   : > { %v4157_v44 = vpop.f32.mrb[55].mxu0 }
0x154d   : > { %v2478_v47 = vpop.f32.mrb[56].mxu0 }
0x154e   : > { %2600 = vrot.lane.b32.xlu1 %v2478_v47, %s5430_s18  ;;  %v4168_v48 = vpop.f32.mrb[57].mxu0 }
0x154f   : > { %v2481_v49 = vpop.f32.mrb[58].mxu0 }
0x1550   : > { %v4169_v50 = vpop.f32.mrb[59].mxu0 }
0x1555   : > { %v2589_v51 = vpop.f32.mrb[60].mxu0 }
0x1556   : > { %2604 = vrot.lane.b32.xlu0 %v2589_v51, %s5431_s28  ;;  %v4180_v52 = vpop.f32.mrb[61].mxu0 }
0x1557   : > { %v2592_v53 = vpop.f32.mrb[62].mxu0 }
0x1558   : > { %v4181_v54 = vpop.f32.mrb[63].mxu0 }
0x159c   : > { %v2597_v55 = vpop.permute.xlu0 %2596 }
0x159d   : > { %v2607_v57 = vsel %vm691_vm2, %v2255_v38, %v2597_v55 }
0x15c0   : > { %v2601_v56 = vpop.permute.xlu1 %2600 }
0x15c1   : > { %v2608_v58 = vsel %vm1147_vm5, %v2607_v57, %v2601_v56 }
0x15c8   : > { %v2605_v59 = vpop.permute.xlu0 %2604 }
0x15c9   : > { %v2609_v60 = vsel %vm1149_vm6, %v2608_v58, %v2605_v59 }
0x15ca   : > { %v2610_v61 = vpack.c.bf16 %v2609_v60, %v2609_v60 }
0x15cc   : > { %4187 = vmatmul.mubr.msk.bf16.vlgmr.msra.gmra.mrb[64].mxu1 %vm641_vm1, %v2610_v61 }
0x15cd   : > { %4202 = vmatprep.mubr.msk.bf16.mxu1 %vm4520_vm0, %v4519_v1  ;;  %4199 = vmatpush3.bf16.msra.mxu1 %v4365_v12 }
0x15ce   : > { %4200 = vmatprep.subr.bf16.mxu1 %v4519_v1 }
0x169f   : > { %v2665_v26 = vpop.f32.mrb[64].mxu1 }
0x16a0   : > { %v2666_v62 = vadd.f32 %v2665_v26, %v5002_v9  ;;  %v4188_v63 = vpop.f32.mrb[65].mxu1  ;;  %v4366_v9 = vld [vmem:[%s5339_s7 + $0x18] sm:$0xff]  }
0x16a1   : > { %v2668_v0 = vpop.f32.mrb[66].mxu1  ;;  %4201 = vmatpush3.bf16.msra.mxu1 %v4366_v9 }
0x16a2   : > { %v4189_v2 = vpop.f32.mrb[67].mxu1  ;;  %v2675_v4 = vsel %vm641_vm1, %v2666_v62, 0.0  ;;  %4212 = vmatprep.subr.bf16.mxu1 %v4519_v1 }
0x16a3   : > { %2676 = vadd.xlane.f32.xlu1 %v2675_v4 }
0x16a4   : > { %4203 = vmatmul.mubr.msk.bf16.vlgmr.msra.gmra.mrb[68].mxu1 %vm641_vm1, %v4828_v11 }
0x16a5   : > { %4214 = vmatprep.mubr.msk.bf16.mxu1 %vm4520_vm0, %v4519_v1 }
0x1730   : > { %v2677_v5 = vpop.xlane.xlu1 %2676 }
0x1731   : > { %v2678_v6 = vmul.f32 0.03125, %v2677_v5 }
0x1733   : > { %v2679_v8 = vsub.f32 %v2666_v62, %v2678_v6 }
0x1735   : > { %v2680_v3 = vmul.f32 %v2679_v8, %v2679_v8 }
0x1737   : > { %v2681_v10 = vsel %vm641_vm1, %v2680_v3, 0.0 }
0x1738   : > { %2682 = vadd.xlane.f32.xlu0 %v2681_v10 }
0x1777   : > { %v2815_v25 = vpop.f32.mrb[68].mxu1 }
0x1778   : > { %v5139_v21 = vpack.c.bf16 %v2815_v25, %v2815_v25  ;;  %v4204_v27 = vpop.f32.mrb[69].mxu1 }
0x1779   : > { %v2818_v28 = vpop.f32.mrb[70].mxu1 }
0x177a   : > { %v4205_v29 = vpop.f32.mrb[71].mxu1  ;;  %2933 = vrot.lane.b32.xlu0 %v5139_v21, %s5421_s25  ;;  %v2827_v30 = vsel %vm691_vm2, %v5139_v21, 0 }
0x17c5   : > { %v2683_v16 = vpop.xlane.xlu0 %2682 }
0x17c6   : > { %v2684_v17 = vmul.f32 0.03125, %v2683_v16 }
0x17c8   : > { %v2685_v11 = vadd.f32 1e-05, %v2684_v17 }
0x17ca   : > { %4433 = vrsqrt.f32 %v2685_v11 }
0x17d4   : > { %v4434_v18 = vpop.eup %4433 }
0x17d5   : > { %v2687_v20 = vmul.f32 %v4434_v18, %v2679_v8 }
0x17d7   : > { %v2694_v14 = vmul.f32 %v3786_v19, %v2687_v20 }
0x17d9   : > { %v5132_v22 = vadd.f32 %v3787_v7, %v2694_v14 }
0x17db   : > { %v2702_v23 = vpack.c.bf16 %v5132_v22, %v5132_v22 }
0x17dd   : > { %4195 = vmatmul.mubr.msk.bf16.vlgmr.msra.gmra.mrb[64].mxu0 %vm641_vm1, %v2702_v23 }
0x17de   : > { %4208 = vmatprep.mubr.msk.bf16.mxu0 %vm4520_vm0, %v4519_v1  ;;  %4207 = vmatpush3.bf16.xpose.msra.mxu0 %v2827_v30 }
0x17df   : > { %4218 = vmatprep.subr.bf16.mxu0 %v4519_v1 }
0x17ec   : > { %v2934_v34 = vpop.permute.xlu0 %2933 }
0x17ed   : > { %v2939_v38 = vsel %vm691_vm2, %v2934_v34, 0 }
0x18b0   : > { %v2757_v31 = vpop.f32.mrb[64].mxu0 }
0x18b1   : > { %v2763_v32 = vmul.f32 0.17677669, %v2757_v31  ;;  %v4196_v33 = vpop.f32.mrb[65].mxu0 }
0x18b2   : > { %v2760_v35 = vpop.f32.mrb[66].mxu0 }
0x18b3   : > { %v2821_v36 = vpack.c.bf16 %v2763_v32, %v2763_v32  ;;  %v4197_v37 = vpop.f32.mrb[67].mxu0 }
0x18b5   : > { %3041 = vrot.lane.b32.xlu0 %v2821_v36, %s5422_s22  ;;  %2931 = vrot.lane.b32.xlu1 %v2821_v36, %s5421_s25  ;;  %s604_s25 = sand.u32 1, %s5439_s30  }
0x18b6   : > { %4209 = vmatmul.mubr.msk.bf16.vlgmr.msra.gmra.mrb[68].mxu0 %vm691_vm2, %v2821_v36  ;;  %s3624_s30 = scalar_lea.sflag [#allocation3], %s604_s25 }
0x18b7   : > { %4219 = vmatpush3.bf16.xpose.msra.mxu0 %v2939_v38  ;;  %4220 = vmatprep.mubr.msk.bf16.mxu0 %vm4520_vm0, %v4519_v1 }
0x18b8   : > { %4230 = vmatprep.subr.bf16.mxu0 %v4519_v1 }
0x18b9   : > { %3151 = vrot.lane.b32.xlu0 %v2821_v36, %s5423_s26  ;;  %3043 = vrot.lane.b32.xlu1 %v5139_v21, %s5422_s22  ;;  %s3712_s22 = sshll.u32 %s604_s25, 3 }
0x18bd   : > { %3153 = vrot.lane.b32.xlu1 %v5139_v21, %s5423_s26  ;;  %s5437_s26 = sld [smem:[#allocation19_spill]] }
0x1927   : > { %v2932_v39 = vpop.permute.xlu1 %2931  ;;  %v3042_v42 = vpop.permute.xlu0 %3041 }
0x1928   : > { %4221 = vmatmul.mubr.msk.bf16.vlgmr.msra.gmra.mrb[72].mxu0 %vm691_vm2, %v2932_v39 }
0x1929   : > { %4232 = vmatprep.mubr.msk.bf16.mxu0 %vm4520_vm0, %v4519_v1 }
0x192b   : > { %v3044_v24 = vpop.permute.xlu1 %3043  ;;  %v3152_v44 = vpop.permute.xlu0 %3151 }
0x192c   : > { %v3049_v40 = vsel %vm691_vm2, %v3044_v24, 0 }
0x192d   : > { %4231 = vmatpush3.bf16.xpose.msra.mxu0 %v3049_v40 }
0x192e   : > { %4242 = vmatprep.subr.bf16.mxu0 %v4519_v1 }
0x192f   : > { %v3154_v41 = vpop.permute.xlu1 %3153 }
0x1930   : > { %v3159_v43 = vsel %vm691_vm2, %v3154_v41, 0 }
0x1934   : > { %4233 = vmatmul.mubr.msk.bf16.vlgmr.msra.gmra.mrb[76].mxu0 %vm691_vm2, %v3042_v42 }
0x1935   : > { %4243 = vmatpush3.bf16.xpose.msra.mxu0 %v3159_v43  ;;  %4244 = vmatprep.mubr.msk.bf16.mxu0 %vm4520_vm0, %v4519_v1 }
0x1936   : > { %4254 = vmatprep.subr.bf16.mxu0 %v4519_v1 }
0x193c   : > { %4245 = vmatmul.mubr.msk.bf16.vlgmr.msra.gmra.mrb[80].mxu0 %vm691_vm2, %v3152_v44 }
0x193d   : > { %4258 = vmatprep.mubr.msk.bf16.mxu0 %vm4520_vm0, %v4519_v1 }
0x1989   : > { %v2863_v45 = vpop.f32.mrb[68].mxu0 }
0x198a   : > { %v4210_v46 = vpop.f32.mrb[69].mxu0  ;;  %v2869_v47 = vsel %vm691_vm2, %v2863_v45, -inf }
0x198b   : > { %2870 = vmax.xlane.f32.xlu1 %v2869_v47  ;;  %v2866_v48 = vpop.f32.mrb[70].mxu0 }
0x198c   : > { %v4211_v49 = vpop.f32.mrb[71].mxu0 }
0x19fb   : > { %v2975_v50 = vpop.f32.mrb[72].mxu0 }
0x19fc   : > { %v4222_v51 = vpop.f32.mrb[73].mxu0  ;;  %v2981_v52 = vsel %vm691_vm2, %v2975_v50, -inf }
0x19fd   : > { %2982 = vmax.xlane.f32.xlu0 %v2981_v52  ;;  %v2978_v53 = vpop.f32.mrb[74].mxu0 }
0x19fe   : > { %v4223_v54 = vpop.f32.mrb[75].mxu0 }
0x1a07   : > { %v3085_v55 = vpop.f32.mrb[76].mxu0 }
0x1a08   : > { %v4234_v56 = vpop.f32.mrb[77].mxu0  ;;  %v3091_v57 = vsel %vm691_vm2, %v3085_v55, -inf }
0x1a09   : > { %3092 = vmax.xlane.f32.xlu0 %v3091_v57  ;;  %v3088_v58 = vpop.f32.mrb[78].mxu0  ;;  %v4370_v56 = vld [vmem:[%s5437_s26 + $0x18] sm:$0xff]  }
0x1a0a   : > { %v4235_v59 = vpop.f32.mrb[79].mxu0 }
0x1a0f   : > { %v3195_v60 = vpop.f32.mrb[80].mxu0 }
0x1a10   : > { %v4246_v61 = vpop.f32.mrb[81].mxu0  ;;  %v3201_v26 = vsel %vm691_vm2, %v3195_v60, -inf }
0x1a11   : > { %3202 = vmax.xlane.f32.xlu1 %v3201_v26  ;;  %v3198_v62 = vpop.f32.mrb[82].mxu0 }
0x1a12   : > { %v4247_v63 = vpop.f32.mrb[83].mxu0 }
0x1a18   : > { %v2871_v0 = vpop.xlane.xlu1 %2870 }
0x1a19   : > { %v2872_v2 = vsub.f32 %v2863_v45, %v2871_v0 }
0x1a1b   : > { %v2873_v4 = vmul.f32 1.442695, %v2872_v2 }
0x1a1d   : > { %4435 = vpow2.f32 %v2873_v4 }
0x1a27   : > { %v4436_v5 = vpop.eup %4435 }
0x1a28   : > { %v2875_v6 = vsel %vm691_vm2, %v4436_v5, 0.0 }
0x1a29   : > { %2876 = vadd.xlane.f32.xlu0 %v2875_v6 }
0x1a8a   : > { %v2983_v8 = vpop.xlane.xlu0 %2982 }
0x1a8b   : > { %v2984_v3 = vsub.f32 %v2975_v50, %v2983_v8 }
0x1a8d   : > { %v2985_v10 = vmul.f32 1.442695, %v2984_v3 }
0x1a8f   : > { %4437 = vpow2.f32 %v2985_v10 }
0x1a96   : > { %v3093_v12 = vpop.xlane.xlu0 %3092 }
0x1a97   : > { %v3094_v9 = vsub.f32 %v3085_v55, %v3093_v12  ;;  %v4369_v55 = vld [vmem:[%s5437_s26 + $0x10] sm:$0xff]  }
0x1a98   : > { %4255 = vmatpush3.bf16.msra.mxu0 %v4369_v55 }
0x1a99   : > { %v4438_v13 = vpop.eup %4437  ;;  %v3095_v15 = vmul.f32 1.442695, %v3094_v9  ;;  %4256 = vmatprep.subr.bf16.mxu0 %v4519_v1 }
0x1a9a   : > { %v2987_v16 = vsel %vm691_vm2, %v4438_v13, 0.0 }
0x1a9b   : > { %4439 = vpow2.f32 %v3095_v15  ;;  %2988 = vadd.xlane.f32.xlu1 %v2987_v16 }
0x1a9c   : > { %4257 = vmatpush3.bf16.msra.mxu0 %v4370_v56 }
0x1a9d   : > { %4270 = vmatprep.subr.bf16.mxu0 %v4519_v1 }
0x1a9e   : > { %v3203_v18 = vpop.xlane.xlu1 %3202 }
0x1a9f   : > { %v3204_v19 = vsub.f32 %v3195_v60, %v3203_v18 }
0x1aa1   : > { %v3205_v20 = vmul.f32 1.442695, %v3204_v19 }
0x1aa3   : > { %4441 = vpow2.f32 %v3205_v20 }
0x1aa5   : > { %v4440_v17 = vpop.eup %4439 }
0x1aa6   : > { %v3097_v11 = vsel %vm691_vm2, %v4440_v17, 0.0 }
0x1aa7   : > { %3098 = vadd.xlane.f32.xlu0 %v3097_v11 }
0x1aac   : > { %2993 = vrot.lane.b32.xlu1 %v5139_v21, %s5427_s23  ;;  %s606_s23 = scalar_lea.vmem [#allocation2], %s3712_s22  ;;  %s4461_s22 = scalar_lea.vmem %s4460_s1, 256 }
0x1aad   : > { %v4442_v7 = vpop.eup %4441 }
0x1aae   : > { %v3207_v14 = vsel %vm691_vm2, %v4442_v7, 0.0 }
0x1ab6   : > { %v2877_v23 = vpop.xlane.xlu0 %2876 }
0x1ab7   : > { %4443 = vrcp.f32 %v2877_v23  ;;  %v4374_v23 = vld [vmem:[%s5345_s13 + $0x28] sm:$0xff]  }
0x1abd   : > { %2882 = vrot.lane.b32.xlu0 %v5139_v21, %s5424_s24 }
0x1ac1   : > { %3213 = vrot.lane.b32.xlu0 %v5139_v21, %s5426_s21  ;;  %v4444_v27 = vpop.eup %4443  ;;  %s3854_s21 = sshll.u32 %s5440_s5, 7 }
0x1ac2   : > { %v2879_v29 = vmul.f32 %v4444_v27, %v4436_v5  ;;  %s5290_s3 = scalar_lea.hbm %s5443_s8, %s3854_s21 }
0x1ac4   : > { %v2880_v33 = vpack.c.bf16 %v2879_v29, %v2879_v29 }
0x1ad0   : > { %3208 = vadd.xlane.f32.xlu1 %v3207_v14  ;;  %v4373_v14 = vld [vmem:[%s5345_s13 + $0x20] sm:$0xff]  }
0x1ae1   : > { %3103 = vrot.lane.b32.xlu1 %v5139_v21, %s5425_s0  ;;  %s5441_s0 = sld [smem:[#allocation21_spill]] }
0x1b28   : > { %v2989_v25 = vpop.xlane.xlu1 %2988 }
0x1b29   : > { %4445 = vrcp.f32 %v2989_v25 }
0x1b2c   : > { %v2994_v32 = vpop.permute.xlu1 %2993 }
0x1b2d   : > { %v2999_v35 = vsel %vm756_vm4, %v2994_v32, 0  ;;  %v3820_v32 = vld [vmem:[%s5342_s10 + $0x1] ss:$0 sm:$0xff] }
0x1b33   : > { %v4446_v34 = vpop.eup %4445 }
0x1b34   : > { %v3099_v28 = vpop.xlane.xlu0 %3098  ;;  %v2991_v21 = vmul.f32 %v4446_v34, %v4438_v13 }
0x1b35   : > { %4447 = vrcp.f32 %v3099_v28 }
0x1b36   : > { %v2992_v36 = vpack.c.bf16 %v2991_v21, %v2991_v21  ;;  %v4375_v21 = vld [vmem:[%s5345_s13 + $0x30] sm:$0xff]  }
0x1b38   : > { %v2883_v30 = vpop.permute.xlu0 %2882 }
0x1b39   : > { %v2888_v31 = vsel %vm756_vm4, %v2883_v30, 0  ;;  %v3819_v30 = vld [vmem:[%s5341_s9 + $0x1] ss:$0 sm:$0xff] }
0x1b3a   : > { %4213 = vmatpush3.bf16.msra.mxu1 %v2888_v31 }
0x1b3b   : > { %4224 = vmatprep.subr.bf16.mxu1 %v4519_v1 }
0x1b3c   : > { %v3214_v41 = vpop.permute.xlu0 %3213 }
0x1b3d   : > { %4215 = vmatmul.mubr.msk.bf16.vlgmr.msra.gmra.mrb[72].mxu1 %vm691_vm2, %v2880_v33  ;;  %v3219_v43 = vsel %vm756_vm4, %v3214_v41, 0 }
0x1b3e   : > { %4225 = vmatpush3.bf16.msra.mxu1 %v2999_v35  ;;  %4226 = vmatprep.mubr.msk.bf16.mxu1 %vm4520_vm0, %v4519_v1 }
0x1b3f   : > { %4236 = vmatprep.subr.bf16.mxu1 %v4519_v1  ;;  %v4448_v37 = vpop.eup %4447 }
0x1b40   : > { %v3101_v39 = vmul.f32 %v4448_v37, %v4440_v17  ;;  %v3826_v37 = vld [vmem:[%s5344_s12 + $0x1] ss:$0 sm:$0xff] }
0x1b42   : > { %v3102_v42 = vpack.c.bf16 %v3101_v39, %v3101_v39 }
0x1b45   : > { %4227 = vmatmul.mubr.msk.bf16.vlgmr.msra.gmra.mrb[76].mxu1 %vm691_vm2, %v2992_v36  ;;  %v4376_v36 = vld [vmem:[%s5345_s13 + $0x38] sm:$0xff]  }
0x1b46   : > { %4238 = vmatprep.mubr.msk.bf16.mxu1 %vm4520_vm0, %v4519_v1 }
0x1b5d   : > { %v3209_v38 = vpop.xlane.xlu1 %3208 }
0x1b5e   : > { %4449 = vrcp.f32 %v3209_v38 }
0x1b61   : > { %v3104_v24 = vpop.permute.xlu1 %3103 }
0x1b62   : > { %v3109_v40 = vsel %vm756_vm4, %v3104_v24, 0 }
0x1b63   : > { %4237 = vmatpush3.bf16.msra.mxu1 %v3109_v40 }
0x1b64   : > { %4248 = vmatprep.subr.bf16.mxu1 %v4519_v1 }
0x1b66   : > { %4239 = vmatmul.mubr.msk.bf16.vlgmr.msra.gmra.mrb[80].mxu1 %vm691_vm2, %v3102_v42 }
0x1b67   : > { %4249 = vmatpush3.bf16.msra.mxu1 %v3219_v43  ;;  %4250 = vmatprep.mubr.msk.bf16.mxu1 %vm4520_vm0, %v4519_v1 }
0x1b68   : > { %v4450_v44 = vpop.eup %4449  ;;  %4262 = vmatprep.subr.bf16.mxu1 %v4519_v1 }
0x1b69   : > { %v3211_v45 = vmul.f32 %v4450_v44, %v4442_v7  ;;  %v4371_v7 = vld [vmem:[%s5343_s11 + $0x10] sm:$0xff]   ;;  %v3839_v44 = vld [vmem:[%s5346_s14 + $0x1] ss:$0 sm:$0xff] }
0x1b6b   : > { %v3212_v46 = vpack.c.bf16 %v3211_v45, %v3211_v45 }
0x1b6e   : > { %4251 = vmatmul.mubr.msk.bf16.vlgmr.msra.gmra.mrb[84].mxu1 %vm691_vm2, %v3212_v46 }
0x1b6f   : > { %4266 = vmatprep.mubr.msk.bf16.mxu1 %vm4520_vm0, %v4519_v1  ;;  %4263 = vmatpush3.bf16.msra.mxu1 %v4371_v7 }
0x1b70   : > { %4264 = vmatprep.subr.bf16.mxu1 %v4519_v1 }
0x1c10   : > { %v2924_v47 = vpop.f32.mrb[72].mxu1 }
0x1c11   : > { %v4216_v48 = vpop.f32.mrb[73].mxu1 }
0x1c12   : > { %v2927_v49 = vpop.f32.mrb[74].mxu1 }
0x1c13   : > { %v4217_v50 = vpop.f32.mrb[75].mxu1 }
0x1c18   : > { %v3035_v51 = vpop.f32.mrb[76].mxu1 }
0x1c19   : > { %3262 = vrot.lane.b32.xlu1 %v3035_v51, %s5429_s2  ;;  %v4228_v52 = vpop.f32.mrb[77].mxu1  ;;  %s3637_s2 = sshll.u32 %s606_s23, 4  ;;  %s5292_s2 = int_to_ptr.vmem [resolvable:$true] %s3637_s2 }
0x1c1a   : > { %v3038_v53 = vpop.f32.mrb[78].mxu1  ;;  %s4455_s5 = scalar_lea.vmem %s5292_s2, 128  ;;  %p4462_p0 = scmp.lt.s32.totalorder %s5292_s2, %s4460_s1 }
0x1c1b   : > { %v4229_v54 = vpop.f32.mrb[79].mxu1  ;;  %p4456_p11 = scmp.ne.s32.totalorder %s5292_s2, %s4455_s5  ;;  %p4463_p1 = scmp.lt.s32.totalorder %s4461_s22, %s4455_s5 }
0x1c1d   : > { %p4457_p12 = pnand %p4456_p11, %p4674_p5  ;;  %p4464_p2 = por %p4463_p1, %p4462_p0 }
0x1c1f   : > { %p4458_p13 = pneg %p4457_p12 }
0x1c21   : > { %p4465_p3 = pnand %p4464_p2, %p4458_p13 }
0x1c39   : > { %v3145_v57 = vpop.f32.mrb[80].mxu1 }
0x1c3a   : > { %3266 = vrot.lane.b32.xlu0 %v3145_v57, %s5430_s18  ;;  %v4240_v58 = vpop.f32.mrb[81].mxu1 }
0x1c3b   : > { %v3148_v59 = vpop.f32.mrb[82].mxu1 }
0x1c3c   : > { %v4241_v60 = vpop.f32.mrb[83].mxu1 }
0x1c41   : > { %v3255_v61 = vpop.f32.mrb[84].mxu1 }
0x1c42   : > { %3270 = vrot.lane.b32.xlu1 %v3255_v61, %s5431_s28  ;;  %v4252_v26 = vpop.f32.mrb[85].mxu1  ;;  %s5438_s28 = sld [smem:[#allocation20_spill]] }
0x1c43   : > { %v3258_v62 = vpop.f32.mrb[86].mxu1 }
0x1c44   : > { %v4253_v63 = vpop.f32.mrb[87].mxu1  ;;  %v3847_v62 = vld [vmem:[%s5347_s15 + $0x1] ss:$0 sm:$0xff] }
0x1c48   : > { %v4377_v57 = vld [vmem:[%s5438_s28] sm:$0xff]   ;;  %v4378_v58 = vld [vmem:[%s5438_s28 + $0x8] sm:$0xff]  }
0x1c8b   : > { %v3263_v0 = vpop.permute.xlu1 %3262 }
0x1c8c   : > { %v3273_v4 = vsel %vm691_vm2, %v2924_v47, %v3263_v0  ;;  %v3848_v0 = vld [vmem:[%s5348_s16 + $0x1] ss:$0 sm:$0xff] }
0x1cac   : > { %v3267_v2 = vpop.permute.xlu0 %3266 }
0x1cad   : > { %v3274_v5 = vsel %vm1147_vm5, %v3273_v4, %v3267_v2 }
0x1cb4   : > { %v3271_v6 = vpop.permute.xlu1 %3270 }
0x1cb5   : > { %v3275_v8 = vsel %vm1149_vm6, %v3274_v5, %v3271_v6 }
0x1cb6   : > { %v3276_v3 = vpack.c.bf16 %v3275_v8, %v3275_v8 }
0x1cb8   : > { %4259 = vmatmul.mubr.msk.bf16.vlgmr.msra.gmra.mrb[84].mxu0 %vm641_vm1, %v3276_v3 }
0x1cb9   : > { %4278 = vmatprep.mubr.msk.bf16.mxu0 %vm4520_vm0, %v4519_v1  ;;  %4271 = vmatpush3.bf16.msra.mxu0 %v4373_v14 }
0x1cba   : > { %4272 = vmatprep.subr.bf16.mxu0 %v4519_v1 }
0x1cbd   : > { %4273 = vmatpush3.bf16.msra.mxu0 %v4374_v23 }
0x1cbe   : > { %4274 = vmatprep.subr.bf16.mxu0 %v4519_v1 }
0x1cc1   : > { %4275 = vmatpush3.bf16.msra.mxu0 %v4375_v21 }
0x1cc2   : > { %4276 = vmatprep.subr.bf16.mxu0 %v4519_v1 }
0x1cc5   : > { %4277 = vmatpush3.bf16.msra.mxu0 %v4376_v36 }
0x1d8b   : > { %v3331_v10 = vpop.f32.mrb[84].mxu0 }
0x1d8c   : > { %v3332_v12 = vadd.f32 %v3331_v10, %v5132_v22  ;;  %v4260_v9 = vpop.f32.mrb[85].mxu0  ;;  %v4372_v22 = vld [vmem:[%s5343_s11 + $0x18] sm:$0xff]  }
0x1d8d   : > { %v3334_v13 = vpop.f32.mrb[86].mxu0  ;;  %4265 = vmatpush3.bf16.msra.mxu1 %v4372_v22 }
0x1d8e   : > { %v4261_v15 = vpop.f32.mrb[87].mxu0  ;;  %v3341_v16 = vsel %vm641_vm1, %v3332_v12, 0.0  ;;  %4282 = vmatprep.subr.bf16.mxu1 %v4519_v1 }
0x1d8f   : > { %3342 = vadd.xlane.f32.xlu0 %v3341_v16 }
0x1e1c   : > { %v3343_v17 = vpop.xlane.xlu0 %3342 }
0x1e1d   : > { %v3344_v11 = vmul.f32 0.03125, %v3343_v17 }
0x1e1f   : > { %v3345_v18 = vsub.f32 %v3332_v12, %v3344_v11 }
0x1e21   : > { %v3346_v19 = vmul.f32 %v3345_v18, %v3345_v18 }
0x1e23   : > { %v3347_v20 = vsel %vm641_vm1, %v3346_v19, 0.0 }
0x1e24   : > { %3348 = vadd.xlane.f32.xlu1 %v3347_v20 }
0x1eb1   : > { %v3349_v25 = vpop.xlane.xlu1 %3348 }
0x1eb2   : > { %v3350_v27 = vmul.f32 0.03125, %v3349_v25 }
0x1eb4   : > { %v3351_v28 = vadd.f32 1e-05, %v3350_v27 }
0x1eb6   : > { %4451 = vrsqrt.f32 %v3351_v28 }
0x1ec0   : > { %v4452_v29 = vpop.eup %4451 }
0x1ec1   : > { %v3353_v31 = vmul.f32 %v4452_v29, %v3345_v18 }
0x1ec3   : > { %v3360_v33 = vmul.f32 %v3819_v30, %v3353_v31 }
0x1ec5   : > { %v3367_v34 = vadd.f32 %v3820_v32, %v3360_v33 }
0x1ec7   : > { %v3368_v35 = vpack.c.bf16 %v3367_v34, %v3367_v34 }
0x1ec9   : > { %4267 = vmatmul.mubr.msk.bf16.vlgmr.msra.gmra.mrb[88].mxu1 %vm641_vm1, %v3368_v35 }
0x1eca   : > { %4286 = vmatprep.mubr.msk.bf16.mxu1 %vm4520_vm0, %v4519_v1  ;;  %4283 = vmatpush3.bf16.msra.mxu1 %v4377_v57 }
0x1ecb   : > { %4284 = vmatprep.subr.bf16.mxu1 %v4519_v1  ;;  %v3849_v1 = vld [vmem:[%s5441_s0] ss:$0 sm:$0xff] }
0x1ece   : > { %4285 = vmatpush3.bf16.msra.mxu1 %v4378_v58 }
0x1f9c   : > { %v3431_v38 = vpop.f32.mrb[88].mxu1 }
0x1f9d   : > { %v3432_v39 = vadd.f32 %v3826_v37, %v3431_v38  ;;  %v4268_v24 = vpop.f32.mrb[89].mxu1 }
0x1f9e   : > { %v3434_v40 = vpop.f32.mrb[90].mxu1 }
0x1f9f   : > { %v3437_v41 = vmax.f32 %v3432_v39, 0.0  ;;  %v4269_v42 = vpop.f32.mrb[91].mxu1 }
0x1fa1   : > { %v3438_v43 = vpack.c.bf16 %v3437_v41, %v3437_v41 }
0x1fa3   : > { %4279 = vmatmul.mubr.msk.bf16.vlgmr.msra.gmra.mrb[88].mxu0 %vm2013_vm7, %v3438_v43 }
0x2076   : > { %v3517_v45 = vpop.f32.mrb[88].mxu0 }
0x2077   : > { %v3518_v46 = vadd.f32 %v3839_v44, %v3517_v45  ;;  %v4280_v47 = vpop.f32.mrb[89].mxu0 }
0x2078   : > { %v3520_v48 = vpop.f32.mrb[90].mxu0 }
0x2079   : > { %v4281_v49 = vpop.f32.mrb[91].mxu0  ;;  %v3523_v50 = vadd.f32 %v3518_v46, %v3367_v34 }
0x207b   : > { %v3528_v51 = vsel %vm641_vm1, %v3523_v50, 0.0 }
0x207c   : > { %3529 = vadd.xlane.f32.xlu0 %v3528_v51 }
0x2109   : > { %v3530_v52 = vpop.xlane.xlu0 %3529 }
0x210a   : > { %v3531_v53 = vmul.f32 0.03125, %v3530_v52 }
0x210c   : > { %v3532_v54 = vsub.f32 %v3523_v50, %v3531_v53 }
0x210e   : > { %v3533_v55 = vmul.f32 %v3532_v54, %v3532_v54 }
0x2110   : > { %v3534_v56 = vsel %vm641_vm1, %v3533_v55, 0.0 }
0x2111   : > { %3535 = vadd.xlane.f32.xlu0 %v3534_v56 }
0x219e   : > { %v3536_v59 = vpop.xlane.xlu0 %3535 }
0x219f   : > { %v3537_v60 = vmul.f32 0.03125, %v3536_v59 }
0x21a1   : > { %v3538_v61 = vadd.f32 1e-05, %v3537_v60 }
0x21a3   : > { %4453 = vrsqrt.f32 %v3538_v61 }
0x21ad   : > { %v4454_v26 = vpop.eup %4453 }
0x21ae   : > { %v3540_v63 = vmul.f32 %v4454_v26, %v3532_v54 }
0x21b0   : > { %v3547_v2 = vmul.f32 %v3847_v62, %v3540_v63 }
0x21b2   : > { %v3554_v4 = vadd.f32 %v3848_v0, %v3547_v2 }
0x21b4   : > { %v3555_v5 = vpack.c.bf16 %v3554_v4, %v3554_v4 }
0x21b6   : > { %4287 = vmatmul.mubr.msk.bf16.vlgmr.msra.gmra.mrb[92].mxu1 %vm641_vm1, %v3555_v5 }
0x2289   : > { %v3616_v6 = vpop.f32.mrb[92].mxu1 }
0x228a   : > { %v3617_v8 = vadd.f32 %v3849_v1, %v3616_v6  ;;  %v4288_v3 = vpop.f32.mrb[93].mxu1 }
0x228b   : > { %v3619_v10 = vpop.f32.mrb[94].mxu1 }
0x228c   : > { %3622 = vst [vmem:[%s606_s23] sm:$0xff] %v3617_v8  ;;  %v4289_v12 = vpop.f32.mrb[95].mxu1 }
0x228d   : > { %4468 = shalt.err (!%p4465_p3)
}
0x228e   : > { %s4469_s25 = scalar_lea.hbm %s5290_s3, 128  ;;  %s4473_s0 = scalar_lea.hbm %s5443_s8, 256 }
0x228f   : > { %p4470_p4 = scmp.ne.s32.totalorder %s5290_s3, %s4469_s25  ;;  %p4474_p9 = scmp.lt.u32.totalorder %s5290_s3, %s5443_s8 }
0x2290   : > { %p4475_p10 = scmp.lt.u32.totalorder %s4473_s0, %s4469_s25  ;;  %p4477_p12 = scmp.lt.u32.totalorder %s4469_s25, %s5290_s3 }
0x2291   : > { %p4471_p7 = pnand %p4470_p4, %p4674_p5 }
0x2292   : > { %p4476_p11 = por %p4475_p10, %p4474_p9 }
0x2293   : > { %p4472_p8 = pneg %p4471_p7 }
0x2294   : > { %p4478_p13 = por %p4477_p12, %p4476_p11 }
0x2296   : > { %p4479_p0 = pnand %p4478_p13, %p4472_p8 }
0x2298   : > { %4482 = shalt.err (!%p4479_p0)
}
0x2299   : > { %4290 = dma.vmem_to_hbm [thread:$0]  (%p4674_p5), %s5292_s2, 128, %s5290_s3, %s3624_s30  }
0x229a PF: > { %s5444_s19 = sld [smem:[#allocation8_spill]]  ;;  %s5445_s17 = sld [smem:[#allocation5_spill]] }
0x22a0   : > { %p4296_p1 = scmp.ge.s32.totalorder %s5444_s19, 2  ;;  %s3649_s20 = sand.u32 1, %s5445_s17  }
0x22a1   : > { %s3650_s1 = scalar_lea.sflag [#allocation3], %s3649_s20 }
0x22a2   : > { %p4293_p2 = pnand %p4296_p1, %p4678_p6 }
0x22a4   : > { %4500 = dma.done.wait (!%p4293_p2), %s3650_s1, 128  }
0x22a5   : > { %4502 = vsyncadd (!%p4293_p2), %s3650_s1, 4294967168  ;;  %s5447_s21 = sld [smem:[#allocation10_spill]]  ;;  %s5448_s0 = sld [smem:[#allocation6_spill]] }
0x22a6   : > { %s5449_s30 = sld [smem:[#allocation7_spill]]  ;;  %s5450_s20 = sld [smem:[#allocation11_spill]] }
0x22ab   : > { %p29_p3 = scmp.ge.s32.totalorder %s5447_s21, 4  }
0x22ad   :  { %31 = sbr.rel (!%p29_p3) target bundleno = 13 (0xd), region = 149 }
0x22b4   :  { %3655 = vsyncpa [#allocation3], 1 }
0x22b5   :  { %3657 = vsyncpa [#allocation3 + $0x1], 1 }

</bundles_post_ra>
